<compile_context>
chip_gen: v5e
topology: v5e:2x2
jax: 0.10.0
libtpu: 0.0.40
codegen_flags: <defaults>
</compile_context>

<pallas_src>
import numpy as np
import jax
import jax.numpy as jnp
from jax.experimental import pallas as pl
from jax.experimental.pallas import tpu as pltpu


_EPS = 1e-8
_HALF_LOG_2PI = 0.9189385332046727
_LANCZOS_G = 7.0
_LANCZOS_COEFS = (
    0.99999999999980993,
    676.5203681218851,
    -1259.1392167224028,
    771.32342877765313,
    -176.61502916214059,
    12.507343278686905,
    -0.13857109526572012,
    9.9843695780195716e-6,
    1.5056327351493116e-7,
)


def _softplus(t):
    # Overflow-safe softplus built only from ops with Mosaic lowerings
    # (exp/log/abs/max go to EUP/VPU).
    return jnp.maximum(t, 0.0) + jnp.log(1.0 + jnp.exp(-jnp.abs(t)))


def _lgamma_pos(z):
    """log Gamma(z) for strictly positive z, branch-free.

    lax.lgamma has no Mosaic lowering, so use the Lanczos(g=7) approximation.
    Shift by 2 (lgamma(z) = lgamma(z+2) - log(z) - log(z+1)) so the Lanczos
    argument is always >= 2 and no reflection branch is needed.
    """
    shift = jnp.log(z) + jnp.log(z + 1.0)
    w = z + 1.0                       # = (z + 2) - 1, the "decremented" Lanczos arg
    acc = _LANCZOS_COEFS[0]
    for i in range(1, 9):
        acc = acc + _LANCZOS_COEFS[i] / (w + float(i))
    t = w + _LANCZOS_G + 0.5
    lg = _HALF_LOG_2PI + (w + 0.5) * jnp.log(t) - t + jnp.log(acc)
    return lg - shift


def _zinb_nll(k, m, r, pi_logit):
    """Elementwise negative ZINB log-likelihood (all-f32)."""
    sp_neg_pi = _softplus(-pi_logit)                     # -log sigmoid(pi_logit)
    log_r_m = jnp.log(r + m + _EPS)
    pi_r_log = -pi_logit + r * (jnp.log(r + _EPS) - log_r_m)

    case_zero = _softplus(pi_r_log) - sp_neg_pi
    case_nonzero = (-sp_neg_pi
                    + pi_r_log
                    + k * (jnp.log(m + _EPS) - log_r_m)
                    + _lgamma_pos(k + r)
                    - _lgamma_pos(r)
                    - _lgamma_pos(k + 1.0))
    log_prob = jnp.where(k < _EPS, case_zero, case_nonzero)
    return -log_prob


# ------------------------------ kernels --------------------------------------

def _elem_kernel(x_ref, m_ref, r_ref, pi_ref, out_ref):
    out_ref[...] = _zinb_nll(x_ref[...].astype(jnp.float32),
                             m_ref[...].astype(jnp.float32),
                             r_ref[...].astype(jnp.float32),
                             pi_ref[...].astype(jnp.float32))


def _make_reduce_kernel(total_rows, block_rows, scale):
    needs_mask = (total_rows % block_rows) != 0

    def kernel(x_ref, m_ref, r_ref, pi_ref, out_ref):
        i = pl.program_id(0)

        @pl.when(i == 0)
        def _init():
            out_ref[...] = jnp.zeros_like(out_ref)

        nll = _zinb_nll(x_ref[...].astype(jnp.float32),
                        m_ref[...].astype(jnp.float32),
                        r_ref[...].astype(jnp.float32),
                        pi_ref[...].astype(jnp.float32))
        if needs_mask:  # static: only emitted when the last row tile is padded
            rows = (jax.lax.broadcasted_iota(jnp.int32, nll.shape, 0)
                    + i * block_rows)
            nll = jnp.where(rows < total_rows, nll, 0.0)

        out_ref[...] = out_ref[...] + jnp.sum(nll)

        @pl.when(i == pl.num_programs(0) - 1)
        def _finalize():
            out_ref[...] = out_ref[...] * np.float32(scale)

    return kernel


# ------------------------------ wrapper ---------------------------------------

def zinb_loss(x, mean, r, pi_logit, reduction='sum', block_rows=None):
    """Pallas implementation of ZeroInflatedNegativeBinomialLoss.forward.

    x/mean/r/pi_logit: same shape [..., G].  reduction in {'sum','mean',None}.
    """
    orig_shape = x.shape
    G = int(orig_shape[-1])
    B = int(np.prod(orig_shape[:-1])) if len(orig_shape) > 1 else 1

    def prep(a):
        return jnp.asarray(a, jnp.float32).reshape(B, G)

    x2, m2, r2, p2 = prep(x), prep(mean), prep(r), prep(pi_logit)

    if block_rows is None:
        # Whole-array rows when small / not sublane-aligned, else 8-aligned tile.
        # Blocks stay tiny (block_rows x G x 4B x 4 inputs x 2 buffers), safe
        # under the 32 MiB scoped VMEM default on v5e/v6e/v7x.
        block_rows = B if (B <= 256 or B % 8 != 0) else 256
    tb = int(block_rows)
    nb = pl.cdiv(B, tb)

    in_specs = [pl.BlockSpec((tb, G), lambda i: (i, 0))] * 4

    if reduction is None:
        out = pl.pallas_call(
            _elem_kernel,
            out_shape=jax.ShapeDtypeStruct((B, G), jnp.float32),
            grid_spec=pltpu.PrefetchScalarGridSpec(
                num_scalar_prefetch=0,
                grid=(nb,),
                in_specs=in_specs,
                out_specs=pl.BlockSpec((tb, G), lambda i: (i, 0)),
            ),
            compiler_params=pltpu.CompilerParams(
                dimension_semantics=("parallel",)),
        )(x2, m2, r2, p2)
        return out.reshape(orig_shape)

    # 'sum'  -> mean over last dim then sum  == total_sum / G
    # 'mean' -> total_sum / (B * G)
    scale = 1.0 / (B * G) if reduction == 'mean' else 1.0 / G
    out = pl.pallas_call(
        _make_reduce_kernel(B, tb, scale),
        out_shape=jax.ShapeDtypeStruct((1, 1), jnp.float32),
        grid_spec=pltpu.PrefetchScalarGridSpec(
            num_scalar_prefetch=0,
            grid=(nb,),
            in_specs=in_specs,
            out_specs=pl.BlockSpec((1, 1), lambda i: (0, 0)),  # resident accumulator
        ),
        compiler_params=pltpu.CompilerParams(
            dimension_semantics=("arbitrary",)),  # grid axis is a reduction
    )(x2, m2, r2, p2)
    return out[0, 0]


# ------------------------------ test ------------------------------------------

if __name__ == "__main__":
    B, G = 16, 512
    root = jax.random.PRNGKey(0)
    k_cnt, k_m, k_r, k_pi = jax.random.split(root, 4)

    mean = jax.random.uniform(k_m, (B, G), jnp.float32, 0.2, 8.0)
    r = jax.random.uniform(k_r, (B, G), jnp.float32, 0.5, 4.0)
    pi_logit = jax.random.normal(k_pi, (B, G), jnp.float32)
    # integer-valued counts with plenty of exact zeros -> both ZINB branches hit
    x = jnp.floor(jax.random.uniform(k_cnt, (B, G), jnp.float32, 0.0, 6.0))

    # block_rows=8 -> grid=(2,), exercising the multi-step accumulation path.
    loss_sum = zinb_loss(x, mean, r, pi_logit, reduction='sum', block_rows=8)
    loss_mean = zinb_loss(x, mean, r, pi_logit, reduction='mean', block_rows=8)
    nll_elem = zinb_loss(x, mean, r, pi_logit, reduction=None, block_rows=8)
    jax.block_until_ready((loss_sum, loss_mean, nll_elem))

    # ---- plain-JAX reference (gammaln / jax.nn.softplus, no Pallas) ----------
    def reference_nll(k, m, rr, plog):
        from jax.scipy.special import gammaln
        sp = jax.nn.softplus
        sp_neg = sp(-plog)
        log_rm = jnp.log(rr + m + _EPS)
        pi_r_log = -plog + rr * (jnp.log(rr + _EPS) - log_rm)
        case_zero = sp(pi_r_log) - sp_neg
        case_nz = (-sp_neg + pi_r_log + k * (jnp.log(m + _EPS) - log_rm)
                   + gammaln(k + rr) - gammaln(rr) - gammaln(k + 1.0))
        return -jnp.where(k < _EPS, case_zero, case_nz)

    ref = reference_nll(x, mean, r, pi_logit)
    ref_sum = jnp.sum(jnp.mean(ref, axis=-1))
    ref_mean = jnp.mean(ref)

    np.testing.assert_allclose(np.asarray(nll_elem), np.asarray(ref),
                               rtol=2e-3, atol=5e-3)
    np.testing.assert_allclose(np.asarray(loss_sum), np.asarray(ref_sum),
                               rtol=2e-3, atol=2e-2)
    np.testing.assert_allclose(np.asarray(loss_mean), np.asarray(ref_mean),
                               rtol=2e-3, atol=5e-3)

    print("KERNEL_OK")
</pallas_src>

<mosaic_0001>
module attributes {stable_mosaic.version = 11 : i64} {
  func.func @kernel(%arg0: i32, %arg1: memref<8x512xf32, #tpu.memory_space<vmem>>, %arg2: memref<8x512xf32, #tpu.memory_space<vmem>>, %arg3: memref<8x512xf32, #tpu.memory_space<vmem>>, %arg4: memref<8x512xf32, #tpu.memory_space<vmem>>, %arg5: memref<1x1xf32, #tpu.memory_space<vmem>>) attributes {dimension_semantics = [#tpu.dimension_semantics<arbitrary>], iteration_bounds = array<i64: 2>, scalar_prefetch = 0 : i64, scratch_operands = 0 : i64, tpu.core_type = #tpu.core_type<tc>, window_params = [{transform_indices = @transform_0, window_bounds = array<i64: 8, 512>}, {transform_indices = @transform_1, window_bounds = array<i64: 8, 512>}, {transform_indices = @transform_2, window_bounds = array<i64: 8, 512>}, {transform_indices = @transform_3, window_bounds = array<i64: 8, 512>}, {pipeline_mode = #tpu.pipeline_mode<synchronous>, transform_indices = @transform_4, window_bounds = array<i64: 1, 1>}]} {
    %c0_i32 = arith.constant 0 : i32
    %0 = arith.cmpi eq, %arg0, %c0_i32 : i32
    %1 = arith.extui %0 : i1 to i32
    %c0_i32_0 = arith.constant 0 : i32
    %2 = arith.cmpi ne, %1, %c0_i32_0 : i32
    scf.if %2 {
      %cst_97 = arith.constant 0.000000e+00 : f32
      %259 = vector.broadcast %cst_97 : f32 to vector<1x1xf32>
      %c0_98 = arith.constant 0 : index
      %c0_99 = arith.constant 0 : index
      %260 = vector.load %arg5[%c0_98, %c0_99] : memref<1x1xf32, #tpu.memory_space<vmem>>, vector<1x1xf32>
      tpu.vector_store %arg5[%c0_98, %c0_99], %259 {strides = array<i32>} : memref<1x1xf32, #tpu.memory_space<vmem>>, vector<1x1xf32>,
    } else {
    }
    %c0 = arith.constant 0 : index
    %c0_1 = arith.constant 0 : index
    %3 = vector.load %arg1[%c0, %c0_1] : memref<8x512xf32, #tpu.memory_space<vmem>>, vector<8x512xf32>
    %c0_2 = arith.constant 0 : index
    %c0_3 = arith.constant 0 : index
    %4 = vector.load %arg2[%c0_2, %c0_3] : memref<8x512xf32, #tpu.memory_space<vmem>>, vector<8x512xf32>
    %c0_4 = arith.constant 0 : index
    %c0_5 = arith.constant 0 : index
    %5 = vector.load %arg3[%c0_4, %c0_5] : memref<8x512xf32, #tpu.memory_space<vmem>>, vector<8x512xf32>
    %c0_6 = arith.constant 0 : index
    %c0_7 = arith.constant 0 : index
    %6 = vector.load %arg4[%c0_6, %c0_7] : memref<8x512xf32, #tpu.memory_space<vmem>>, vector<8x512xf32>
    %cst = arith.constant 0.000000e+00 : f32
    %7 = vector.broadcast %cst : f32 to vector<8x512xf32>
    %8 = arith.subf %7, %6 : vector<8x512xf32>
    %cst_8 = arith.constant 0.000000e+00 : f32
    %9 = vector.broadcast %cst_8 : f32 to vector<8x512xf32>
    %10 = arith.maximumf %8, %9 : vector<8x512xf32>
    %11 = math.absf %8 : vector<8x512xf32>
    %cst_9 = arith.constant 0.000000e+00 : f32
    %12 = vector.broadcast %cst_9 : f32 to vector<8x512xf32>
    %13 = arith.subf %12, %11 : vector<8x512xf32>
    %14 = math.exp %13 : vector<8x512xf32>
    %cst_10 = arith.constant 1.000000e+00 : f32
    %15 = vector.broadcast %cst_10 : f32 to vector<8x512xf32>
    %16 = arith.addf %15, %14 : vector<8x512xf32>
    %17 = math.log %16 : vector<8x512xf32>
    %18 = arith.addf %10, %17 : vector<8x512xf32>
    %19 = arith.addf %5, %4 : vector<8x512xf32>
    %cst_11 = arith.constant 9.99999993E-9 : f32
    %20 = vector.broadcast %cst_11 : f32 to vector<8x512xf32>
    %21 = arith.addf %19, %20 : vector<8x512xf32>
    %22 = math.log %21 : vector<8x512xf32>
    %cst_12 = arith.constant 0.000000e+00 : f32
    %23 = vector.broadcast %cst_12 : f32 to vector<8x512xf32>
    %24 = arith.subf %23, %6 : vector<8x512xf32>
    %cst_13 = arith.constant 9.99999993E-9 : f32
    %25 = vector.broadcast %cst_13 : f32 to vector<8x512xf32>
    %26 = arith.addf %5, %25 : vector<8x512xf32>
    %27 = math.log %26 : vector<8x512xf32>
    %28 = arith.subf %27, %22 : vector<8x512xf32>
    %29 = arith.mulf %5, %28 : vector<8x512xf32>
    %30 = arith.addf %24, %29 : vector<8x512xf32>
    %cst_14 = arith.constant 0.000000e+00 : f32
    %31 = vector.broadcast %cst_14 : f32 to vector<8x512xf32>
    %32 = arith.maximumf %30, %31 : vector<8x512xf32>
    %33 = math.absf %30 : vector<8x512xf32>
    %cst_15 = arith.constant 0.000000e+00 : f32
    %34 = vector.broadcast %cst_15 : f32 to vector<8x512xf32>
    %35 = arith.subf %34, %33 : vector<8x512xf32>
    %36 = math.exp %35 : vector<8x512xf32>
    %cst_16 = arith.constant 1.000000e+00 : f32
    %37 = vector.broadcast %cst_16 : f32 to vector<8x512xf32>
    %38 = arith.addf %37, %36 : vector<8x512xf32>
    %39 = math.log %38 : vector<8x512xf32>
    %40 = arith.addf %32, %39 : vector<8x512xf32>
    %41 = arith.subf %40, %18 : vector<8x512xf32>
    %cst_17 = arith.constant 0.000000e+00 : f32
    %42 = vector.broadcast %cst_17 : f32 to vector<8x512xf32>
    %43 = arith.subf %42, %18 : vector<8x512xf32>
    %44 = arith.addf %43, %30 : vector<8x512xf32>
    %cst_18 = arith.constant 9.99999993E-9 : f32
    %45 = vector.broadcast %cst_18 : f32 to vector<8x512xf32>
    %46 = arith.addf %4, %45 : vector<8x512xf32>
    %47 = math.log %46 : vector<8x512xf32>
    %48 = arith.subf %47, %22 : vector<8x512xf32>
    %49 = arith.mulf %3, %48 : vector<8x512xf32>
    %50 = arith.addf %44, %49 : vector<8x512xf32>
    %51 = arith.addf %3, %5 : vector<8x512xf32>
    %52 = math.log %51 : vector<8x512xf32>
    %cst_19 = arith.constant 1.000000e+00 : f32
    %53 = vector.broadcast %cst_19 : f32 to vector<8x512xf32>
    %54 = arith.addf %51, %53 : vector<8x512xf32>
    %55 = math.log %54 : vector<8x512xf32>
    %56 = arith.addf %52, %55 : vector<8x512xf32>
    %cst_20 = arith.constant 1.000000e+00 : f32
    %57 = vector.broadcast %cst_20 : f32 to vector<8x512xf32>
    %58 = arith.addf %51, %57 : vector<8x512xf32>
    %cst_21 = arith.constant 1.000000e+00 : f32
    %59 = vector.broadcast %cst_21 : f32 to vector<8x512xf32>
    %60 = arith.addf %58, %59 : vector<8x512xf32>
    %cst_22 = arith.constant 676.520386 : f32
    %61 = vector.broadcast %cst_22 : f32 to vector<8x512xf32>
    %62 = arith.divf %61, %60 : vector<8x512xf32>
    %cst_23 = arith.constant 1.000000e+00 : f32
    %63 = vector.broadcast %cst_23 : f32 to vector<8x512xf32>
    %64 = arith.addf %63, %62 : vector<8x512xf32>
    %cst_24 = arith.constant 2.000000e+00 : f32
    %65 = vector.broadcast %cst_24 : f32 to vector<8x512xf32>
    %66 = arith.addf %58, %65 : vector<8x512xf32>
    %cst_25 = arith.constant -1259.13916 : f32
    %67 = vector.broadcast %cst_25 : f32 to vector<8x512xf32>
    %68 = arith.divf %67, %66 : vector<8x512xf32>
    %69 = arith.addf %64, %68 : vector<8x512xf32>
    %cst_26 = arith.constant 3.000000e+00 : f32
    %70 = vector.broadcast %cst_26 : f32 to vector<8x512xf32>
    %71 = arith.addf %58, %70 : vector<8x512xf32>
    %cst_27 = arith.constant 771.323425 : f32
    %72 = vector.broadcast %cst_27 : f32 to vector<8x512xf32>
    %73 = arith.divf %72, %71 : vector<8x512xf32>
    %74 = arith.addf %69, %73 : vector<8x512xf32>
    %cst_28 = arith.constant 4.000000e+00 : f32
    %75 = vector.broadcast %cst_28 : f32 to vector<8x512xf32>
    %76 = arith.addf %58, %75 : vector<8x512xf32>
    %cst_29 = arith.constant -176.615036 : f32
    %77 = vector.broadcast %cst_29 : f32 to vector<8x512xf32>
    %78 = arith.divf %77, %76 : vector<8x512xf32>
    %79 = arith.addf %74, %78 : vector<8x512xf32>
    %cst_30 = arith.constant 5.000000e+00 : f32
    %80 = vector.broadcast %cst_30 : f32 to vector<8x512xf32>
    %81 = arith.addf %58, %80 : vector<8x512xf32>
    %cst_31 = arith.constant 12.5073433 : f32
    %82 = vector.broadcast %cst_31 : f32 to vector<8x512xf32>
    %83 = arith.divf %82, %81 : vector<8x512xf32>
    %84 = arith.addf %79, %83 : vector<8x512xf32>
    %cst_32 = arith.constant 6.000000e+00 : f32
    %85 = vector.broadcast %cst_32 : f32 to vector<8x512xf32>
    %86 = arith.addf %58, %85 : vector<8x512xf32>
    %cst_33 = arith.constant -0.138571098 : f32
    %87 = vector.broadcast %cst_33 : f32 to vector<8x512xf32>
    %88 = arith.divf %87, %86 : vector<8x512xf32>
    %89 = arith.addf %84, %88 : vector<8x512xf32>
    %cst_34 = arith.constant 7.000000e+00 : f32
    %90 = vector.broadcast %cst_34 : f32 to vector<8x512xf32>
    %91 = arith.addf %58, %90 : vector<8x512xf32>
    %cst_35 = arith.constant 9.98436917E-6 : f32
    %92 = vector.broadcast %cst_35 : f32 to vector<8x512xf32>
    %93 = arith.divf %92, %91 : vector<8x512xf32>
    %94 = arith.addf %89, %93 : vector<8x512xf32>
    %cst_36 = arith.constant 8.000000e+00 : f32
    %95 = vector.broadcast %cst_36 : f32 to vector<8x512xf32>
    %96 = arith.addf %58, %95 : vector<8x512xf32>
    %cst_37 = arith.constant 1.50563267E-7 : f32
    %97 = vector.broadcast %cst_37 : f32 to vector<8x512xf32>
    %98 = arith.divf %97, %96 : vector<8x512xf32>
    %99 = arith.addf %94, %98 : vector<8x512xf32>
    %cst_38 = arith.constant 7.000000e+00 : f32
    %100 = vector.broadcast %cst_38 : f32 to vector<8x512xf32>
    %101 = arith.addf %58, %100 : vector<8x512xf32>
    %cst_39 = arith.constant 5.000000e-01 : f32
    %102 = vector.broadcast %cst_39 : f32 to vector<8x512xf32>
    %103 = arith.addf %101, %102 : vector<8x512xf32>
    %cst_40 = arith.constant 5.000000e-01 : f32
    %104 = vector.broadcast %cst_40 : f32 to vector<8x512xf32>
    %105 = arith.addf %58, %104 : vector<8x512xf32>
    %106 = math.log %103 : vector<8x512xf32>
    %107 = arith.mulf %105, %106 : vector<8x512xf32>
    %cst_41 = arith.constant 0.918938517 : f32
    %108 = vector.broadcast %cst_41 : f32 to vector<8x512xf32>
    %109 = arith.addf %108, %107 : vector<8x512xf32>
    %110 = arith.subf %109, %103 : vector<8x512xf32>
    %111 = math.log %99 : vector<8x512xf32>
    %112 = arith.addf %110, %111 : vector<8x512xf32>
    %113 = arith.subf %112, %56 : vector<8x512xf32>
    %114 = arith.addf %50, %113 : vector<8x512xf32>
    %115 = math.log %5 : vector<8x512xf32>
    %cst_42 = arith.constant 1.000000e+00 : f32
    %116 = vector.broadcast %cst_42 : f32 to vector<8x512xf32>
    %117 = arith.addf %5, %116 : vector<8x512xf32>
    %118 = math.log %117 : vector<8x512xf32>
    %119 = arith.addf %115, %118 : vector<8x512xf32>
    %cst_43 = arith.constant 1.000000e+00 : f32
    %120 = vector.broadcast %cst_43 : f32 to vector<8x512xf32>
    %121 = arith.addf %5, %120 : vector<8x512xf32>
    %cst_44 = arith.constant 1.000000e+00 : f32
    %122 = vector.broadcast %cst_44 : f32 to vector<8x512xf32>
    %123 = arith.addf %121, %122 : vector<8x512xf32>
    %cst_45 = arith.constant 676.520386 : f32
    %124 = vector.broadcast %cst_45 : f32 to vector<8x512xf32>
    %125 = arith.divf %124, %123 : vector<8x512xf32>
    %cst_46 = arith.constant 1.000000e+00 : f32
    %126 = vector.broadcast %cst_46 : f32 to vector<8x512xf32>
    %127 = arith.addf %126, %125 : vector<8x512xf32>
    %cst_47 = arith.constant 2.000000e+00 : f32
    %128 = vector.broadcast %cst_47 : f32 to vector<8x512xf32>
    %129 = arith.addf %121, %128 : vector<8x512xf32>
    %cst_48 = arith.constant -1259.13916 : f32
    %130 = vector.broadcast %cst_48 : f32 to vector<8x512xf32>
    %131 = arith.divf %130, %129 : vector<8x512xf32>
    %132 = arith.addf %127, %131 : vector<8x512xf32>
    %cst_49 = arith.constant 3.000000e+00 : f32
    %133 = vector.broadcast %cst_49 : f32 to vector<8x512xf32>
    %134 = arith.addf %121, %133 : vector<8x512xf32>
    %cst_50 = arith.constant 771.323425 : f32
    %135 = vector.broadcast %cst_50 : f32 to vector<8x512xf32>
    %136 = arith.divf %135, %134 : vector<8x512xf32>
    %137 = arith.addf %132, %136 : vector<8x512xf32>
    %cst_51 = arith.constant 4.000000e+00 : f32
    %138 = vector.broadcast %cst_51 : f32 to vector<8x512xf32>
    %139 = arith.addf %121, %138 : vector<8x512xf32>
    %cst_52 = arith.constant -176.615036 : f32
    %140 = vector.broadcast %cst_52 : f32 to vector<8x512xf32>
    %141 = arith.divf %140, %139 : vector<8x512xf32>
    %142 = arith.addf %137, %141 : vector<8x512xf32>
    %cst_53 = arith.constant 5.000000e+00 : f32
    %143 = vector.broadcast %cst_53 : f32 to vector<8x512xf32>
    %144 = arith.addf %121, %143 : vector<8x512xf32>
    %cst_54 = arith.constant 12.5073433 : f32
    %145 = vector.broadcast %cst_54 : f32 to vector<8x512xf32>
    %146 = arith.divf %145, %144 : vector<8x512xf32>
    %147 = arith.addf %142, %146 : vector<8x512xf32>
    %cst_55 = arith.constant 6.000000e+00 : f32
    %148 = vector.broadcast %cst_55 : f32 to vector<8x512xf32>
    %149 = arith.addf %121, %148 : vector<8x512xf32>
    %cst_56 = arith.constant -0.138571098 : f32
    %150 = vector.broadcast %cst_56 : f32 to vector<8x512xf32>
    %151 = arith.divf %150, %149 : vector<8x512xf32>
    %152 = arith.addf %147, %151 : vector<8x512xf32>
    %cst_57 = arith.constant 7.000000e+00 : f32
    %153 = vector.broadcast %cst_57 : f32 to vector<8x512xf32>
    %154 = arith.addf %121, %153 : vector<8x512xf32>
    %cst_58 = arith.constant 9.98436917E-6 : f32
    %155 = vector.broadcast %cst_58 : f32 to vector<8x512xf32>
    %156 = arith.divf %155, %154 : vector<8x512xf32>
    %157 = arith.addf %152, %156 : vector<8x512xf32>
    %cst_59 = arith.constant 8.000000e+00 : f32
    %158 = vector.broadcast %cst_59 : f32 to vector<8x512xf32>
    %159 = arith.addf %121, %158 : vector<8x512xf32>
    %cst_60 = arith.constant 1.50563267E-7 : f32
    %160 = vector.broadcast %cst_60 : f32 to vector<8x512xf32>
    %161 = arith.divf %160, %159 : vector<8x512xf32>
    %162 = arith.addf %157, %161 : vector<8x512xf32>
    %cst_61 = arith.constant 7.000000e+00 : f32
    %163 = vector.broadcast %cst_61 : f32 to vector<8x512xf32>
    %164 = arith.addf %121, %163 : vector<8x512xf32>
    %cst_62 = arith.constant 5.000000e-01 : f32
    %165 = vector.broadcast %cst_62 : f32 to vector<8x512xf32>
    %166 = arith.addf %164, %165 : vector<8x512xf32>
    %cst_63 = arith.constant 5.000000e-01 : f32
    %167 = vector.broadcast %cst_63 : f32 to vector<8x512xf32>
    %168 = arith.addf %121, %167 : vector<8x512xf32>
    %169 = math.log %166 : vector<8x512xf32>
    %170 = arith.mulf %168, %169 : vector<8x512xf32>
    %cst_64 = arith.constant 0.918938517 : f32
    %171 = vector.broadcast %cst_64 : f32 to vector<8x512xf32>
    %172 = arith.addf %171, %170 : vector<8x512xf32>
    %173 = arith.subf %172, %166 : vector<8x512xf32>
    %174 = math.log %162 : vector<8x512xf32>
    %175 = arith.addf %173, %174 : vector<8x512xf32>
    %176 = arith.subf %175, %119 : vector<8x512xf32>
    %177 = arith.subf %114, %176 : vector<8x512xf32>
    %cst_65 = arith.constant 1.000000e+00 : f32
    %178 = vector.broadcast %cst_65 : f32 to vector<8x512xf32>
    %179 = arith.addf %3, %178 : vector<8x512xf32>
    %180 = math.log %179 : vector<8x512xf32>
    %cst_66 = arith.constant 1.000000e+00 : f32
    %181 = vector.broadcast %cst_66 : f32 to vector<8x512xf32>
    %182 = arith.addf %179, %181 : vector<8x512xf32>
    %183 = math.log %182 : vector<8x512xf32>
    %184 = arith.addf %180, %183 : vector<8x512xf32>
    %cst_67 = arith.constant 1.000000e+00 : f32
    %185 = vector.broadcast %cst_67 : f32 to vector<8x512xf32>
    %186 = arith.addf %179, %185 : vector<8x512xf32>
    %cst_68 = arith.constant 1.000000e+00 : f32
    %187 = vector.broadcast %cst_68 : f32 to vector<8x512xf32>
    %188 = arith.addf %186, %187 : vector<8x512xf32>
    %cst_69 = arith.constant 676.520386 : f32
    %189 = vector.broadcast %cst_69 : f32 to vector<8x512xf32>
    %190 = arith.divf %189, %188 : vector<8x512xf32>
    %cst_70 = arith.constant 1.000000e+00 : f32
    %191 = vector.broadcast %cst_70 : f32 to vector<8x512xf32>
    %192 = arith.addf %191, %190 : vector<8x512xf32>
    %cst_71 = arith.constant 2.000000e+00 : f32
    %193 = vector.broadcast %cst_71 : f32 to vector<8x512xf32>
    %194 = arith.addf %186, %193 : vector<8x512xf32>
    %cst_72 = arith.constant -1259.13916 : f32
    %195 = vector.broadcast %cst_72 : f32 to vector<8x512xf32>
    %196 = arith.divf %195, %194 : vector<8x512xf32>
    %197 = arith.addf %192, %196 : vector<8x512xf32>
    %cst_73 = arith.constant 3.000000e+00 : f32
    %198 = vector.broadcast %cst_73 : f32 to vector<8x512xf32>
    %199 = arith.addf %186, %198 : vector<8x512xf32>
    %cst_74 = arith.constant 771.323425 : f32
    %200 = vector.broadcast %cst_74 : f32 to vector<8x512xf32>
    %201 = arith.divf %200, %199 : vector<8x512xf32>
    %202 = arith.addf %197, %201 : vector<8x512xf32>
    %cst_75 = arith.constant 4.000000e+00 : f32
    %203 = vector.broadcast %cst_75 : f32 to vector<8x512xf32>
    %204 = arith.addf %186, %203 : vector<8x512xf32>
    %cst_76 = arith.constant -176.615036 : f32
    %205 = vector.broadcast %cst_76 : f32 to vector<8x512xf32>
    %206 = arith.divf %205, %204 : vector<8x512xf32>
    %207 = arith.addf %202, %206 : vector<8x512xf32>
    %cst_77 = arith.constant 5.000000e+00 : f32
    %208 = vector.broadcast %cst_77 : f32 to vector<8x512xf32>
    %209 = arith.addf %186, %208 : vector<8x512xf32>
    %cst_78 = arith.constant 12.5073433 : f32
    %210 = vector.broadcast %cst_78 : f32 to vector<8x512xf32>
    %211 = arith.divf %210, %209 : vector<8x512xf32>
    %212 = arith.addf %207, %211 : vector<8x512xf32>
    %cst_79 = arith.constant 6.000000e+00 : f32
    %213 = vector.broadcast %cst_79 : f32 to vector<8x512xf32>
    %214 = arith.addf %186, %213 : vector<8x512xf32>
    %cst_80 = arith.constant -0.138571098 : f32
    %215 = vector.broadcast %cst_80 : f32 to vector<8x512xf32>
    %216 = arith.divf %215, %214 : vector<8x512xf32>
    %217 = arith.addf %212, %216 : vector<8x512xf32>
    %cst_81 = arith.constant 7.000000e+00 : f32
    %218 = vector.broadcast %cst_81 : f32 to vector<8x512xf32>
    %219 = arith.addf %186, %218 : vector<8x512xf32>
    %cst_82 = arith.constant 9.98436917E-6 : f32
    %220 = vector.broadcast %cst_82 : f32 to vector<8x512xf32>
    %221 = arith.divf %220, %219 : vector<8x512xf32>
    %222 = arith.addf %217, %221 : vector<8x512xf32>
    %cst_83 = arith.constant 8.000000e+00 : f32
    %223 = vector.broadcast %cst_83 : f32 to vector<8x512xf32>
    %224 = arith.addf %186, %223 : vector<8x512xf32>
    %cst_84 = arith.constant 1.50563267E-7 : f32
    %225 = vector.broadcast %cst_84 : f32 to vector<8x512xf32>
    %226 = arith.divf %225, %224 : vector<8x512xf32>
    %227 = arith.addf %222, %226 : vector<8x512xf32>
    %cst_85 = arith.constant 7.000000e+00 : f32
    %228 = vector.broadcast %cst_85 : f32 to vector<8x512xf32>
    %229 = arith.addf %186, %228 : vector<8x512xf32>
    %cst_86 = arith.constant 5.000000e-01 : f32
    %230 = vector.broadcast %cst_86 : f32 to vector<8x512xf32>
    %231 = arith.addf %229, %230 : vector<8x512xf32>
    %cst_87 = arith.constant 5.000000e-01 : f32
    %232 = vector.broadcast %cst_87 : f32 to vector<8x512xf32>
    %233 = arith.addf %186, %232 : vector<8x512xf32>
    %234 = math.log %231 : vector<8x512xf32>
    %235 = arith.mulf %233, %234 : vector<8x512xf32>
    %cst_88 = arith.constant 0.918938517 : f32
    %236 = vector.broadcast %cst_88 : f32 to vector<8x512xf32>
    %237 = arith.addf %236, %235 : vector<8x512xf32>
    %238 = arith.subf %237, %231 : vector<8x512xf32>
    %239 = math.log %227 : vector<8x512xf32>
    %240 = arith.addf %238, %239 : vector<8x512xf32>
    %241 = arith.subf %240, %184 : vector<8x512xf32>
    %242 = arith.subf %177, %241 : vector<8x512xf32>
    %cst_89 = arith.constant 9.99999993E-9 : f32
    %243 = vector.broadcast %cst_89 : f32 to vector<8x512xf32>
    %244 = arith.cmpf olt, %3, %243 : vector<8x512xf32>
    %245 = arith.select %244, %41, %242 : vector<8x512xi1>, vector<8x512xf32>
    %cst_90 = arith.constant 0.000000e+00 : f32
    %246 = vector.broadcast %cst_90 : f32 to vector<8x512xf32>
    %247 = arith.subf %246, %245 : vector<8x512xf32>
    %c0_91 = arith.constant 0 : index
    %c0_92 = arith.constant 0 : index
    %248 = vector.load %arg5[%c0_91, %c0_92] : memref<1x1xf32, #tpu.memory_space<vmem>>, vector<1x1xf32>
    %249 = vector.shape_cast %247 : vector<8x512xf32> to vector<1x8x512xf32>
    %cst_93 = arith.constant dense<0.000000e+00> : vector<1xf32>
    %250 = vector.multi_reduction <add>, %249, %cst_93 [1, 2] : vector<1x8x512xf32> to vector<1xf32>
    %251 = vector.shape_cast %250 : vector<1xf32> to vector<1x1x1xf32>
    %252 = vector.extract %251[0, 0, 0] : f32 from vector<1x1x1xf32>
    %253 = vector.broadcast %252 : f32 to vector<1x1xf32>
    %254 = arith.addf %248, %253 : vector<1x1xf32>
    %c0_94 = arith.constant 0 : index
    %c0_95 = arith.constant 0 : index
    %255 = vector.load %arg5[%c0_94, %c0_95] : memref<1x1xf32, #tpu.memory_space<vmem>>, vector<1x1xf32>
    tpu.vector_store %arg5[%c0_94, %c0_95], %254 {strides = array<i32>} : memref<1x1xf32, #tpu.memory_space<vmem>>, vector<1x1xf32>,
    %c1_i32 = arith.constant 1 : i32
    %256 = arith.cmpi eq, %arg0, %c1_i32 : i32
    %257 = arith.extui %256 : i1 to i32
    %c0_i32_96 = arith.constant 0 : i32
    %258 = arith.cmpi ne, %257, %c0_i32_96 : i32
    scf.if %258 {
      %c0_97 = arith.constant 0 : index
      %c0_98 = arith.constant 0 : index
      %259 = vector.load %arg5[%c0_97, %c0_98] : memref<1x1xf32, #tpu.memory_space<vmem>>, vector<1x1xf32>
      %cst_99 = arith.constant 0.001953125 : f32
      %260 = vector.broadcast %cst_99 : f32 to vector<1x1xf32>
      %261 = arith.mulf %259, %260 : vector<1x1xf32>
      %c0_100 = arith.constant 0 : index
      %c0_101 = arith.constant 0 : index
      %262 = vector.load %arg5[%c0_100, %c0_101] : memref<1x1xf32, #tpu.memory_space<vmem>>, vector<1x1xf32>
      tpu.vector_store %arg5[%c0_100, %c0_101], %261 {strides = array<i32>} : memref<1x1xf32, #tpu.memory_space<vmem>>, vector<1x1xf32>,
    } else {
    }
    return
  }
  func.func @transform_0(%arg0: i32) -> (i32, i32) {
    %c0_i32 = arith.constant 0 : i32
    %c0_i32_0 = arith.constant 0 : i32
    return %arg0, %c0_i32 : i32, i32
  }
  func.func @transform_1(%arg0: i32) -> (i32, i32) {
    %c0_i32 = arith.constant 0 : i32
    %c0_i32_0 = arith.constant 0 : i32
    return %arg0, %c0_i32 : i32, i32
  }
  func.func @transform_2(%arg0: i32) -> (i32, i32) {
    %c0_i32 = arith.constant 0 : i32
    %c0_i32_0 = arith.constant 0 : i32
    return %arg0, %c0_i32 : i32, i32
  }
  func.func @transform_3(%arg0: i32) -> (i32, i32) {
    %c0_i32 = arith.constant 0 : i32
    %c0_i32_0 = arith.constant 0 : i32
    return %arg0, %c0_i32 : i32, i32
  }
  func.func @transform_4(%arg0: i32) -> (i32, i32) {
    %c0_i32 = arith.constant 0 : i32
    %c0_i32_0 = arith.constant 0 : i32
    %c0_i32_1 = arith.constant 0 : i32
    return %c0_i32, %c0_i32_0 : i32, i32
  }
}

</mosaic_0001>

<bundles_post_ra>
// kernel: tpu_custom_call.1
= control target key start
LH: loop header
LB: loop body
LE: loop exit
PB: predicated region body
PF: predicated region fallthrough
CT: control target
= control target key end

     0   :  { %9 = vsyncpa [#allocation3], 0  ;;  %s6324_s0 = inlined_call_operand.hbm [shape: f32[16,512], index: 0, kind: input, shape index: {}]   ;;  %s6325_s1 = inlined_call_operand.hbm [shape: f32[16,512], index: 1, kind: input, shape index: {}]   ;;  %s6326_s2 = inlined_call_operand.hbm [shape: f32[16,512], index: 2, kind: input, shape index: {}]   ;;  %s6327_s3 = inlined_call_operand.hbm [shape: f32[16,512], index: 3, kind: input, shape index: {}]   ;;  %s6328_s4 = inlined_call_operand.hbm [shape: f32[1,1], index: 4, kind: output, shape index: {}]  }
   0x1   :  { %11 = vsyncpa [#allocation3 + $0x1], 0 }
   0x2   :  { %12 = vsyncpa [#allocation6], 0 }
   0x3   :  { %14 = vsyncpa [#allocation6 + $0x1], 0 }
   0x4   :  { %15 = vsyncpa [#allocation9], 0 }
   0x5   :  { %17 = vsyncpa [#allocation9 + $0x1], 0 }
   0x6   :  { %18 = vsyncpa [#allocation4], 0  ;;  %s3185_s15 = smov 0   ;;  %s3187_s16 = smov 0  }
   0x7   :  { %s3189_s17 = smov 0   ;;  %s3191_s18 = smov 0  }
   0x8 LB: > { %s3204_s19 = sadd.s32 4294967295, %s3156_s18   ;;  %s3207_s20 = sadd.s32 1, %s3156_s18   ;;  %s3156_s18 = sphi %s3191_s18, %s6735_s18   ;;  %s3152_s17 = sphi %s3189_s17, %s6734_s17   ;;  %s3148_s16 = sphi %s3187_s16, %s6733_s16   ;;  %s3144_s15 = sphi %s3185_s15, %s6732_s15  }
   0x9   : > { %s28_s21 = ssub.s32 %s3156_s18, %s3207_s20  ;;  %s31_s22 = sadd.s32 1, %s3152_s17 }
   0xa   : > { %p29_p0 = scmp.eq.s32.totalorder %s28_s21, 0  ;;  %p38_p1 = scmp.ne.s32.totalorder %s3152_s17, %s3148_s16 }
   0xb   : > { %p39_p2 = scmp.eq.s32.totalorder %s3156_s18, 0  ;;  %p44_p3 = scmp.ne.s32.totalorder %s3148_s16, %s3144_s15 }
   0xc   : > { %s3217_s23 = scalar_select %p29_p0, %s3152_s17, %s31_s22  }
   0xd   : > { %p40_p4 = por %p39_p2, %p38_p1  ;;  %p45_p5 = scmp.eq.s32.totalorder %s3204_s19, 0 }
   0xe   : > { %p2569_p6 = scmp.lt.s32.totalorder %s3156_s18, 2  ;;  %s3226_s25 = sand.u32 1, %s3152_s17  }
   0xf   : > { %p3221_p7 = por %p45_p5, %p44_p3  ;;  %s3229_s26 = sshll.u32 %s3226_s25, 5 }
  0x10   : > { %s3232_s27 = sshll.u32 %s3156_s18, 5  ;;  %p3234_p8 = pnand %p2569_p6, %p40_p4 }
  0x11   : > { %s187_s29 = sand.u32 1, %s3156_s18   ;;  %s196_s6 = scalar_lea.hbm %s6325_s1, %s3232_s27 }
  0x12   : > { %s198_s7 = sshll.u32 %s196_s6, 4  ;;  %s191_s8 = scalar_lea.vmem [#allocation5], %s3229_s26  ;;  %s199_s7 = int_to_ptr.hbm [resolvable:$true] %s198_s7 }
  0x13   : > { %s200_s9 = sshll.u32 %s191_s8, 4  ;;  %s3244_s10 = scalar_lea.sflag [#allocation6], %s187_s29  ;;  %s201_s9 = int_to_ptr.vmem [resolvable:$true] %s200_s9 }
  0x14   : > { %s2962_s11 = sshra.s32 %s199_s7, 4  ;;  %p2966_p10 = pneg %p3234_p8  ;;  %s2963_s11 = int_to_ptr.hbm [resolvable:$true] %s2962_s11 }
  0x15   : > { %s2964_s12 = scalar_lea.hbm %s2963_s11, 32  ;;  %s2969_s15 = scalar_lea.hbm %s6325_s1, 64 }
  0x16   : > { %p2965_p9 = scmp.ne.s32.totalorder %s2963_s11, %s2964_s12  ;;  %p2970_p13 = scmp.lt.s32.totalorder %s2963_s11, %s6325_s1 }
  0x17   : > { %p2971_p0 = scmp.lt.s32.totalorder %s2969_s15, %s2964_s12 }
  0x18   : > { %p2967_p11 = pnand %p2966_p10, %p2965_p9 }
  0x19   : > { %p2972_p1 = por %p2971_p0, %p2970_p13 }
  0x1a   : > { %p2968_p12 = pneg %p2967_p11 }
  0x1c   : > { %p2973_p2 = pnand %p2972_p1, %p2968_p12 }
  0x1e   : > { %2976 = shalt.err (!%p2973_p2)
}
  0x1f   : > { %2562 = dma.hbm_to_vmem [thread:$0]  (!%p3234_p8), %s199_s7, 512, %s201_s9, %s3244_s10  }
  0x20   : > { %p2527_p3 = scmp.ge.s32.totalorder %s3156_s18, 1  ;;  %p245_p4 = scmp.lt.s32.totalorder %s3156_s18, 3 }
  0x21   : > { %s176_s6 = scalar_lea.hbm %s6324_s0, %s3232_s27  ;;  %s171_s11 = scalar_lea.vmem [#allocation2], %s3229_s26 }
  0x22   : > { %p3262_p5 = pnand %p2527_p3, %p245_p4  ;;  %s178_s8 = sshll.u32 %s176_s6, 4  ;;  %s179_s8 = int_to_ptr.hbm [resolvable:$true] %s178_s8 }
  0x23   : > { %s180_s12 = sshll.u32 %s171_s11, 4  ;;  %s168_s13 = scalar_lea.sflag [#allocation3], %s3226_s25  ;;  %s181_s12 = int_to_ptr.vmem [resolvable:$true] %s180_s12 }
  0x24   : > { %s2992_s14 = sshra.s32 %s179_s8, 4  ;;  %s2999_s9 = scalar_lea.hbm %s6324_s0, 64  ;;  %s2993_s14 = int_to_ptr.hbm [resolvable:$true] %s2992_s14 }
  0x25   : > { %s2994_s15 = scalar_lea.hbm %s2993_s14, 32  ;;  %p3000_p12 = scmp.lt.s32.totalorder %s2993_s14, %s6324_s0 }
  0x26   : > { %p2995_p6 = scmp.ne.s32.totalorder %s2993_s14, %s2994_s15  ;;  %p3001_p13 = scmp.lt.s32.totalorder %s2999_s9, %s2994_s15 }
  0x28   : > { %p2997_p9 = pnand %p2995_p6, %p2966_p10  ;;  %p3002_p0 = por %p3001_p13, %p3000_p12 }
  0x2a   : > { %p2998_p11 = pneg %p2997_p9 }
  0x2c   : > { %p3003_p1 = pnand %p3002_p0, %p2998_p11 }
  0x2e   : > { %3006 = shalt.err (!%p3003_p1)
}
  0x2f   : > { %2559 = dma.hbm_to_vmem [thread:$0]  (!%p3234_p8), %s179_s8, 512, %s181_s12, %s168_s13  }
  0x30   : > { %s216_s6 = scalar_lea.hbm %s6326_s2, %s3232_s27  ;;  %s211_s18 = scalar_lea.vmem [#allocation7], %s3229_s26 }
  0x31   : > { %s218_s11 = sshll.u32 %s216_s6, 4  ;;  %s220_s7 = sshll.u32 %s211_s18, 4  ;;  %s219_s11 = int_to_ptr.hbm [resolvable:$true] %s218_s11  ;;  %s221_s7 = int_to_ptr.vmem [resolvable:$true] %s220_s7 }
  0x32   : > { %s3022_s14 = sshra.s32 %s219_s11, 4  ;;  %s3029_s8 = scalar_lea.hbm %s6326_s2, 64  ;;  %s3023_s14 = int_to_ptr.hbm [resolvable:$true] %s3022_s14 }
  0x33   : > { %s3024_s15 = scalar_lea.hbm %s3023_s14, 32  ;;  %p3030_p6 = scmp.lt.s32.totalorder %s3023_s14, %s6326_s2 }
  0x34   : > { %p3025_p2 = scmp.ne.s32.totalorder %s3023_s14, %s3024_s15  ;;  %p3031_p9 = scmp.lt.s32.totalorder %s3029_s8, %s3024_s15 }
  0x36   : > { %p3027_p3 = pnand %p3025_p2, %p2966_p10  ;;  %p3032_p11 = por %p3031_p9, %p3030_p6 }
  0x38   : > { %p3028_p4 = pneg %p3027_p3 }
  0x3a   : > { %p3033_p12 = pnand %p3032_p11, %p3028_p4 }
  0x3c   : > { %3036 = shalt.err (!%p3033_p12)
}
  0x3d   : > { %2565 = dma.hbm_to_vmem [thread:$0]  (!%p3234_p8), %s219_s11, 512, %s221_s7, %s3244_s10  }
  0x3e   : > { %s236_s5 = scalar_lea.hbm %s6327_s3, %s3232_s27  ;;  %s231_s6 = scalar_lea.vmem [#allocation8], %s3229_s26 }
  0x3f   : > { %s240_s18 = sshll.u32 %s231_s6, 4  ;;  %s238_s9 = sshll.u32 %s236_s5, 4  ;;  %s241_s18 = int_to_ptr.vmem [resolvable:$true] %s240_s18  ;;  %s239_s9 = int_to_ptr.hbm [resolvable:$true] %s238_s9 }
  0x40   : > { %s228_s14 = scalar_lea.sflag [#allocation9], %s3226_s25  ;;  %s3052_s15 = sshra.s32 %s239_s9, 4  ;;  %s3053_s15 = int_to_ptr.hbm [resolvable:$true] %s3052_s15 }
  0x41   : > { %s3054_s21 = scalar_lea.hbm %s3053_s15, 32  ;;  %s3059_s11 = scalar_lea.hbm %s6327_s3, 64 }
  0x42   : > { %p3055_p13 = scmp.ne.s32.totalorder %s3053_s15, %s3054_s21  ;;  %p3060_p2 = scmp.lt.s32.totalorder %s3053_s15, %s6327_s3 }
  0x43   : > { %p3061_p3 = scmp.lt.s32.totalorder %s3059_s11, %s3054_s21 }
  0x44   : > { %p3057_p0 = pnand %p3055_p13, %p2966_p10 }
  0x45   : > { %p3062_p4 = por %p3061_p3, %p3060_p2 }
  0x46   : > { %p3058_p1 = pneg %p3057_p0 }
  0x48   : > { %p3063_p6 = pnand %p3062_p4, %p3058_p1 }
  0x4a   : > { %3066 = shalt.err (!%p3063_p6)
}
  0x4b   : > { %2568 = dma.hbm_to_vmem [thread:$0]  (!%p3234_p8), %s239_s9, 512, %s241_s18, %s228_s14  }
  0x4c   : > { %249 = sbr.rel (%p3262_p5) target bundleno = 791 (0x317), region = 36 }
  0x51   : > { %s251_s25 = sand.u32 1, %s3148_s16  }
  0x52   : > { %s2528_s26 = sshll.u32 %s251_s25, 5  ;;  %s252_s12 = scalar_lea.sflag [#allocation3], %s251_s25 }
  0x53   : > { %s3320_s13 = scalar_lea.vmem [#allocation2], %s2528_s26 }
  0x54   : > { %3127 = dma.done.wait (%p3221_p7), %s252_s12, 512  }
  0x55   : > { %3129 = vsyncadd (%p3221_p7), %s252_s12, 4294966784  ;;  %s261_s22 = sand.u32 1, %s3204_s19   ;;  %s265_s30 = scalar_lea.vmem [#allocation5], %s2528_s26 }
  0x56   : > { %s262_s28 = scalar_lea.sflag [#allocation6], %s261_s22 }
  0x57   : > { %3131 = dma.done.wait (%p3221_p7), %s262_s28, 1024  }
  0x58   : > { %3133 = vsyncadd (%p3221_p7), %s262_s28, 4294966272  ;;  %s3331_s29 = scalar_lea.vmem [#allocation7], %s2528_s26  ;;  %s282_s5 = scalar_lea.sflag [#allocation9], %s251_s25 }
  0x59   : > { %s285_s6 = scalar_lea.vmem [#allocation8], %s2528_s26 }
  0x5a   : > { %3135 = dma.done.wait (%p3221_p7), %s282_s5, 512  }
  0x5b   : > { %3137 = vsyncadd (%p3221_p7), %s282_s5, 4294966784  ;;  %p2532_p8 = scmp.ne.s32.totalorder %s3204_s19, 0 }
  0x5d   : > { %324 = sbr.rel (%p2532_p8) target bundleno = 100 (0x64), region = 56 }
  0x62   : > { %vm325_vm0 = vcmask 0   ;;  %v3158_v0 = vmov 0.0  }
  0x63   : > { %326 = vst.msk [vmem:[#allocation10] sm:$0x1] %vm325_vm0, %v3158_v0 }
  0x64 PF: > { %v3338_v1 = vld [vmem:[%s265_s30] sm:$0xff]  ;;  %v3340_v2 = vld [vmem:[%s265_s30 + $0x8] sm:$0xff]  ;;  %v3342_v3 = vld [vmem:[%s265_s30 + $0x10] sm:$0xff]  ;;  %p2533_p7 = scmp.ne.s32.totalorder %s3204_s19, 1 }
  0x65   : > { %v3344_v4 = vld [vmem:[%s265_s30 + $0x18] sm:$0xff]  ;;  %v3347_v5 = vld [vmem:[%s3331_s29] sm:$0xff]  ;;  %v3350_v6 = vld [vmem:[%s3331_s29 + $0x8] sm:$0xff]  ;;  %v471_v55 = vadd.f32 1e-08, %v3338_v1 }
  0x66   : > { %v3353_v7 = vld [vmem:[%s3331_s29 + $0x10] sm:$0xff]  ;;  %v3356_v8 = vld [vmem:[%s3331_s29 + $0x18] sm:$0xff]  ;;  %v383_v9 = vadd.f32 %v3347_v5, %v3338_v1  ;;  %v399_v10 = vadd.f32 1e-08, %v3347_v5  ;;  %v339_v11 = vld [vmem:[%s285_s6] sm:$0xff]  ;;  %v384_v14 = vadd.f32 %v3350_v6, %v3340_v2 }
  0x67   : > { %v340_v12 = vld [vmem:[%s285_s6 + $0x8] sm:$0xff]  ;;  %v341_v13 = vld [vmem:[%s285_s6 + $0x10] sm:$0xff]  ;;  %v385_v15 = vadd.f32 %v3353_v7, %v3342_v3  ;;  %v386_v16 = vadd.f32 %v3356_v8, %v3344_v4  ;;  %v342_v17 = vld [vmem:[%s285_s6 + $0x18] sm:$0xff]  ;;  %v3367_v18 = vsub.f32 0.0, %v339_v11  ;;  %v400_v28 = vadd.f32 1e-08, %v3350_v6 }
  0x68   : > { %v3369_v19 = vsub.f32 0.0, %v340_v12  ;;  %v3371_v20 = vsub.f32 0.0, %v341_v13  ;;  %v387_v21 = vadd.f32 1e-08, %v383_v9  ;;  %v3373_v22 = vsub.f32 0.0, %v342_v17 }
  0x69   : > { %v388_v23 = vadd.f32 1e-08, %v384_v14  ;;  %v389_v24 = vadd.f32 1e-08, %v385_v15  ;;  %2606 = vlog2.f32 %v399_v10  ;;  %v351_v25 = vand.u32 2147483647, %v3367_v18 }
  0x6a   : > { %v352_v26 = vand.u32 2147483647, %v3369_v19  ;;  %v353_v27 = vand.u32 2147483647, %v3371_v20  ;;  %2608 = vlog2.f32 %v387_v21  ;;  %v354_v29 = vand.u32 2147483647, %v3373_v22 }
  0x6b   : > { %v355_v30 = vsub.f32 0.0, %v351_v25  ;;  %v390_v31 = vadd.f32 1e-08, %v386_v16  ;;  %2610 = vlog2.f32 %v388_v23  ;;  %v401_v40 = vadd.f32 1e-08, %v3353_v7  ;;  %v3408_v25 = vld [vmem:[%s3320_s13] sm:$0xff] }
  0x6c   : > { %v356_v32 = vsub.f32 0.0, %v352_v26  ;;  %v357_v33 = vsub.f32 0.0, %v353_v27  ;;  %2612 = vlog2.f32 %v389_v24  ;;  %v358_v34 = vsub.f32 0.0, %v354_v29 }
  0x6d   : > { %v359_v35 = vmul.f32 1.442695, %v355_v30  ;;  %2614 = vlog2.f32 %v390_v31  ;;  %v402_v43 = vadd.f32 1e-08, %v3356_v8  ;;  %v472_v59 = vadd.f32 1e-08, %v3340_v2 }
  0x6e   : > { %v361_v37 = vmul.f32 1.442695, %v356_v32  ;;  %v363_v38 = vmul.f32 1.442695, %v357_v33  ;;  %2616 = vlog2.f32 %v400_v28  ;;  %v365_v39 = vmul.f32 1.442695, %v358_v34 }
  0x6f   : > { %v2607_v36 = vpop.eup %2606  ;;  %2618 = vpow2.f32 %v359_v35  ;;  %v473_v24 = vadd.f32 1e-08, %v3342_v3  ;;  %v474_v28 = vadd.f32 1e-08, %v3344_v4  ;;  %v3417_v3 = vld [vmem:[%s3320_s13 + $0x8] sm:$0xff]  ;;  %v3420_v34 = vld [vmem:[%s3320_s13 + $0x10] sm:$0xff]  ;;  %v495_v4 = vadd.f32 %v3347_v5, %v3408_v25 }
  0x70   : > { %v404_v41 = vmul.f32 0.6931472, %v2607_v36  ;;  %v2609_v42 = vpop.eup %2608  ;;  %2620 = vpow2.f32 %v361_v37 }
  0x71   : > { %v2611_v44 = vpop.eup %2610  ;;  %2622 = vpow2.f32 %v363_v38  ;;  %v3382_v45 = vmul.f32 0.6931472, %v2609_v42  ;;  %v3428_v38 = vld [vmem:[%s3320_s13 + $0x18] sm:$0xff] }
  0x72   : > { %v2613_v46 = vpop.eup %2612  ;;  %2624 = vpow2.f32 %v365_v39  ;;  %v3384_v48 = vmul.f32 0.6931472, %v2611_v44 }
  0x73   : > { %v2615_v47 = vpop.eup %2614  ;;  %2626 = vlog2.f32 %v401_v40  ;;  %v411_v49 = vsub.f32 %v404_v41, %v3382_v45  ;;  %v3394_v62 = vmul.f32 0.6931472, %v2613_v46  ;;  %v496_v46 = vadd.f32 %v3350_v6, %v3417_v3 }
  0x74   : > { %v2617_v50 = vpop.eup %2616  ;;  %2628 = vlog2.f32 %v402_v43  ;;  %v3396_v9 = vmul.f32 0.6931472, %v2615_v47  ;;  %v347_v43 = vmax.f32 %v3367_v18, 0.0 }
  0x75   : > { %v2619_v51 = vpop.eup %2618  ;;  %v406_v52 = vmul.f32 0.6931472, %v2617_v50  ;;  %v415_v53 = vmul.f32 %v411_v49, %v3347_v5  ;;  %2630 = vlog2.f32 %v471_v55  ;;  %v497_v5 = vadd.f32 %v3353_v7, %v3420_v34 }
  0x76   : > { %v2621_v54 = vpop.eup %2620  ;;  %v367_v61 = vadd.f32 1.0, %v2619_v51  ;;  %2632 = vlog2.f32 %v472_v59  ;;  %v348_v49 = vmax.f32 %v3369_v19, 0.0  ;;  %v498_v51 = vadd.f32 %v3356_v8, %v3428_v38 }
  0x77   : > { %v2623_v56 = vpop.eup %2622  ;;  %v412_v57 = vsub.f32 %v406_v52, %v3384_v48  ;;  %v3391_v58 = vadd.f32 %v415_v53, %v3367_v18  ;;  %v368_v0 = vadd.f32 1.0, %v2621_v54  ;;  %v3440_v52 = vadd.f32 1.0, %v495_v4 }
  0x78   : > { %v2625_v60 = vpop.eup %2624  ;;  %v369_v1 = vadd.f32 1.0, %v2623_v56  ;;  %2634 = vlog2.f32 %v367_v61 }
  0x79   : > { %v2627_v63 = vpop.eup %2626  ;;  %v416_v10 = vmul.f32 %v412_v57, %v3350_v6  ;;  %v427_v13 = vand.u32 2147483647, %v3391_v58  ;;  %v370_v14 = vadd.f32 1.0, %v2625_v60  ;;  %2636 = vlog2.f32 %v368_v0 }
  0x7a   : > { %v2629_v11 = vpop.eup %2628  ;;  %v408_v12 = vmul.f32 0.6931472, %v2627_v63  ;;  %2638 = vlog2.f32 %v369_v1  ;;  %v349_v57 = vmax.f32 %v3371_v20, 0.0  ;;  %v350_v6 = vmax.f32 %v3373_v22, 0.0 }
  0x7b   : > { %v410_v15 = vmul.f32 0.6931472, %v2629_v11  ;;  %v3401_v2 = vadd.f32 %v416_v10, %v3369_v19  ;;  %v431_v17 = vsub.f32 0.0, %v427_v13  ;;  %2640 = vlog2.f32 %v370_v14  ;;  %v2631_v31 = vpop.eup %2630 }
  0x7c   : > { %v413_v16 = vsub.f32 %v408_v12, %v3394_v62  ;;  %v2633_v33 = vpop.eup %2632  ;;  %v3444_v19 = vadd.f32 1.0, %v496_v46  ;;  %v3446_v63 = vadd.f32 1.0, %v497_v5  ;;  %v3448_v10 = vadd.f32 1.0, %v498_v51 }
  0x7d   : > { %v414_v21 = vsub.f32 %v410_v15, %v3396_v9  ;;  %v428_v23 = vand.u32 2147483647, %v3401_v2  ;;  %v435_v27 = vmul.f32 1.442695, %v431_v17  ;;  %v478_v14 = vmul.f32 0.6931472, %v2633_v33 }
  0x7e   : > { %v417_v26 = vmul.f32 %v413_v16, %v3353_v7  ;;  %v2635_v37 = vpop.eup %2634 }
  0x7f   : > { %v418_v29 = vmul.f32 %v414_v21, %v3356_v8  ;;  %v432_v30 = vsub.f32 0.0, %v428_v23  ;;  %2642 = vpow2.f32 %v435_v27  ;;  %v2637_v40 = vpop.eup %2636  ;;  %v372_v54 = vmul.f32 0.6931472, %v2635_v37 }
  0x80   : > { %v3414_v32 = vadd.f32 %v417_v26, %v3371_v20  ;;  %2644 = vlog2.f32 %v473_v24  ;;  %v2639_v42 = vpop.eup %2638  ;;  %v374_v55 = vmul.f32 0.6931472, %v2637_v40  ;;  %v476_v20 = vmul.f32 0.6931472, %v2631_v31 }
  0x81   : > { %v3423_v35 = vadd.f32 %v418_v29, %v3373_v22  ;;  %v437_v36 = vmul.f32 1.442695, %v432_v30  ;;  %2646 = vlog2.f32 %v474_v28  ;;  %v2641_v47 = vpop.eup %2640  ;;  %v376_v59 = vmul.f32 0.6931472, %v2639_v42 }
  0x82   : > { %v429_v39 = vand.u32 2147483647, %v3414_v32  ;;  %v378_v61 = vmul.f32 0.6931472, %v2641_v47  ;;  %v3450_v11 = vadd.f32 %v372_v54, %v347_v43  ;;  %v3452_v1 = vadd.f32 %v374_v55, %v348_v49 }
  0x83   : > { %v430_v41 = vand.u32 2147483647, %v3423_v35  ;;  %2648 = vpow2.f32 %v437_v36  ;;  %v3455_v22 = vadd.f32 1.0, %v3440_v52  ;;  %v3457_v12 = vadd.f32 %v376_v59, %v349_v57 }
  0x84   : > { %v433_v44 = vsub.f32 0.0, %v429_v39  ;;  %6337 = vst [vmem:[#allocation15_spill] sm:$0xff] %v3450_v11  ;;  %v3459_v16 = vadd.f32 %v378_v61, %v350_v6  ;;  %v3462_v21 = vadd.f32 1.0, %v3444_v19  ;;  %v3465_v23 = vadd.f32 1.0, %v3446_v63 }
  0x85   : > { %v434_v50 = vsub.f32 0.0, %v430_v41  ;;  %v2643_v53 = vpop.eup %2642  ;;  %6338 = vst [vmem:[#allocation16_spill] sm:$0xff] %v3452_v1  ;;  %v3468_v24 = vadd.f32 1.0, %v3448_v10  ;;  %v3471_v26 = vadd.f32 2.0, %v3440_v52  ;;  %v3474_v27 = vadd.f32 2.0, %v3444_v19 }
  0x86   : > { %v439_v18 = vmul.f32 1.442695, %v433_v44  ;;  %v2645_v56 = vpop.eup %2644  ;;  %v443_v0 = vadd.f32 1.0, %v2643_v53  ;;  %6339 = vst [vmem:[#allocation17_spill] sm:$0xff] %v3459_v16  ;;  %v463_v29 = vsub.f32 0.0, %v3450_v11  ;;  %v464_v30 = vsub.f32 0.0, %v3452_v1 }
  0x87   : > { %v441_v7 = vmul.f32 1.442695, %v434_v50  ;;  %v2647_v60 = vpop.eup %2646  ;;  %v480_v15 = vmul.f32 0.6931472, %v2645_v56  ;;  %v483_v31 = vsub.f32 %v476_v20, %v3382_v45  ;;  %v465_v36 = vsub.f32 0.0, %v3457_v12 }
  0x88   : > { %2650 = vpow2.f32 %v439_v18  ;;  %v482_v17 = vmul.f32 0.6931472, %v2647_v60  ;;  %v484_v37 = vsub.f32 %v478_v14, %v3384_v48  ;;  %v466_v41 = vsub.f32 0.0, %v3459_v16 }
  0x89   : > { %v2649_v8 = vpop.eup %2648  ;;  %2652 = vpow2.f32 %v441_v7  ;;  %v485_v39 = vsub.f32 %v480_v15, %v3394_v62  ;;  %v423_v43 = vmax.f32 %v3391_v58, 0.0  ;;  %v3486_v45 = vadd.f32 2.0, %v3446_v63 }
  0x8a   : > { %v444_v13 = vadd.f32 1.0, %v2649_v8  ;;  %2654 = vlog2.f32 %v443_v0  ;;  %v486_v42 = vsub.f32 %v482_v17, %v3396_v9  ;;  %v468_v47 = vadd.f32 %v464_v30, %v3401_v2 }
  0x8b   : > { %2656 = vlog2.f32 %v495_v4  ;;  %v467_v4 = vadd.f32 %v463_v29, %v3391_v58  ;;  %v487_v48 = vmul.f32 %v483_v31, %v3408_v25  ;;  %v469_v49 = vadd.f32 %v465_v36, %v3414_v32 }
  0x8c   : > { %2658 = vlog2.f32 %v444_v13  ;;  %v488_v9 = vmul.f32 %v484_v37, %v3417_v3  ;;  %v470_v50 = vadd.f32 %v466_v41, %v3423_v35  ;;  %v490_v58 = vmul.f32 %v486_v42, %v3428_v38 }
  0x8d   : > { %2660 = vlog2.f32 %v496_v46  ;;  %v489_v46 = vmul.f32 %v485_v39, %v3420_v34  ;;  %v3498_v53 = vadd.f32 2.0, %v3448_v10  ;;  %v538_v3 = vand.u32 2147483648, %v3455_v22 }
  0x8e   : > { %v2651_v28 = vpop.eup %2650  ;;  %2662 = vlog2.f32 %v497_v5  ;;  %v3504_v18 = vadd.f32 %v487_v48, %v467_v4  ;;  %v553_v38 = vand.u32 2147483648, %v3462_v21  ;;  %v3510_v57 = vadd.f32 %v488_v9, %v468_v47 }
  0x8f   : > { %v2653_v33 = vpop.eup %2652  ;;  %v445_v40 = vadd.f32 1.0, %v2651_v28  ;;  %2664 = vlog2.f32 %v498_v51  ;;  %v424_v51 = vmax.f32 %v3401_v2, 0.0  ;;  %v3512_v6 = vadd.f32 %v489_v46, %v469_v49 }
  0x90   : > { %v446_v44 = vadd.f32 1.0, %v2653_v33  ;;  %v2655_v62 = vpop.eup %2654  ;;  %2666 = vlog2.f32 %v3440_v52  ;;  %vm532_vm1 = vweird.f32 %v3455_v22  ;;  %v568_v2 = vand.u32 2147483648, %v3465_v23 }
  0x91   : > { %v2657_v5 = vpop.eup %2656  ;;  %2668 = vlog2.f32 %v445_v40  ;;  %v3519_v7 = vadd.f32 %v490_v58, %v470_v50  ;;  %v536_v60 = vand.u32 2147483647, %v3455_v22  ;;  %v551_v61 = vand.u32 2147483647, %v3462_v21 }
  0x92   : > { %v2659_v25 = vpop.eup %2658  ;;  %2670 = vlog2.f32 %v446_v44  ;;  %v448_v0 = vmul.f32 0.6931472, %v2655_v62  ;;  %v3526_v20 = vor.u32 1.1754944e-38, %v538_v3  ;;  %vm547_vm2 = vweird.f32 %v3462_v21 }
  0x93   : > { %v2661_v34 = vpop.eup %2660  ;;  %2672 = vrcp.f32 %v3455_v22  ;;  %v583_v13 = vand.u32 2147483648, %v3468_v24  ;;  %v3533_v15 = vor.u32 1.1754944e-38, %v553_v38  ;;  %vm562_vm3 = vweird.f32 %v3465_v23 }
  0x94   : > { %v3508_v56 = vpop.eup %2662  ;;  %2674 = vrcp.f32 %v3462_v21  ;;  %v566_v17 = vand.u32 2147483647, %v3465_v23  ;;  %v3540_v29 = vor.u32 1.1754944e-38, %v568_v2  ;;  %vm577_vm4 = vweird.f32 %v3468_v24 }
  0x95   : > { %v3517_v59 = vpop.eup %2664  ;;  %2676 = vrcp.f32 %v3465_v23  ;;  %v581_v30 = vand.u32 2147483647, %v3468_v24  ;;  %v450_v33 = vmul.f32 0.6931472, %v2659_v25  ;;  %v3547_v36 = vmul.f32 0.6931472, %v2657_v5 }
  0x96   : > { %v3524_v8 = vpop.eup %2666  ;;  %2678 = vrcp.f32 %v3468_v24  ;;  %vm600_vm5 = vweird.f32 %v3471_v26  ;;  %v3553_v39 = vadd.f32 %v448_v0, %v423_v43  ;;  %vm3558_vm6 = vcmp.eq.f32.partialorder %v536_v60, 8.507059e+37 }
  0x97   : > { %v3531_v14 = vpop.eup %2668  ;;  %2680 = vrcp.f32 %v3471_v26  ;;  %v3562_v42 = vor.u32 1.1754944e-38, %v583_v13  ;;  %v3566_v4 = vmul.f32 0.6931472, %v2661_v34  ;;  %v604_v47 = vand.u32 2147483647, %v3471_v26 }
  0x98   : > { %v3538_v28 = vpop.eup %2670  ;;  %2682 = vrcp.f32 %v3474_v27  ;;  %6340 = vst [vmem:[#allocation18_spill] sm:$0xff] %v3553_v39  ;;  %v606_v9 = vand.u32 2147483648, %v3471_v26  ;;  %v3580_v5 = vadd.f32 %v450_v33, %v424_v51  ;;  %vm3583_vm9 = vcmp.eq.f32.partialorder %v551_v61, 8.507059e+37 }
  0x99   : > { %v3545_v31 = vpop.eup %2672  ;;  %2684 = vrcp.f32 %v3486_v45  ;;  %vm3587_vm10 = vcmp.eq.f32.partialorder %v566_v17, 8.507059e+37  ;;  %vm3597_vm12 = vcmp.eq.f32.partialorder %v581_v30, 8.507059e+37  ;;  %v634_v41 = vand.u32 2147483647, %v3486_v45 }
  0x9a   : > { %v3551_v37 = vpop.eup %2674  ;;  %2686 = vlog2.f32 %v3444_v19  ;;  %v528_v40 = vmul.f32 %v3545_v31, %v3455_v22  ;;  %vm533_vm7 = vweird.f32 %v3545_v31  ;;  %6343 = vst [vmem:[#allocation19_spill] sm:$0xff] %v3580_v5 }
  0x9b   : > { %v3564_v44 = vpop.eup %2676  ;;  %2688 = vlog2.f32 %v3446_v63  ;;  %v543_v43 = vmul.f32 %v3551_v37, %v3462_v21  ;;  %vm548_vm8 = vweird.f32 %v3551_v37  ;;  %vm3609_vm13 = vmor %vm532_vm1, %vm533_vm7  ;;  %vm3660_vm7 = vcmp.eq.f32.partialorder %v604_v47, 8.507059e+37 }
  0x9c   : > { %v3572_v48 = vpop.eup %2678  ;;  %v529_v62 = vsub.f32 1.0, %v528_v40  ;;  %v558_v49 = vmul.f32 %v3564_v44, %v3465_v23  ;;  %vm563_vm11 = vweird.f32 %v3564_v44  ;;  %vm3630_vm15 = vmor %vm547_vm2, %vm548_vm8  ;;  %2690 = vrcp.f32 %v3498_v53 }
  0x9d   : > { %v3578_v46 = vpop.eup %2680  ;;  %v544_v50 = vsub.f32 1.0, %v543_v43  ;;  %v573_v3 = vmul.f32 %v3572_v48, %v3468_v24  ;;  %vm578_vm14 = vweird.f32 %v3572_v48  ;;  %vm3646_vm1 = vmor %vm562_vm3, %vm563_vm11  ;;  %vm615_vm3 = vweird.f32 %v3474_v27 }
  0x9e   : > { %v3593_v34 = vpop.eup %2682  ;;  %v530_v38 = vmul.f32 %v3545_v31, %v529_v62  ;;  %v559_v51 = vsub.f32 1.0, %v558_v49  ;;  %v596_v60 = vmul.f32 %v3578_v46, %v3471_v26  ;;  %vm601_vm0 = vweird.f32 %v3578_v46  ;;  %vm3656_vm2 = vmor %vm577_vm4, %vm578_vm14 }
  0x9f   : > { %v3603_v61 = vpop.eup %2684  ;;  %v545_v13 = vmul.f32 %v3551_v37, %v544_v50  ;;  %v574_v17 = vsub.f32 1.0, %v573_v3  ;;  %v611_v30 = vmul.f32 %v3593_v34, %v3474_v27  ;;  %vm3669_vm8 = vmor %vm600_vm5, %vm601_vm0  ;;  %vm616_vm4 = vweird.f32 %v3593_v34 }
  0xa0   : > { %v3617_v33 = vpop.eup %2686  ;;  %v531_v40 = vadd.f32 %v3545_v31, %v530_v38  ;;  %v560_v43 = vmul.f32 %v3564_v44, %v559_v51  ;;  %v597_v62 = vsub.f32 1.0, %v596_v60  ;;  %v626_v22 = vmul.f32 %v3603_v61, %v3486_v45  ;;  %vm3695_vm5 = vmor %vm615_vm3, %vm616_vm4 }
  0xa1   : > { %v3623_v49 = vpop.eup %2688  ;;  %v546_v50 = vadd.f32 %v3551_v37, %v545_v13  ;;  %v575_v38 = vmul.f32 %v3572_v48, %v574_v17  ;;  %v612_v51 = vsub.f32 1.0, %v611_v30  ;;  %v619_v24 = vand.u32 2147483647, %v3474_v27 }
  0xa2   : > { %v535_v13 = vsel %vm3609_vm13, %v3545_v31, %v531_v40  ;;  %v561_v55 = vadd.f32 %v3564_v44, %v560_v43  ;;  %v598_v17 = vmul.f32 %v3578_v46, %v597_v62  ;;  %v627_v47 = vsub.f32 1.0, %v626_v22 }
  0xa3   : > { %v576_v30 = vadd.f32 %v3572_v48, %v575_v38  ;;  %v613_v23 = vmul.f32 %v3593_v34, %v612_v51  ;;  %v540_v62 = vsel %vm3558_vm6, %v3526_v20, %v535_v13  ;;  %v550_v38 = vsel %vm3630_vm15, %v3551_v37, %v546_v50 }
  0xa4   : > { %v599_v40 = vadd.f32 %v3578_v46, %v598_v17  ;;  %v565_v26 = vsel %vm3646_vm1, %v3564_v44, %v561_v55  ;;  %v621_v51 = vand.u32 2147483648, %v3474_v27  ;;  %v607_v60 = vor.u32 1.1754944e-38, %v606_v9 }
  0xa5   : > { %v580_v17 = vsel %vm3656_vm2, %v3572_v48, %v576_v30  ;;  %v614_v22 = vadd.f32 %v3593_v34, %v613_v23  ;;  %vm630_vm6 = vweird.f32 %v3486_v45  ;;  %vm631_vm11 = vweird.f32 %v3603_v61 }
  0xa6   : > { %v603_v20 = vsel %vm3669_vm8, %v3578_v46, %v599_v40  ;;  %v636_v55 = vand.u32 2147483648, %v3486_v45  ;;  %v541_v44 = vmul.f32 676.5204, %v540_v62  ;;  %v555_v48 = vsel %vm3583_vm9, %v3533_v15, %v550_v38  ;;  %vm3723_vm9 = vmor %vm630_vm6, %vm631_vm11  ;;  %v3749_v62 = vpop.eup %2690 }
  0xa7   : > { %v570_v9 = vsel %vm3587_vm10, %v3540_v29, %v565_v26  ;;  %v628_v27 = vmul.f32 %v3603_v61, %v627_v47  ;;  %v585_v46 = vsel %vm3597_vm12, %v3562_v42, %v580_v17  ;;  %vm3712_vm13 = vcmp.eq.f32.partialorder %v619_v24, 8.507059e+37 }
  0xa8   : > { %v622_v45 = vor.u32 1.1754944e-38, %v621_v51  ;;  %v608_v15 = vsel %vm3660_vm7, %v607_v60, %v603_v20  ;;  %v618_v29 = vsel %vm3695_vm5, %v3593_v34, %v614_v22  ;;  %vm3727_vm10 = vcmp.eq.f32.partialorder %v634_v41, 8.507059e+37 }
  0xa9   : > { %v629_v58 = vadd.f32 %v3603_v61, %v628_v27  ;;  %v556_v2 = vmul.f32 676.5204, %v555_v48  ;;  %v571_v3 = vmul.f32 676.5204, %v570_v9  ;;  %v659_v13 = vadd.f32 3.0, %v3440_v52 }
  0xaa   : > { %v3733_v60 = vadd.f32 3.0, %v3444_v19  ;;  %v586_v21 = vmul.f32 676.5204, %v585_v46  ;;  %v587_v30 = vadd.f32 1.0, %v541_v44  ;;  %v637_v34 = vor.u32 1.1754944e-38, %v636_v55 }
  0xab   : > { %v3736_v31 = vadd.f32 3.0, %v3446_v63  ;;  %v609_v0 = vmul.f32 -1259.1392, %v608_v15  ;;  %v623_v23 = vsel %vm3712_vm13, %v622_v45, %v618_v29  ;;  %v633_v40 = vsel %vm3723_vm9, %v3603_v61, %v629_v58 }
  0xac   : > { %2692 = vrcp.f32 %v659_v13  ;;  %v649_v43 = vand.u32 2147483647, %v3498_v53  ;;  %v651_v24 = vand.u32 2147483648, %v3498_v53  ;;  %v3746_v47 = vadd.f32 3.0, %v3448_v10 }
  0xad   : > { %2694 = vrcp.f32 %v3733_v60  ;;  %v3752_v38 = vmul.f32 0.6931472, %v3508_v56  ;;  %v3754_v26 = vadd.f32 1.0, %v556_v2  ;;  %v3756_v51 = vadd.f32 1.0, %v571_v3 }
  0xae   : > { %2696 = vrcp.f32 %v3736_v31  ;;  %v3759_v61 = vadd.f32 1.0, %v586_v21  ;;  %v3761_v17 = vmul.f32 -1259.1392, %v623_v23  ;;  %v638_v22 = vsel %vm3727_vm10, %v637_v34, %v633_v40 }
  0xaf   : > { %v641_v41 = vmul.f32 %v3749_v62, %v3498_v53  ;;  %vm645_vm12 = vweird.f32 %v3498_v53  ;;  %v3768_v56 = vadd.f32 %v609_v0, %v587_v30  ;;  %v672_v20 = vand.u32 2147483647, %v659_v13 }
  0xb0   : > { %v674_v37 = vand.u32 2147483648, %v659_v13  ;;  %vm3770_vm14 = vcmp.eq.f32.partialorder %v649_v43, 8.507059e+37  ;;  %v652_v48 = vor.u32 1.1754944e-38, %v651_v24  ;;  %2698 = vrcp.f32 %v3746_v47 }
  0xb1   : > { %v642_v55 = vsub.f32 1.0, %v641_v41  ;;  %v3775_v27 = vmul.f32 -1259.1392, %v638_v22  ;;  %vm668_vm15 = vweird.f32 %v659_v13  ;;  %vm683_vm0 = vweird.f32 %v3733_v60 }
  0xb2   : > { %v2693_v9 = vpop.eup %2692  ;;  %v687_v46 = vand.u32 2147483647, %v3733_v60  ;;  %vm646_vm1 = vweird.f32 %v3749_v62  ;;  %v689_v29 = vand.u32 2147483648, %v3733_v60  ;;  %vm3782_vm2 = vcmp.eq.f32.partialorder %v672_v20, 8.507059e+37 }
  0xb3   : > { %v2695_v50 = vpop.eup %2694  ;;  %v643_v45 = vmul.f32 %v3749_v62, %v642_v55  ;;  %v664_v15 = vmul.f32 %v2693_v9, %v659_v13  ;;  %v675_v42 = vor.u32 1.1754944e-38, %v674_v37  ;;  %v3788_v3 = vadd.f32 4.0, %v3440_v52  ;;  %vm3794_vm3 = vmor %vm645_vm12, %vm646_vm1 }
  0xb4   : > { %v2697_v58 = vpop.eup %2696  ;;  %v679_v2 = vmul.f32 %v2695_v50, %v3733_v60  ;;  %vm669_vm7 = vweird.f32 %v2693_v9  ;;  %vm684_vm8 = vweird.f32 %v2695_v50  ;;  %vm698_vm4 = vweird.f32 %v3736_v31 }
  0xb5   : > { %v644_v21 = vadd.f32 %v3749_v62, %v643_v45  ;;  %v665_v30 = vsub.f32 1.0, %v664_v15  ;;  %v694_v34 = vmul.f32 %v2697_v58, %v3736_v31  ;;  %v702_v40 = vand.u32 2147483647, %v3736_v31  ;;  %vm3804_vm6 = vmor %vm668_vm15, %vm669_vm7 }
  0xb6   : > { %v680_v23 = vsub.f32 1.0, %v679_v2  ;;  %v3800_v43 = vpop.eup %2698  ;;  %vm699_vm5 = vweird.f32 %v2697_v58  ;;  %v704_v41 = vand.u32 2147483648, %v3736_v31  ;;  %vm3808_vm11 = vcmp.eq.f32.partialorder %v687_v46, 8.507059e+37  ;;  %vm3820_vm13 = vmor %vm683_vm0, %vm684_vm8 }
  0xb7   : > { %v666_v24 = vmul.f32 %v2693_v9, %v665_v30  ;;  %v695_v22 = vsub.f32 1.0, %v694_v34  ;;  %v690_v55 = vor.u32 1.1754944e-38, %v689_v29  ;;  %v709_v45 = vmul.f32 %v3800_v43, %v3746_v47  ;;  %vm3827_vm9 = vmor %vm698_vm4, %vm699_vm5 }
  0xb8   : > { %v681_v20 = vmul.f32 %v2695_v50, %v680_v23  ;;  %v648_v15 = vsel %vm3794_vm3, %v3749_v62, %v644_v21  ;;  %2700 = vrcp.f32 %v3788_v3  ;;  %vm713_vm10 = vweird.f32 %v3746_v47 }
  0xb9   : > { %v667_v2 = vadd.f32 %v2693_v9, %v666_v24  ;;  %v696_v46 = vmul.f32 %v2697_v58, %v695_v22  ;;  %v710_v34 = vsub.f32 1.0, %v709_v45  ;;  %v3833_v62 = vadd.f32 4.0, %v3444_v19 }
  0xba   : > { %v682_v30 = vadd.f32 %v2695_v50, %v681_v20  ;;  %vm3837_vm12 = vcmp.eq.f32.partialorder %v702_v40, 8.507059e+37  ;;  %v705_v23 = vor.u32 1.1754944e-38, %v704_v41  ;;  %v653_v31 = vsel %vm3770_vm14, %v652_v48, %v648_v15 }
  0xbb   : > { %v671_v60 = vsel %vm3804_vm6, %v2693_v9, %v667_v2  ;;  %v697_v21 = vadd.f32 %v2697_v58, %v696_v46  ;;  %v711_v22 = vmul.f32 %v3800_v43, %v710_v34  ;;  %vm714_vm15 = vweird.f32 %v3800_v43 }
  0xbc   : > { %v686_v24 = vsel %vm3820_vm13, %v2695_v50, %v682_v30  ;;  %v717_v9 = vand.u32 2147483647, %v3746_v47  ;;  %v719_v40 = vand.u32 2147483648, %v3746_v47  ;;  %v3852_v20 = vadd.f32 4.0, %v3446_v63  ;;  %vm3866_vm14 = vmor %vm713_vm10, %vm714_vm15 }
  0xbd   : > { %v701_v53 = vsel %vm3827_vm9, %v2697_v58, %v697_v21  ;;  %v676_v44 = vsel %vm3782_vm2, %v675_v42, %v671_v60  ;;  %v691_v48 = vsel %vm3808_vm11, %v690_v55, %v686_v24  ;;  %v712_v50 = vadd.f32 %v3800_v43, %v711_v22 }
  0xbe   : > { %2702 = vrcp.f32 %v3833_v62  ;;  %v2701_v41 = vpop.eup %2700  ;;  %v654_v45 = vmul.f32 -1259.1392, %v653_v31  ;;  %v656_v58 = vadd.f32 %v3761_v17, %v3754_v26  ;;  %v706_v15 = vsel %vm3837_vm12, %v705_v23, %v701_v53 }
  0xbf   : > { %v3871_v42 = vadd.f32 4.0, %v3448_v10  ;;  %v657_v37 = vadd.f32 %v3775_v27, %v3756_v51  ;;  %v732_v55 = vmul.f32 %v2701_v41, %v3788_v3  ;;  %v740_v2 = vand.u32 2147483647, %v3788_v3 }
  0xc0   : > { %v742_v26 = vand.u32 2147483648, %v3788_v3  ;;  %v677_v17 = vmul.f32 771.3234, %v676_v44  ;;  %v692_v13 = vmul.f32 771.3234, %v691_v48  ;;  %vm718_vm0 = vcmp.eq.f32.partialorder %v717_v9, 8.507059e+37 }
  0xc1   : > { %v720_v47 = vor.u32 1.1754944e-38, %v719_v40  ;;  %v707_v46 = vmul.f32 771.3234, %v706_v15  ;;  %v716_v30 = vsel %vm3866_vm14, %v3800_v43, %v712_v50  ;;  %v733_v29 = vsub.f32 1.0, %v732_v55 }
  0xc2   : > { %2704 = vrcp.f32 %v3852_v20  ;;  %v658_v51 = vadd.f32 %v654_v45, %v3759_v61  ;;  %vm736_vm1 = vweird.f32 %v3788_v3  ;;  %vm737_vm2 = vweird.f32 %v2701_v41 }
  0xc3   : > { %2706 = vrcp.f32 %v3871_v42  ;;  %v734_v34 = vmul.f32 %v2701_v41, %v733_v29  ;;  %vm3885_vm7 = vcmp.eq.f32.partialorder %v740_v2, 8.507059e+37  ;;  %v743_v21 = vor.u32 1.1754944e-38, %v742_v26  ;;  %vm3901_vm8 = vmor %vm736_vm1, %vm737_vm2 }
  0xc4   : > { %v2703_v27 = vpop.eup %2702  ;;  %v755_v0 = vand.u32 2147483647, %v3833_v62  ;;  %v721_v43 = vsel %vm718_vm0, %v720_v47, %v716_v30  ;;  %v3891_v23 = vadd.f32 %v677_v17, %v3768_v56  ;;  %vm751_vm3 = vweird.f32 %v3833_v62 }
  0xc5   : > { %v747_v61 = vmul.f32 %v2703_v27, %v3833_v62  ;;  %v3895_v31 = vadd.f32 %v692_v13, %v656_v58  ;;  %v3897_v24 = vadd.f32 %v707_v46, %v657_v37  ;;  %v735_v22 = vadd.f32 %v2701_v41, %v734_v34 }
  0xc6   : > { %v3906_v9 = vadd.f32 5.0, %v3440_v52  ;;  %vm752_vm4 = vweird.f32 %v2703_v27  ;;  %v757_v40 = vand.u32 2147483648, %v3833_v62  ;;  %v3910_v44 = vadd.f32 5.0, %v3444_v19 }
  0xc7   : > { %v748_v56 = vsub.f32 1.0, %v747_v61  ;;  %v722_v50 = vmul.f32 771.3234, %v721_v43  ;;  %vm3914_vm5 = vcmp.eq.f32.partialorder %v755_v0, 8.507059e+37  ;;  %vm766_vm6 = vweird.f32 %v3852_v20  ;;  %vm3929_vm11 = vmor %vm751_vm3, %vm752_vm4 }
  0xc8   : > { %v3912_v48 = vpop.eup %2704  ;;  %2708 = vrcp.f32 %v3906_v9  ;;  %v739_v58 = vsel %vm3901_vm8, %v2701_v41, %v735_v22  ;;  %v770_v37 = vand.u32 2147483647, %v3852_v20  ;;  %v772_v2 = vand.u32 2147483648, %v3852_v20 }
  0xc9   : > { %v3920_v3 = vpop.eup %2706  ;;  %v749_v15 = vmul.f32 %v2703_v27, %v748_v56  ;;  %v762_v25 = vmul.f32 %v3912_v48, %v3852_v20  ;;  %v785_v17 = vand.u32 2147483647, %v3871_v42  ;;  %v3938_v41 = vadd.f32 5.0, %v3446_v63 }
  0xca   : > { %v777_v26 = vmul.f32 %v3920_v3, %v3871_v42  ;;  %v758_v47 = vor.u32 1.1754944e-38, %v757_v40  ;;  %2710 = vrcp.f32 %v3910_v44  ;;  %v3941_v62 = vadd.f32 %v722_v50, %v658_v51 }
  0xcb   : > { %v750_v13 = vadd.f32 %v2703_v27, %v749_v15  ;;  %v763_v46 = vsub.f32 1.0, %v762_v25  ;;  %v744_v30 = vsel %vm3885_vm7, %v743_v21, %v739_v58  ;;  %v787_v34 = vand.u32 2147483648, %v3871_v42 }
  0xcc   : > { %v778_v29 = vsub.f32 1.0, %v777_v26  ;;  %vm3949_vm13 = vcmp.eq.f32.partialorder %v770_v37, 8.507059e+37  ;;  %vm781_vm9 = vweird.f32 %v3871_v42  ;;  %v773_v51 = vor.u32 1.1754944e-38, %v772_v2 }
  0xcd   : > { %v754_v0 = vsel %vm3929_vm11, %v2703_v27, %v750_v13  ;;  %v764_v43 = vmul.f32 %v3912_v48, %v763_v46  ;;  %vm3957_vm10 = vcmp.eq.f32.partialorder %v785_v17, 8.507059e+37  ;;  %2712 = vrcp.f32 %v3938_v41 }
  0xce   : > { %v3954_v22 = vpop.eup %2708  ;;  %v779_v60 = vmul.f32 %v3920_v3, %v778_v29  ;;  %v745_v27 = vmul.f32 -176.61504, %v744_v30  ;;  %vm767_vm12 = vweird.f32 %v3912_v48  ;;  %v3964_v53 = vadd.f32 5.0, %v3448_v10 }
  0xcf   : > { %v800_v56 = vmul.f32 %v3954_v22, %v3906_v9  ;;  %v759_v40 = vsel %vm3914_vm5, %v758_v47, %v754_v0  ;;  %vm782_vm15 = vweird.f32 %v3920_v3  ;;  %v788_v50 = vor.u32 1.1754944e-38, %v787_v34  ;;  %vm3977_vm0 = vmor %vm766_vm6, %vm767_vm12 }
  0xd0   : > { %vm804_vm14 = vweird.f32 %v3906_v9  ;;  %v2711_v58 = vpop.eup %2710  ;;  %v765_v15 = vadd.f32 %v3912_v48, %v764_v43  ;;  %v808_v37 = vand.u32 2147483647, %v3906_v9  ;;  %v810_v55 = vand.u32 2147483648, %v3906_v9  ;;  %vm3987_vm2 = vmor %vm781_vm9, %vm782_vm15 }
  0xd1   : > { %v801_v25 = vsub.f32 1.0, %v800_v56  ;;  %v780_v45 = vadd.f32 %v3920_v3, %v779_v60  ;;  %vm805_vm1 = vweird.f32 %v3954_v22  ;;  %v815_v26 = vmul.f32 %v2711_v58, %v3910_v44 }
  0xd2   : > { %v823_v17 = vand.u32 2147483647, %v3910_v44  ;;  %v760_v13 = vmul.f32 -176.61504, %v759_v40  ;;  %v3992_v20 = vadd.f32 %v745_v27, %v3891_v23  ;;  %v825_v30 = vand.u32 2147483648, %v3910_v44  ;;  %vm4008_vm8 = vmor %vm804_vm14, %vm805_vm1 }
  0xd3   : > { %v802_v46 = vmul.f32 %v3954_v22, %v801_v25  ;;  %v3996_v29 = vpop.eup %2712  ;;  %v816_v34 = vsub.f32 1.0, %v815_v26  ;;  %vm819_vm7 = vweird.f32 %v3910_v44  ;;  %vm820_vm3 = vweird.f32 %v2711_v58 }
  0xd4   : > { %2714 = vrcp.f32 %v3964_v53  ;;  %v769_v42 = vsel %vm3977_vm0, %v3912_v48, %v765_v15  ;;  %vm4012_vm4 = vcmp.eq.f32.partialorder %v808_v37, 8.507059e+37  ;;  %v830_v44 = vmul.f32 %v3996_v29, %v3938_v41  ;;  %vm4026_vm6 = vmor %vm819_vm7, %vm820_vm3 }
  0xd5   : > { %v803_v0 = vadd.f32 %v3954_v22, %v802_v46  ;;  %v784_v48 = vsel %vm3987_vm2, %v3920_v3, %v780_v45  ;;  %v811_v60 = vor.u32 1.1754944e-38, %v810_v55  ;;  %v817_v27 = vmul.f32 %v2711_v58, %v816_v34 }
  0xd6   : > { %vm4021_vm5 = vcmp.eq.f32.partialorder %v823_v17, 8.507059e+37  ;;  %v792_v9 = vadd.f32 %v760_v13, %v3895_v31  ;;  %v826_v15 = vor.u32 1.1754944e-38, %v825_v30  ;;  %v831_v25 = vsub.f32 1.0, %v830_v44 }
  0xd7   : > { %vm834_vm11 = vweird.f32 %v3938_v41  ;;  %v774_v37 = vsel %vm3949_vm13, %v773_v51, %v769_v42  ;;  %v807_v3 = vsel %vm4008_vm8, %v3954_v22, %v803_v0  ;;  %v818_v55 = vadd.f32 %v2711_v58, %v817_v27 }
  0xd8   : > { %v863_v2 = vadd.f32 6.0, %v3440_v52  ;;  %v789_v31 = vsel %vm3957_vm10, %v788_v50, %v784_v48  ;;  %v832_v45 = vmul.f32 %v3996_v29, %v831_v25  ;;  %vm835_vm9 = vweird.f32 %v3996_v29 }
  0xd9   : > { %v4042_v26 = vadd.f32 6.0, %v3444_v19  ;;  %v822_v61 = vsel %vm4026_vm6, %v2711_v58, %v818_v55  ;;  %v838_v51 = vand.u32 2147483647, %v3938_v41  ;;  %v840_v22 = vand.u32 2147483648, %v3938_v41  ;;  %vm4054_vm13 = vmor %vm834_vm11, %vm835_vm9 }
  0xda   : > { %v2715_v17 = vpop.eup %2714  ;;  %2716 = vrcp.f32 %v863_v2  ;;  %v775_v13 = vmul.f32 -176.61504, %v774_v37  ;;  %v812_v21 = vsel %vm4012_vm4, %v811_v60, %v807_v3  ;;  %v833_v50 = vadd.f32 %v3996_v29, %v832_v45 }
  0xdb   : > { %v845_v47 = vmul.f32 %v2715_v17, %v3964_v53  ;;  %v790_v46 = vmul.f32 -176.61504, %v789_v31  ;;  %vm849_vm10 = vweird.f32 %v3964_v53  ;;  %v853_v58 = vand.u32 2147483647, %v3964_v53 }
  0xdc   : > { %v4061_v34 = vadd.f32 6.0, %v3446_v63  ;;  %v827_v42 = vsel %vm4021_vm5, %v826_v15, %v822_v61  ;;  %vm850_vm12 = vweird.f32 %v2715_v17  ;;  %2718 = vrcp.f32 %v4042_v26 }
  0xdd   : > { %v846_v0 = vsub.f32 1.0, %v845_v47  ;;  %v813_v23 = vmul.f32 12.507343, %v812_v21  ;;  %vm4066_vm15 = vcmp.eq.f32.partialorder %v838_v51, 8.507059e+37  ;;  %v841_v43 = vor.u32 1.1754944e-38, %v840_v22  ;;  %vm4083_vm14 = vmor %vm849_vm10, %vm850_vm12 }
  0xde   : > { %v855_v44 = vand.u32 2147483648, %v3964_v53  ;;  %v793_v48 = vadd.f32 %v775_v13, %v3897_v24  ;;  %v837_v60 = vsel %vm4054_vm13, %v3996_v29, %v833_v50  ;;  %v4076_v56 = vadd.f32 6.0, %v3448_v10 }
  0xdf   : > { %v847_v27 = vmul.f32 %v2715_v17, %v846_v0  ;;  %v4079_v15 = vadd.f32 %v790_v46, %v3941_v62  ;;  %v828_v25 = vmul.f32 12.507343, %v827_v42  ;;  %v876_v24 = vand.u32 2147483647, %v863_v2 }
  0xe0   : > { %v2717_v40 = vpop.eup %2716  ;;  %2720 = vrcp.f32 %v4061_v34  ;;  %vm4088_vm0 = vcmp.eq.f32.partialorder %v853_v58, 8.507059e+37  ;;  %v878_v31 = vand.u32 2147483648, %v863_v2  ;;  %v842_v62 = vsel %vm4066_vm15, %v841_v43, %v837_v60 }
  0xe1   : > { %v848_v3 = vadd.f32 %v2715_v17, %v847_v27  ;;  %v868_v55 = vmul.f32 %v2717_v40, %v863_v2  ;;  %v856_v45 = vor.u32 1.1754944e-38, %v855_v44  ;;  %v4095_v53 = vadd.f32 %v813_v23, %v3992_v20 }
  0xe2   : > { %vm872_vm1 = vweird.f32 %v863_v2  ;;  %v4097_v61 = vpop.eup %2718  ;;  %vm873_vm2 = vweird.f32 %v2717_v40  ;;  %2722 = vrcp.f32 %v4076_v56  ;;  %v4102_v13 = vadd.f32 %v828_v25, %v792_v9 }
  0xe3   : > { %v852_v51 = vsel %vm4083_vm14, %v2715_v17, %v848_v3  ;;  %v869_v22 = vsub.f32 1.0, %v868_v55  ;;  %vm4104_vm7 = vcmp.eq.f32.partialorder %v876_v24, 8.507059e+37  ;;  %v883_v20 = vmul.f32 %v4097_v61, %v4042_v26  ;;  %vm4115_vm8 = vmor %vm872_vm1, %vm873_vm2 }
  0xe4   : > { %vm887_vm3 = vweird.f32 %v4042_v26  ;;  %v843_v50 = vmul.f32 12.507343, %v842_v62  ;;  %v879_v46 = vor.u32 1.1754944e-38, %v878_v31  ;;  %v891_v17 = vand.u32 2147483647, %v4042_v26 }
  0xe5   : > { %v870_v47 = vmul.f32 %v2717_v40, %v869_v22  ;;  %v857_v58 = vsel %vm4088_vm0, %v856_v45, %v852_v51  ;;  %v884_v42 = vsub.f32 1.0, %v883_v20  ;;  %v893_v0 = vand.u32 2147483648, %v4042_v26 }
  0xe6   : > { %v2721_v30 = vpop.eup %2720  ;;  %v4121_v23 = vadd.f32 7.0, %v3440_v52  ;;  %vm902_vm4 = vweird.f32 %v4061_v34  ;;  %v906_v44 = vand.u32 2147483647, %v4061_v34  ;;  %vm888_vm5 = vweird.f32 %v4097_v61 }
  0xe7   : > { %v871_v41 = vadd.f32 %v2717_v40, %v870_v47  ;;  %v898_v43 = vmul.f32 %v2721_v30, %v4061_v34  ;;  %v885_v60 = vmul.f32 %v4097_v61, %v884_v42  ;;  %v908_v2 = vand.u32 2147483648, %v4061_v34  ;;  %vm4145_vm11 = vmor %vm887_vm3, %vm888_vm5 }
  0xe8   : > { %v4130_v27 = vadd.f32 7.0, %v3444_v19  ;;  %v4132_v25 = vpop.eup %2722  ;;  %v858_v37 = vmul.f32 12.507343, %v857_v58  ;;  %2724 = vrcp.f32 %v4121_v23  ;;  %vm903_vm6 = vweird.f32 %v2721_v30 }
  0xe9   : > { %v875_v24 = vsel %vm4115_vm8, %v2717_v40, %v871_v41  ;;  %v899_v3 = vsub.f32 1.0, %v898_v43  ;;  %v886_v29 = vadd.f32 %v4097_v61, %v885_v60  ;;  %v913_v55 = vmul.f32 %v4132_v25, %v4076_v56  ;;  %vm4162_vm13 = vmor %vm902_vm4, %vm903_vm6 }
  0xea   : > { %v921_v31 = vand.u32 2147483647, %v4076_v56  ;;  %v880_v62 = vsel %vm4104_vm7, %v879_v46, %v875_v24  ;;  %v923_v51 = vand.u32 2147483648, %v4076_v56  ;;  %v4151_v22 = vadd.f32 7.0, %v3446_v63 }
  0xeb   : > { %v900_v40 = vmul.f32 %v2721_v30, %v899_v3  ;;  %v4153_v20 = vadd.f32 %v843_v50, %v793_v48  ;;  %vm4155_vm9 = vcmp.eq.f32.partialorder %v891_v17, 8.507059e+37  ;;  %v914_v21 = vsub.f32 1.0, %v913_v55 }
  0xec   : > { %2726 = vrcp.f32 %v4130_v27  ;;  %v894_v26 = vor.u32 1.1754944e-38, %v893_v0  ;;  %vm4166_vm10 = vcmp.eq.f32.partialorder %v906_v44, 8.507059e+37  ;;  %vm917_vm12 = vweird.f32 %v4076_v56 }
  0xed   : > { %v901_v46 = vadd.f32 %v2721_v30, %v900_v40  ;;  %v4172_v48 = vadd.f32 %v858_v37, %v4079_v15  ;;  %v881_v50 = vmul.f32 -0.1385711, %v880_v62  ;;  %v890_v17 = vsel %vm4145_vm11, %v4097_v61, %v886_v29 }
  0xee   : > { %v909_v42 = vor.u32 1.1754944e-38, %v908_v2  ;;  %v2725_v34 = vpop.eup %2724  ;;  %v915_v0 = vmul.f32 %v4132_v25, %v914_v21  ;;  %vm4178_vm15 = vcmp.eq.f32.partialorder %v921_v31, 8.507059e+37  ;;  %v924_v43 = vor.u32 1.1754944e-38, %v923_v51 }
  0xef   : > { %2728 = vrcp.f32 %v4151_v22  ;;  %v905_v15 = vsel %vm4162_vm13, %v2721_v30, %v901_v46  ;;  %v4186_v44 = vadd.f32 7.0, %v3448_v10  ;;  %v936_v60 = vmul.f32 %v2725_v34, %v4121_v23 }
  0xf0   : > { %v944_v61 = vand.u32 2147483647, %v4121_v23  ;;  %v895_v2 = vsel %vm4155_vm9, %v894_v26, %v890_v17  ;;  %vm918_vm14 = vweird.f32 %v4132_v25  ;;  %vm940_vm0 = vweird.f32 %v4121_v23 }
  0xf1   : > { %v946_v37 = vand.u32 2147483648, %v4121_v23  ;;  %v4196_v3 = vadd.f32 %v881_v50, %v4095_v53  ;;  %v937_v30 = vsub.f32 1.0, %v936_v60  ;;  %vm941_vm1 = vweird.f32 %v2725_v34  ;;  %vm4206_vm7 = vmor %vm917_vm12, %vm918_vm14 }
  0xf2   : > { %v2727_v24 = vpop.eup %2726  ;;  %vm955_vm2 = vweird.f32 %v4130_v27  ;;  %v910_v29 = vsel %vm4166_vm10, %v909_v42, %v905_v15  ;;  %v916_v55 = vadd.f32 %v4132_v25, %v915_v0  ;;  %v959_v62 = vand.u32 2147483647, %v4130_v27  ;;  %vm4217_vm8 = vmor %vm940_vm0, %vm941_vm1 }
  0xf3   : > { %v951_v31 = vmul.f32 %v2727_v24, %v4130_v27  ;;  %v896_v45 = vmul.f32 -0.1385711, %v895_v2  ;;  %v938_v53 = vmul.f32 %v2725_v34, %v937_v30  ;;  %vm4210_vm3 = vcmp.eq.f32.partialorder %v944_v61, 8.507059e+37 }
  0xf4   : > { %v961_v47 = vand.u32 2147483648, %v4130_v27  ;;  %v947_v46 = vor.u32 1.1754944e-38, %v946_v37  ;;  %vm956_vm4 = vweird.f32 %v2727_v24  ;;  %2730 = vrcp.f32 %v4186_v44 }
  0xf5   : > { %v2729_v21 = vpop.eup %2728  ;;  %v952_v56 = vsub.f32 1.0, %v951_v31  ;;  %v911_v58 = vmul.f32 -0.1385711, %v910_v29  ;;  %v939_v9 = vadd.f32 %v2725_v34, %v938_v53  ;;  %vm970_vm5 = vweird.f32 %v4151_v22  ;;  %vm4238_vm11 = vmor %vm955_vm2, %vm956_vm4 }
  0xf6   : > { %v966_v50 = vmul.f32 %v2729_v21, %v4151_v22  ;;  %v920_v17 = vsel %vm4206_vm7, %v4132_v25, %v916_v55  ;;  %vm4227_vm6 = vcmp.eq.f32.partialorder %v959_v62, 8.507059e+37  ;;  %v4232_v15 = vadd.f32 8.0, %v3440_v52 }
  0xf7   : > { %v953_v42 = vmul.f32 %v2727_v24, %v952_v56  ;;  %v943_v60 = vsel %vm4217_vm8, %v2725_v34, %v939_v9  ;;  %v962_v2 = vor.u32 1.1754944e-38, %v961_v47  ;;  %v4243_v25 = vadd.f32 8.0, %v3444_v19 }
  0xf8   : > { %v967_v37 = vsub.f32 1.0, %v966_v50  ;;  %vm971_vm9 = vweird.f32 %v2729_v21  ;;  %v974_v29 = vand.u32 2147483647, %v4151_v22  ;;  %v976_v55 = vand.u32 2147483648, %v4151_v22 }
  0xf9   : > { %v954_v30 = vadd.f32 %v2727_v24, %v953_v42  ;;  %v925_v34 = vsel %vm4178_vm15, %v924_v43, %v920_v17  ;;  %v948_v31 = vsel %vm4210_vm3, %v947_v46, %v943_v60  ;;  %2732 = vrcp.f32 %v4232_v15  ;;  %vm4270_vm13 = vmor %vm970_vm5, %vm971_vm9 }
  0xfa   : > { %v968_v62 = vmul.f32 %v2729_v21, %v967_v37  ;;  %v4252_v40 = vpop.eup %2730  ;;  %v991_v47 = vand.u32 2147483648, %v4186_v44  ;;  %v4258_v26 = vadd.f32 8.0, %v3446_v63  ;;  %2734 = vrcp.f32 %v4243_v25 }
  0xfb   : > { %v958_v53 = vsel %vm4238_vm11, %v2727_v24, %v954_v30  ;;  %v4262_v41 = vadd.f32 %v896_v45, %v4102_v13  ;;  %v4265_v43 = vadd.f32 %v911_v58, %v4153_v20  ;;  %v981_v24 = vmul.f32 %v4252_v40, %v4186_v44 }
  0xfc   : > { %v969_v51 = vadd.f32 %v2729_v21, %v968_v62  ;;  %v4276_v56 = vmul.f32 -0.1385711, %v925_v34  ;;  %v949_v9 = vmul.f32 9.984369e-06, %v948_v31  ;;  %vm4278_vm10 = vcmp.eq.f32.partialorder %v974_v29, 8.507059e+37 }
  0xfd   : > { %v977_v20 = vor.u32 1.1754944e-38, %v976_v55  ;;  %v963_v45 = vsel %vm4227_vm6, %v962_v2, %v958_v53  ;;  %v982_v58 = vsub.f32 1.0, %v981_v24  ;;  %vm985_vm12 = vweird.f32 %v4186_v44 }
  0xfe   : > { %v989_v50 = vand.u32 2147483647, %v4186_v44  ;;  %v973_v17 = vsel %vm4270_vm13, %v2729_v21, %v969_v51  ;;  %v4288_v42 = vor.u32 1.1754944e-38, %v991_v47  ;;  %v4291_v60 = vadd.f32 8.0, %v3448_v10 }
  0xff   : > { %2736 = vrcp.f32 %v4258_v26  ;;  %v2733_v61 = vpop.eup %2732  ;;  %v983_v37 = vmul.f32 %v4252_v40, %v982_v58  ;;  %vm1008_vm15 = vweird.f32 %v4232_v15  ;;  %v1012_v0 = vand.u32 2147483647, %v4232_v15 }
 0x100   : > { %v1014_v2 = vand.u32 2147483648, %v4232_v15  ;;  %v2735_v30 = vpop.eup %2734  ;;  %v964_v29 = vmul.f32 9.984369e-06, %v963_v45  ;;  %vm986_vm14 = vweird.f32 %v4252_v40  ;;  %v4300_v21 = vadd.f32 %v949_v9, %v4196_v3 }
 0x101   : > { %v1004_v55 = vmul.f32 %v2733_v61, %v4232_v15  ;;  %v978_v34 = vsel %vm4278_vm10, %v977_v20, %v973_v17  ;;  %v1019_v31 = vmul.f32 %v2735_v30, %v4243_v25  ;;  %v1027_v62 = vand.u32 2147483647, %v4243_v25  ;;  %vm4320_vm3 = vmor %vm985_vm12, %vm986_vm14 }
 0x102   : > { %v1029_v53 = vand.u32 2147483648, %v4243_v25  ;;  %vm1009_vm0 = vweird.f32 %v2733_v61  ;;  %v1042_v51 = vand.u32 2147483647, %v4258_v26  ;;  %2738 = vrcp.f32 %v4291_v60 }
 0x103   : > { %v1005_v47 = vsub.f32 1.0, %v1004_v55  ;;  %v984_v3 = vadd.f32 %v4252_v40, %v983_v37  ;;  %vm4311_vm1 = vcmp.eq.f32.partialorder %v989_v50, 8.507059e+37  ;;  %v1020_v24 = vsub.f32 1.0, %v1019_v31  ;;  %vm4330_vm4 = vmor %vm1008_vm15, %vm1009_vm0 }
 0x104   : > { %vm1023_vm2 = vweird.f32 %v4243_v25  ;;  %vm1024_vm7 = vweird.f32 %v2735_v30  ;;  %v979_v13 = vmul.f32 9.984369e-06, %v978_v34  ;;  %vm4324_vm8 = vcmp.eq.f32.partialorder %v1012_v0, 8.507059e+37 }
 0x105   : > { %v2737_v9 = vpop.eup %2736  ;;  %v1006_v45 = vmul.f32 %v2733_v61, %v1005_v47  ;;  %v1015_v50 = vor.u32 1.1754944e-38, %v1014_v2  ;;  %v1021_v17 = vmul.f32 %v2735_v30, %v1020_v24  ;;  %vm4334_vm5 = vcmp.eq.f32.partialorder %v1027_v62, 8.507059e+37  ;;  %vm4340_vm11 = vmor %vm1023_vm2, %vm1024_vm7 }
 0x106   : > { %v1034_v55 = vmul.f32 %v2737_v9, %v4258_v26  ;;  %vm1038_vm6 = vweird.f32 %v4258_v26  ;;  %v1030_v2 = vor.u32 1.1754944e-38, %v1029_v53  ;;  %vm4344_vm9 = vcmp.eq.f32.partialorder %v1042_v51, 8.507059e+37 }
 0x107   : > { %v1007_v0 = vadd.f32 %v2733_v61, %v1006_v45  ;;  %v1044_v31 = vand.u32 2147483648, %v4258_v26  ;;  %v988_v62 = vsel %vm4320_vm3, %v4252_v40, %v984_v3  ;;  %v1022_v47 = vadd.f32 %v2735_v30, %v1021_v17 }
 0x108   : > { %v1035_v24 = vsub.f32 1.0, %v1034_v55  ;;  %vm1039_vm13 = vweird.f32 %v2737_v9  ;;  %v2739_v54 = vpop.eup %2738  ;;  %vm1053_vm10 = vweird.f32 %v4291_v60  ;;  %v4356_v53 = vadd.f32 0.5, %v4121_v23 }
 0x109   : > { %v1011_v45 = vsel %vm4330_vm4, %v2733_v61, %v1007_v0  ;;  %v4359_v51 = vadd.f32 0.5, %v4130_v27  ;;  %v1026_v40 = vsel %vm4340_vm11, %v2735_v30, %v1022_v47  ;;  %v1049_v20 = vmul.f32 %v2739_v54, %v4291_v60  ;;  %vm4368_vm12 = vmor %vm1038_vm6, %vm1039_vm13 }
 0x10a   : > { %v1016_v16 = vsel %vm4324_vm8, %v1015_v50, %v1011_v45  ;;  %v1036_v3 = vmul.f32 %v2737_v9, %v1035_v24  ;;  %v1045_v23 = vor.u32 1.1754944e-38, %v1044_v31  ;;  %v1059_v25 = vand.u32 2147483648, %v4291_v60 }
 0x10b   : > { %v4374_v27 = vadd.f32 0.5, %v4151_v22  ;;  %v4377_v58 = vadd.f32 0.5, %v4186_v44  ;;  %v1031_v30 = vsel %vm4334_vm5, %v1030_v2, %v1026_v40  ;;  %v1050_v17 = vsub.f32 1.0, %v1049_v20 }
 0x10c   : > { %v1037_v50 = vadd.f32 %v2737_v9, %v1036_v3  ;;  %vm1054_vm15 = vweird.f32 %v2739_v54  ;;  %v996_v26 = vadd.f32 %v964_v29, %v4262_v41  ;;  %v1017_v55 = vmul.f32 1.5056327e-07, %v1016_v16 }
 0x10d   : > { %v1057_v0 = vand.u32 2147483647, %v4291_v60  ;;  %2740 = vlog2.f32 %v4356_v53  ;;  %v997_v34 = vadd.f32 %v979_v13, %v4265_v43  ;;  %v1051_v44 = vmul.f32 %v2739_v54, %v1050_v17  ;;  %vm4395_vm14 = vmor %vm1053_vm10, %vm1054_vm15 }
 0x10e   : > { %v1041_v22 = vsel %vm4368_vm12, %v2737_v9, %v1037_v50  ;;  %2742 = vlog2.f32 %v4359_v51  ;;  %v993_v37 = vsel %vm4311_vm1, %v4288_v42, %v988_v62  ;;  %v1032_v2 = vmul.f32 1.5056327e-07, %v1031_v30  ;;  %v2951_v50 = vld [vmem:[%s3331_s29 + $0x8] sm:$0xff] }
 0x10f   : > { %v1046_v16 = vsel %vm4344_vm9, %v1045_v23, %v1041_v22  ;;  %2744 = vlog2.f32 %v4374_v27  ;;  %v1052_v29 = vadd.f32 %v2739_v54, %v1051_v44  ;;  %v1060_v9 = vor.u32 1.1754944e-38, %v1059_v25  ;;  %v2952_v22 = vld [vmem:[%s3331_s29 + $0x10] sm:$0xff] }
 0x110   : > { %v1047_v43 = vmul.f32 1.5056327e-07, %v1046_v16  ;;  %2746 = vlog2.f32 %v4377_v58  ;;  %v4402_v46 = vmul.f32 0.6931472, %v3517_v59  ;;  %vm1058_vm0 = vcmp.eq.f32.partialorder %v1057_v0, 8.507059e+37 }
 0x111   : > { %2748 = vlog2.f32 %v3448_v10  ;;  %v1063_v42 = vadd.f32 %v1017_v55, %v4300_v21  ;;  %v512_v13 = vmul.f32 0.6931472, %v3524_v8  ;;  %v1056_v15 = vsel %vm4395_vm14, %v2739_v54, %v1052_v29 }
 0x112   : > { %v1071_v31 = vadd.f32 0.5, %v3440_v52  ;;  %v452_v59 = vmul.f32 0.6931472, %v3531_v14  ;;  %v930_v47 = vadd.f32 %v4276_v56, %v4172_v48  ;;  %v994_v24 = vmul.f32 9.984369e-06, %v993_v37  ;;  %v2950_v52 = vld [vmem:[%s3331_s29] sm:$0xff] }
 0x113   : > { %v2741_v62 = vpop.eup %2740  ;;  %v1064_v45 = vadd.f32 %v1032_v2, %v996_v26  ;;  %v1061_v40 = vsel %vm1058_vm0, %v1060_v9, %v1056_v15  ;;  %v1065_v3 = vadd.f32 %v1047_v43, %v997_v34  ;;  %v1072_v8 = vadd.f32 0.5, %v3444_v19 }
 0x114   : > { %v2743_v21 = vpop.eup %2742  ;;  %v1076_v20 = vmul.f32 0.6931472, %v2741_v62  ;;  %v1073_v54 = vadd.f32 0.5, %v3446_v63  ;;  %2750 = vlog2.f32 %v1063_v42  ;;  %v4418_v14 = vadd.f32 1.0, %v2950_v52  ;;  %v2953_v62 = vld [vmem:[%s3331_s29 + $0x18] sm:$0xff] }
 0x115   : > { %v2745_v61 = vpop.eup %2744  ;;  %v1078_v23 = vmul.f32 0.6931472, %v2743_v21  ;;  %v4421_v48 = vmul.f32 0.6931472, %v3538_v28  ;;  %v4424_v17 = vadd.f32 1.0, %v2951_v50  ;;  %v998_v55 = vadd.f32 %v994_v24, %v930_v47 }
 0x116   : > { %v2747_v25 = vpop.eup %2746  ;;  %v1080_v56 = vmul.f32 0.6931472, %v2745_v61  ;;  %v1083_v30 = vmul.f32 %v1076_v20, %v1071_v31  ;;  %v514_v26 = vmul.f32 0.6931472, %v3617_v33  ;;  %v1062_v63 = vmul.f32 1.5056327e-07, %v1061_v40 }
 0x117   : > { %v2749_v19 = vpop.eup %2748  ;;  %2752 = vlog2.f32 %v1064_v45  ;;  %v1074_v0 = vadd.f32 0.5, %v3448_v10  ;;  %v1082_v34 = vmul.f32 0.6931472, %v2747_v25  ;;  %v4429_v44 = vadd.f32 1.0, %v2952_v22 }
 0x118   : > { %2754 = vlog2.f32 %v1065_v3  ;;  %v1084_v28 = vmul.f32 %v1078_v23, %v1072_v8  ;;  %v1085_v37 = vmul.f32 %v1080_v56, %v1073_v54  ;;  %v4432_v2 = vadd.f32 1.0, %v4418_v14 }
 0x119   : > { %2756 = vlog2.f32 %v2950_v52  ;;  %v4435_v16 = vadd.f32 %v512_v13, %v3547_v36  ;;  %v1087_v33 = vadd.f32 0.9189385, %v1083_v30  ;;  %v4438_v41 = vadd.f32 1.0, %v4424_v17 }
 0x11a   : > { %2758 = vlog2.f32 %v2951_v50  ;;  %v2751_v10 = vpop.eup %2750  ;;  %v516_v43 = vmul.f32 0.6931472, %v3623_v49  ;;  %v518_v29 = vmul.f32 0.6931472, %v2749_v19  ;;  %v1066_v9 = vadd.f32 %v1062_v63, %v998_v55 }
 0x11b   : > { %2760 = vlog2.f32 %v2952_v22  ;;  %v6466_v42 = vmax.f32 %v3414_v32, 0.0  ;;  %v1086_v31 = vmul.f32 %v1082_v34, %v1074_v0  ;;  %v4447_v36 = vadd.f32 1.0, %v4429_v44 }
 0x11c   : > { %2762 = vlog2.f32 %v2953_v62  ;;  %v4450_v47 = vadd.f32 %v514_v26, %v3566_v4  ;;  %v1088_v24 = vadd.f32 0.9189385, %v1084_v28  ;;  %v1089_v45 = vadd.f32 0.9189385, %v1085_v37 }
 0x11d   : > { %v4443_v15 = vadd.f32 %v452_v59, %v6466_v42  ;;  %v2753_v13 = vpop.eup %2752  ;;  %2764 = vrcp.f32 %v4432_v2  ;;  %v1091_v21 = vsub.f32 %v1087_v33, %v4356_v53  ;;  %v1096_v32 = vmul.f32 0.6931472, %v2751_v10 }
 0x11e   : > { %v2755_v49 = vpop.eup %2754  ;;  %v4454_v59 = vadd.f32 1.0, %v2953_v62  ;;  %2766 = vrcp.f32 %v4438_v41  ;;  %v4458_v3 = vadd.f32 %v516_v43, %v3752_v38  ;;  %v4461_v8 = vadd.f32 %v518_v29, %v4402_v46 }
 0x11f   : > { %6467 = vst [vmem:[#allocation20_spill] sm:$0xff] %v4443_v15  ;;  %v2757_v40 = vpop.eup %2756  ;;  %2768 = vlog2.f32 %v1066_v9  ;;  %v1154_v4 = vand.u32 2147483648, %v4432_v2  ;;  %v4464_v61 = vadd.f32 0.9189385, %v1086_v31  ;;  %v1098_v54 = vmul.f32 0.6931472, %v2753_v13 }
 0x120   : > { %v2759_v20 = vpop.eup %2758  ;;  %v1152_v53 = vand.u32 2147483647, %v4432_v2  ;;  %2770 = vrcp.f32 %v4447_v36  ;;  %v1092_v52 = vsub.f32 %v1088_v24, %v4359_v51  ;;  %v1093_v38 = vsub.f32 %v1089_v45, %v4374_v27 }
 0x121   : > { %v2761_v23 = vpop.eup %2760  ;;  %v1100_v25 = vmul.f32 0.6931472, %v2755_v49  ;;  %2772 = vlog2.f32 %v4418_v14  ;;  %v1103_v56 = vadd.f32 %v1096_v32, %v1091_v21  ;;  %v4473_v30 = vadd.f32 1.0, %v4454_v59 }
 0x122   : > { %v2763_v46 = vpop.eup %2762  ;;  %2774 = vlog2.f32 %v4424_v17  ;;  %vm1148_vm1 = vweird.f32 %v4432_v2  ;;  %v4478_v19 = vmul.f32 0.6931472, %v2757_v40  ;;  %v4481_v51 = vor.u32 1.1754944e-38, %v1154_v4 }
 0x123   : > { %v4476_v50 = vpop.eup %2764  ;;  %2776 = vlog2.f32 %v4429_v44  ;;  %vm1163_vm2 = vweird.f32 %v4438_v41  ;;  %v1094_v26 = vsub.f32 %v4464_v61, %v4377_v58  ;;  %v4488_v55 = vmul.f32 0.6931472, %v2759_v20 }
 0x124   : > { %v4484_v27 = vpop.eup %2766  ;;  %2778 = vlog2.f32 %v4454_v59  ;;  %v1144_v63 = vmul.f32 %v4476_v50, %v4432_v2  ;;  %v4493_v34 = vadd.f32 %v1098_v54, %v1092_v52  ;;  %v4495_v22 = vadd.f32 %v1100_v25, %v1093_v38 }
 0x125   : > { %v2769_v0 = vpop.eup %2768  ;;  %v4497_v28 = vmul.f32 0.6931472, %v2761_v23  ;;  %vm4499_vm7 = vcmp.eq.f32.partialorder %v1152_v53, 8.507059e+37  ;;  %v1159_v58 = vmul.f32 %v4484_v27, %v4438_v41  ;;  %v1107_v10 = vsub.f32 %v1103_v56, %v4435_v16 }
 0x126   : > { %v2771_v33 = vpop.eup %2770  ;;  %v4506_v43 = vmul.f32 0.6931472, %v2763_v46  ;;  %v1145_v29 = vsub.f32 1.0, %v1144_v63  ;;  %2780 = vrcp.f32 %v4473_v30  ;;  %vm1149_vm3 = vweird.f32 %v4476_v50 }
 0x127   : > { %v2773_v9 = vpop.eup %2772  ;;  %v1160_v42 = vsub.f32 1.0, %v1159_v58  ;;  %v1169_v31 = vand.u32 2147483648, %v4438_v41  ;;  %v1174_v62 = vmul.f32 %v2771_v33, %v4447_v36  ;;  %vm1164_vm8 = vweird.f32 %v4484_v27  ;;  %vm4531_vm6 = vmor %vm1148_vm1, %vm1149_vm3 }
 0x128   : > { %v4512_v13 = vpop.eup %2774  ;;  %v1146_v24 = vmul.f32 %v4476_v50, %v1145_v29  ;;  %vm1178_vm4 = vweird.f32 %v4447_v36  ;;  %v1184_v16 = vand.u32 2147483648, %v4447_v36  ;;  %vm1179_vm5 = vweird.f32 %v2771_v33  ;;  %vm4544_vm11 = vmor %vm1163_vm2, %vm1164_vm8 }
 0x129   : > { %v4518_v45 = vpop.eup %2776  ;;  %v1161_v49 = vmul.f32 %v4484_v27, %v1160_v42  ;;  %v1175_v21 = vsub.f32 1.0, %v1174_v62  ;;  %v4522_v32 = vadd.f32 2.0, %v4418_v14  ;;  %v1102_v4 = vmul.f32 0.6931472, %v2769_v0  ;;  %vm4559_vm9 = vmor %vm1178_vm4, %vm1179_vm5 }
 0x12a   : > { %v4524_v40 = vpop.eup %2778  ;;  %v1147_v20 = vadd.f32 %v4476_v50, %v1146_v24  ;;  %v1167_v54 = vand.u32 2147483647, %v4438_v41  ;;  %v1182_v53 = vand.u32 2147483647, %v4447_v36  ;;  %v1108_v23 = vsub.f32 %v4493_v34, %v4450_v47 }
 0x12b   : > { %v1162_v52 = vadd.f32 %v4484_v27, %v1161_v49  ;;  %v1176_v2 = vmul.f32 %v2771_v33, %v1175_v21  ;;  %2782 = vrcp.f32 %v4522_v32  ;;  %v4554_v47 = vadd.f32 %v1107_v10, %v3504_v18 }
 0x12c   : > { %v4549_v25 = vpop.eup %2780  ;;  %v1170_v56 = vor.u32 1.1754944e-38, %v1169_v31  ;;  %v4564_v63 = vadd.f32 2.0, %v4424_v17  ;;  %v1151_v0 = vsel %vm4531_vm6, %v4476_v50, %v1147_v20  ;;  %v1185_v58 = vor.u32 1.1754944e-38, %v1184_v16 }
 0x12d   : > { %v1177_v34 = vadd.f32 %v2771_v33, %v1176_v2  ;;  %v1189_v18 = vmul.f32 %v4549_v25, %v4473_v30  ;;  %v1166_v36 = vsel %vm4544_vm11, %v4484_v27, %v1162_v52  ;;  %vm1168_vm13 = vcmp.eq.f32.partialorder %v1167_v54, 8.507059e+37 }
 0x12e   : > { %vm1183_vm10 = vcmp.eq.f32.partialorder %v1182_v53, 8.507059e+37  ;;  %v4575_v10 = vadd.f32 2.0, %v4429_v44  ;;  %v4577_v29 = vadd.f32 %v1102_v4, %v1094_v26  ;;  %v4579_v42 = vmul.f32 0.6931472, %v2773_v9 }
 0x12f   : > { %v1181_v50 = vsel %vm4559_vm9, %v2771_v33, %v1177_v34  ;;  %v1190_v31 = vsub.f32 1.0, %v1189_v18  ;;  %v1156_v62 = vsel %vm4499_vm7, %v4481_v51, %v1151_v0  ;;  %v1197_v24 = vand.u32 2147483647, %v4473_v30 }
 0x130   : > { %v1199_v27 = vand.u32 2147483648, %v4473_v30  ;;  %2784 = vrcp.f32 %v4564_v63  ;;  %v1171_v26 = vsel %vm1168_vm13, %v1170_v56, %v1166_v36  ;;  %v1186_v49 = vsel %vm1183_vm10, %v1185_v58, %v1181_v50 }
 0x131   : > { %v4589_v16 = vpop.eup %2782  ;;  %v1191_v9 = vmul.f32 %v4549_v25, %v1190_v31  ;;  %v4593_v21 = vadd.f32 2.0, %v4454_v59  ;;  %v4596_v33 = vadd.f32 %v1108_v23, %v3510_v57  ;;  %v1220_v37 = vand.u32 2147483647, %v4522_v32 }
 0x132   : > { %v1212_v51 = vmul.f32 %v4589_v16, %v4522_v32  ;;  %2786 = vrcp.f32 %v4575_v10  ;;  %v1157_v4 = vmul.f32 676.5204, %v1156_v62  ;;  %vm1193_vm12 = vweird.f32 %v4473_v30 }
 0x133   : > { %vm1194_vm15 = vweird.f32 %v4549_v25  ;;  %v1222_v20 = vand.u32 2147483648, %v4522_v32  ;;  %v1172_v61 = vmul.f32 676.5204, %v1171_v26  ;;  %v1187_v54 = vmul.f32 676.5204, %v1186_v49 }
 0x134   : > { %vm4605_vm14 = vcmp.eq.f32.partialorder %v1197_v24, 8.507059e+37  ;;  %v1213_v57 = vsub.f32 1.0, %v1212_v51  ;;  %v1192_v23 = vadd.f32 %v4549_v25, %v1191_v9  ;;  %v1200_v52 = vor.u32 1.1754944e-38, %v1199_v27  ;;  %vm4614_vm1 = vmor %vm1193_vm12, %vm1194_vm15 }
 0x135   : > { %vm1216_vm0 = vweird.f32 %v4522_v32  ;;  %2788 = vrcp.f32 %v4593_v21  ;;  %vm4619_vm2 = vcmp.eq.f32.partialorder %v1220_v37, 8.507059e+37  ;;  %v1235_v41 = vand.u32 2147483647, %v4564_v63 }
 0x136   : > { %v4612_v38 = vpop.eup %2784  ;;  %v1214_v2 = vmul.f32 %v4589_v16, %v1213_v57  ;;  %v1237_v0 = vand.u32 2147483648, %v4564_v63  ;;  %v4625_v34 = vadd.f32 1.0, %v1157_v4  ;;  %vm1217_vm7 = vweird.f32 %v4589_v16 }
 0x137   : > { %v1223_v58 = vor.u32 1.1754944e-38, %v1222_v20  ;;  %v1227_v18 = vmul.f32 %v4612_v38, %v4564_v63  ;;  %v4632_v50 = vadd.f32 1.0, %v1172_v61  ;;  %v4634_v31 = vadd.f32 1.0, %v1187_v54  ;;  %vm4648_vm8 = vmor %vm1216_vm0, %vm1217_vm7 }
 0x138   : > { %v4630_v36 = vpop.eup %2786  ;;  %vm1231_vm3 = vweird.f32 %v4564_v63  ;;  %v4638_v62 = vadd.f32 3.0, %v4418_v14  ;;  %v1196_v24 = vsel %vm4614_vm1, %v4549_v25, %v1192_v23  ;;  %v1215_v27 = vadd.f32 %v4589_v16, %v1214_v2 }
 0x139   : > { %v1228_v26 = vsub.f32 1.0, %v1227_v18  ;;  %v1242_v49 = vmul.f32 %v4630_v36, %v4575_v10  ;;  %vm4652_vm4 = vcmp.eq.f32.partialorder %v1235_v41, 8.507059e+37  ;;  %v1238_v37 = vor.u32 1.1754944e-38, %v1237_v0 }
 0x13a   : > { %vm1246_vm5 = vweird.f32 %v4575_v10  ;;  %v4658_v25 = vadd.f32 3.0, %v4424_v17  ;;  %v1250_v32 = vand.u32 2147483647, %v4575_v10  ;;  %2790 = vrcp.f32 %v4638_v62 }
 0x13b   : > { %v4660_v4 = vpop.eup %2788  ;;  %v1229_v20 = vmul.f32 %v4612_v38, %v1228_v26  ;;  %v1243_v61 = vsub.f32 1.0, %v1242_v49  ;;  %v1201_v54 = vsel %vm4605_vm14, %v1200_v52, %v1196_v24  ;;  %vm1232_vm6 = vweird.f32 %v4612_v38 }
 0x13c   : > { %v1252_v57 = vand.u32 2147483648, %v4575_v10  ;;  %v1257_v23 = vmul.f32 %v4660_v4, %v4593_v21  ;;  %v1219_v30 = vsel %vm4648_vm8, %v4589_v16, %v1215_v27  ;;  %v1265_v41 = vand.u32 2147483647, %v4593_v21  ;;  %vm4684_vm9 = vmor %vm1231_vm3, %vm1232_vm6 }
 0x13d   : > { %v1244_v2 = vmul.f32 %v4630_v36, %v1243_v61  ;;  %v4677_v0 = vadd.f32 3.0, %v4429_v44  ;;  %v1230_v53 = vadd.f32 %v4612_v38, %v1229_v20  ;;  %vm1247_vm11 = vweird.f32 %v4630_v36 }
 0x13e   : > { %v1258_v52 = vsub.f32 1.0, %v1257_v23  ;;  %2792 = vrcp.f32 %v4658_v25  ;;  %v1202_v18 = vmul.f32 676.5204, %v1201_v54  ;;  %vm4688_vm13 = vcmp.eq.f32.partialorder %v1250_v32, 8.507059e+37  ;;  %vm4701_vm15 = vmor %vm1246_vm5, %vm1247_vm11 }
 0x13f   : > { %vm1261_vm10 = vweird.f32 %v4593_v21  ;;  %v1267_v27 = vand.u32 2147483648, %v4593_v21  ;;  %v1224_v26 = vsel %vm4619_vm2, %v1223_v58, %v1219_v30  ;;  %v1245_v49 = vadd.f32 %v4630_v36, %v1244_v2 }
 0x140   : > { %v1259_v9 = vmul.f32 %v4660_v4, %v1258_v52  ;;  %vm1262_vm12 = vweird.f32 %v4660_v4  ;;  %v2791_v63 = vpop.eup %2790  ;;  %v1253_v61 = vor.u32 1.1754944e-38, %v1252_v57  ;;  %vm4705_vm14 = vcmp.eq.f32.partialorder %v1265_v41, 8.507059e+37 }
 0x141   : > { %v1288_v56 = vand.u32 2147483647, %v4638_v62  ;;  %2794 = vrcp.f32 %v4677_v0  ;;  %v1234_v58 = vsel %vm4684_vm9, %v4612_v38, %v1230_v53  ;;  %v1280_v10 = vmul.f32 %v2791_v63, %v4638_v62  ;;  %vm4721_vm0 = vmor %vm1261_vm10, %vm1262_vm12 }
 0x142   : > { %v1260_v54 = vadd.f32 %v4660_v4, %v1259_v9  ;;  %v1290_v23 = vand.u32 2147483648, %v4638_v62  ;;  %v4717_v30 = vadd.f32 1.0, %v1202_v18  ;;  %v1225_v57 = vmul.f32 -1259.1392, %v1224_v26 }
 0x143   : > { %v1268_v41 = vor.u32 1.1754944e-38, %v1267_v27  ;;  %v4726_v52 = vadd.f32 3.0, %v4454_v59  ;;  %v1249_v53 = vsel %vm4701_vm15, %v4630_v36, %v1245_v49  ;;  %v1281_v24 = vsub.f32 1.0, %v1280_v10 }
 0x144   : > { %v2793_v38 = vpop.eup %2792  ;;  %vm1284_vm1 = vweird.f32 %v4638_v62  ;;  %vm1299_vm2 = vweird.f32 %v4658_v25  ;;  %v1239_v21 = vsel %vm4652_vm4, %v1238_v37, %v1234_v58  ;;  %vm1285_vm7 = vweird.f32 %v2791_v63 }
 0x145   : > { %vm4735_vm3 = vcmp.eq.f32.partialorder %v1288_v56, 8.507059e+37  ;;  %v1295_v27 = vmul.f32 %v2793_v38, %v4658_v25  ;;  %v1264_v26 = vsel %vm4721_vm0, %v4660_v4, %v1260_v54  ;;  %v1282_v36 = vmul.f32 %v2791_v63, %v1281_v24  ;;  %vm4752_vm8 = vmor %vm1284_vm1, %vm1285_vm7 }
 0x146   : > { %v1291_v49 = vor.u32 1.1754944e-38, %v1290_v23  ;;  %v1303_v9 = vand.u32 2147483647, %v4658_v25  ;;  %v1254_v51 = vsel %vm4688_vm13, %v1253_v61, %v1249_v53  ;;  %v1305_v56 = vand.u32 2147483648, %v4658_v25 }
 0x147   : > { %v4744_v20 = vpop.eup %2794  ;;  %v1296_v37 = vsub.f32 1.0, %v1295_v27  ;;  %2796 = vrcp.f32 %v4726_v52  ;;  %v1240_v58 = vmul.f32 -1259.1392, %v1239_v21  ;;  %v1283_v10 = vadd.f32 %v2791_v63, %v1282_v36 }
 0x148   : > { %vm1300_vm4 = vweird.f32 %v2793_v38  ;;  %v1310_v54 = vmul.f32 %v4744_v20, %v4677_v0  ;;  %v1269_v16 = vsel %vm4705_vm14, %v1268_v41, %v1264_v26  ;;  %vm1314_vm5 = vweird.f32 %v4677_v0 }
 0x149   : > { %v1297_v61 = vmul.f32 %v2793_v38, %v1296_v37  ;;  %v4762_v23 = vadd.f32 4.0, %v4418_v14  ;;  %v1255_v2 = vmul.f32 -1259.1392, %v1254_v51  ;;  %vm4764_vm6 = vcmp.eq.f32.partialorder %v1303_v9, 8.507059e+37  ;;  %vm4775_vm11 = vmor %vm1299_vm2, %vm1300_vm4 }
 0x14a   : > { %v1311_v53 = vsub.f32 1.0, %v1310_v54  ;;  %v4769_v24 = vadd.f32 4.0, %v4424_v17  ;;  %v1287_v21 = vsel %vm4752_vm8, %v2791_v63, %v1283_v10  ;;  %v1306_v27 = vor.u32 1.1754944e-38, %v1305_v56 }
 0x14b   : > { %v1298_v32 = vadd.f32 %v2793_v38, %v1297_v61  ;;  %v1318_v26 = vand.u32 2147483647, %v4677_v0  ;;  %v1270_v36 = vmul.f32 -1259.1392, %v1269_v16  ;;  %v1320_v51 = vand.u32 2147483648, %v4677_v0 }
 0x14c   : > { %v1312_v9 = vmul.f32 %v4744_v20, %v1311_v53  ;;  %2798 = vrcp.f32 %v4762_v23  ;;  %vm1315_vm9 = vweird.f32 %v4744_v20  ;;  %v1333_v25 = vand.u32 2147483647, %v4726_v52 }
 0x14d   : > { %v4783_v37 = vpop.eup %2796  ;;  %v4788_v63 = vadd.f32 4.0, %v4429_v44  ;;  %2800 = vrcp.f32 %v4769_v24  ;;  %v1292_v56 = vsel %vm4735_vm3, %v1291_v49, %v1287_v21  ;;  %v1302_v10 = vsel %vm4775_vm11, %v2793_v38, %v1298_v32  ;;  %vm4806_vm13 = vmor %vm1314_vm5, %vm1315_vm9 }
 0x14e   : > { %v1325_v4 = vmul.f32 %v4783_v37, %v4726_v52  ;;  %v1335_v54 = vand.u32 2147483648, %v4726_v52  ;;  %v1271_v16 = vadd.f32 %v1225_v57, %v4625_v34  ;;  %v1272_v61 = vadd.f32 %v1240_v58, %v4632_v50 }
 0x14f   : > { %v4801_v53 = vadd.f32 %v1255_v2, %v4634_v31  ;;  %v1313_v60 = vadd.f32 %v4744_v20, %v1312_v9  ;;  %vm4810_vm10 = vcmp.eq.f32.partialorder %v1318_v26, 8.507059e+37  ;;  %v1321_v49 = vor.u32 1.1754944e-38, %v1320_v51 }
 0x150   : > { %v1326_v21 = vsub.f32 1.0, %v1325_v4  ;;  %vm1329_vm12 = vweird.f32 %v4726_v52  ;;  %v1293_v34 = vmul.f32 771.3234, %v1292_v56  ;;  %v1307_v50 = vsel %vm4764_vm6, %v1306_v27, %v1302_v10 }
 0x151   : > { %v4818_v31 = vadd.f32 4.0, %v4454_v59  ;;  %2802 = vrcp.f32 %v4788_v63  ;;  %v4822_v57 = vadd.f32 %v1270_v36, %v4717_v30  ;;  %vm4825_vm15 = vcmp.eq.f32.partialorder %v1333_v25, 8.507059e+37 }
 0x152   : > { %v2799_v0 = vpop.eup %2798  ;;  %v1327_v58 = vmul.f32 %v4783_v37, %v1326_v21  ;;  %v1336_v32 = vor.u32 1.1754944e-38, %v1335_v54  ;;  %v1317_v62 = vsel %vm4806_vm13, %v4744_v20, %v1313_v60  ;;  %vm1352_vm14 = vweird.f32 %v4762_v23 }
 0x153   : > { %v2801_v41 = vpop.eup %2800  ;;  %v1348_v27 = vmul.f32 %v2799_v0, %v4762_v23  ;;  %v1356_v26 = vand.u32 2147483647, %v4762_v23  ;;  %v1308_v30 = vmul.f32 771.3234, %v1307_v50  ;;  %vm1330_vm0 = vweird.f32 %v4783_v37 }
 0x154   : > { %v1358_v36 = vand.u32 2147483648, %v4762_v23  ;;  %v1363_v9 = vmul.f32 %v2801_v41, %v4769_v24  ;;  %v4838_v51 = vadd.f32 %v1293_v34, %v1271_v16  ;;  %v1371_v56 = vand.u32 2147483647, %v4769_v24  ;;  %vm4849_vm2 = vmor %vm1329_vm12, %vm1330_vm0 }
 0x155   : > { %v1349_v25 = vsub.f32 1.0, %v1348_v27  ;;  %2804 = vrcp.f32 %v4818_v31  ;;  %v1322_v60 = vsel %vm4810_vm10, %v1321_v49, %v1317_v62  ;;  %v1328_v20 = vadd.f32 %v4783_v37, %v1327_v58 }
 0x156   : > { %vm1353_vm1 = vweird.f32 %v2799_v0  ;;  %v1364_v10 = vsub.f32 1.0, %v1363_v9  ;;  %vm1367_vm7 = vweird.f32 %v4769_v24  ;;  %vm1368_vm3 = vweird.f32 %v2801_v41 }
 0x157   : > { %v4845_v4 = vpop.eup %2802  ;;  %v1350_v16 = vmul.f32 %v2799_v0, %v1349_v25  ;;  %v1373_v18 = vand.u32 2147483648, %v4769_v24  ;;  %vm4855_vm8 = vcmp.eq.f32.partialorder %v1356_v26, 8.507059e+37  ;;  %v1359_v49 = vor.u32 1.1754944e-38, %v1358_v36  ;;  %vm4866_vm4 = vmor %vm1352_vm14, %vm1353_vm1 }
 0x158   : > { %v1365_v21 = vmul.f32 %v2801_v41, %v1364_v10  ;;  %v1378_v34 = vmul.f32 %v4845_v4, %v4788_v63  ;;  %v1323_v52 = vmul.f32 771.3234, %v1322_v60  ;;  %v4861_v50 = vadd.f32 %v1308_v30, %v1272_v61  ;;  %vm4876_vm5 = vmor %vm1367_vm7, %vm1368_vm3 }
 0x159   : > { %v1351_v58 = vadd.f32 %v2799_v0, %v1350_v16  ;;  %v4871_v24 = vadd.f32 5.0, %v4418_v14  ;;  %v1332_v27 = vsel %vm4849_vm2, %v4783_v37, %v1328_v20  ;;  %vm4880_vm6 = vcmp.eq.f32.partialorder %v1371_v56, 8.507059e+37 }
 0x15a   : > { %v1366_v26 = vadd.f32 %v2801_v41, %v1365_v21  ;;  %v1379_v23 = vsub.f32 1.0, %v1378_v34  ;;  %v1374_v9 = vor.u32 1.1754944e-38, %v1373_v18  ;;  %vm1382_vm11 = vweird.f32 %v4788_v63 }
 0x15b   : > { %v2805_v30 = vpop.eup %2804  ;;  %v4886_v25 = vadd.f32 5.0, %v4424_v17  ;;  %2806 = vrcp.f32 %v4871_v24  ;;  %v1355_v37 = vsel %vm4866_vm4, %v2799_v0, %v1351_v58  ;;  %v1386_v56 = vand.u32 2147483647, %v4788_v63 }
 0x15c   : > { %v1380_v60 = vmul.f32 %v4845_v4, %v1379_v23  ;;  %v1393_v20 = vmul.f32 %v2805_v30, %v4818_v31  ;;  %v1337_v10 = vsel %vm4825_vm15, %v1336_v32, %v1332_v27  ;;  %v1370_v54 = vsel %vm4876_vm5, %v2801_v41, %v1366_v26 }
 0x15d   : > { %vm1383_vm9 = vweird.f32 %v4845_v4  ;;  %v1388_v16 = vand.u32 2147483648, %v4788_v63  ;;  %vm1397_vm13 = vweird.f32 %v4818_v31  ;;  %v1401_v0 = vand.u32 2147483647, %v4818_v31 }
 0x15e   : > { %v1394_v18 = vsub.f32 1.0, %v1393_v20  ;;  %v4903_v21 = vadd.f32 5.0, %v4429_v44  ;;  %v1360_v34 = vsel %vm4855_vm8, %v1359_v49, %v1355_v37  ;;  %v1381_v2 = vadd.f32 %v4845_v4, %v1380_v60  ;;  %vm4913_vm12 = vmor %vm1382_vm11, %vm1383_vm9 }
 0x15f   : > { %vm1398_vm10 = vweird.f32 %v2805_v30  ;;  %2808 = vrcp.f32 %v4886_v25  ;;  %v1338_v32 = vmul.f32 771.3234, %v1337_v10  ;;  %v1375_v41 = vsel %vm4880_vm6, %v1374_v9, %v1370_v54 }
 0x160   : > { %v1395_v62 = vmul.f32 %v2805_v30, %v1394_v18  ;;  %v1403_v27 = vand.u32 2147483648, %v4818_v31  ;;  %v1341_v49 = vadd.f32 %v1323_v52, %v4801_v53  ;;  %vm4919_vm15 = vcmp.eq.f32.partialorder %v1386_v56, 8.507059e+37  ;;  %vm4928_vm14 = vmor %vm1397_vm13, %vm1398_vm10 }
 0x161   : > { %v2807_v38 = vpop.eup %2806  ;;  %v1389_v36 = vor.u32 1.1754944e-38, %v1388_v16  ;;  %v4924_v61 = vadd.f32 5.0, %v4454_v59  ;;  %v1361_v23 = vmul.f32 -176.61504, %v1360_v34  ;;  %vm4932_vm0 = vcmp.eq.f32.partialorder %v1401_v0, 8.507059e+37 }
 0x162   : > { %v1396_v63 = vadd.f32 %v2805_v30, %v1395_v62  ;;  %v1416_v53 = vmul.f32 %v2807_v38, %v4871_v24  ;;  %v1376_v52 = vmul.f32 -176.61504, %v1375_v41  ;;  %v1385_v60 = vsel %vm4913_vm12, %v4845_v4, %v1381_v2 }
 0x163   : > { %v1424_v56 = vand.u32 2147483647, %v4871_v24  ;;  %2810 = vrcp.f32 %v4903_v21  ;;  %v1342_v31 = vadd.f32 %v1338_v32, %v4822_v57  ;;  %v1404_v20 = vor.u32 1.1754944e-38, %v1403_v27 }
 0x164   : > { %v1417_v10 = vsub.f32 1.0, %v1416_v53  ;;  %vm1420_vm1 = vweird.f32 %v4871_v24  ;;  %v1400_v16 = vsel %vm4928_vm14, %v2805_v30, %v1396_v63  ;;  %vm1421_vm2 = vweird.f32 %v2807_v38 }
 0x165   : > { %v4944_v54 = vpop.eup %2808  ;;  %v1426_v18 = vand.u32 2147483648, %v4871_v24  ;;  %2812 = vrcp.f32 %v4924_v61  ;;  %v1390_v4 = vsel %vm4919_vm15, %v1389_v36, %v1385_v60  ;;  %v1439_v34 = vand.u32 2147483647, %v4886_v25  ;;  %vm4970_vm8 = vmor %vm1420_vm1, %vm1421_vm2 }
 0x166   : > { %v1418_v0 = vmul.f32 %v2807_v38, %v1417_v10  ;;  %v1431_v57 = vmul.f32 %v4944_v54, %v4886_v25  ;;  %v4956_v2 = vadd.f32 %v1361_v23, %v4838_v51  ;;  %v4959_v32 = vadd.f32 %v1376_v52, %v4861_v50 }
 0x167   : > { %vm4961_vm7 = vcmp.eq.f32.partialorder %v1424_v56, 8.507059e+37  ;;  %vm1435_vm3 = vweird.f32 %v4886_v25  ;;  %v1405_v41 = vsel %vm4932_vm0, %v1404_v20, %v1400_v16  ;;  %v4975_v50 = vadd.f32 6.0, %v4418_v14 }
 0x168   : > { %v1419_v58 = vadd.f32 %v2807_v38, %v1418_v0  ;;  %v1432_v51 = vsub.f32 1.0, %v1431_v57  ;;  %v1391_v26 = vmul.f32 -176.61504, %v1390_v4  ;;  %v1427_v36 = vor.u32 1.1754944e-38, %v1426_v18 }
 0x169   : > { %v4977_v27 = vpop.eup %2810  ;;  %v1441_v23 = vand.u32 2147483648, %v4886_v25  ;;  %v4981_v63 = vadd.f32 6.0, %v4424_v17  ;;  %vm4984_vm4 = vcmp.eq.f32.partialorder %v1439_v34, 8.507059e+37  ;;  %vm1450_vm5 = vweird.f32 %v4903_v21 }
 0x16a   : > { %v1433_v9 = vmul.f32 %v4944_v54, %v1432_v51  ;;  %v1446_v37 = vmul.f32 %v4977_v27, %v4903_v21  ;;  %v1454_v53 = vand.u32 2147483647, %v4903_v21  ;;  %v1406_v60 = vmul.f32 -176.61504, %v1405_v41 }
 0x16b   : > { %v4992_v52 = vpop.eup %2812  ;;  %v1423_v56 = vsel %vm4970_vm8, %v2807_v38, %v1419_v58  ;;  %v1456_v20 = vand.u32 2147483648, %v4903_v21  ;;  %2814 = vrcp.f32 %v4975_v50  ;;  %vm1436_vm6 = vweird.f32 %v4944_v54 }
 0x16c   : > { %v1447_v10 = vsub.f32 1.0, %v1446_v37  ;;  %v1461_v16 = vmul.f32 %v4992_v52, %v4924_v61  ;;  %v1469_v18 = vand.u32 2147483647, %v4924_v61  ;;  %vm1451_vm11 = vweird.f32 %v4977_v27  ;;  %vm5016_vm9 = vmor %vm1435_vm3, %vm1436_vm6 }
 0x16d   : > { %v1471_v4 = vand.u32 2147483648, %v4924_v61  ;;  %v5005_v0 = vadd.f32 6.0, %v4429_v44  ;;  %2816 = vrcp.f32 %v4981_v63  ;;  %v1428_v38 = vsel %vm4961_vm7, %v1427_v36, %v1423_v56  ;;  %vm5032_vm12 = vmor %vm1450_vm5, %vm1451_vm11 }
 0x16e   : > { %v1434_v57 = vadd.f32 %v4944_v54, %v1433_v9  ;;  %v1448_v34 = vmul.f32 %v4977_v27, %v1447_v10  ;;  %v1462_v41 = vsub.f32 1.0, %v1461_v16  ;;  %v5012_v58 = vadd.f32 %v1391_v26, %v1341_v49 }
 0x16f   : > { %v1442_v51 = vor.u32 1.1754944e-38, %v1441_v23  ;;  %vm5020_vm13 = vcmp.eq.f32.partialorder %v1454_v53, 8.507059e+37  ;;  %vm1465_vm10 = vweird.f32 %v4924_v61  ;;  %v5025_v30 = vadd.f32 %v1406_v60, %v1342_v31 }
 0x170   : > { %v1449_v36 = vadd.f32 %v4977_v27, %v1448_v34  ;;  %v1457_v49 = vor.u32 1.1754944e-38, %v1456_v20  ;;  %v1463_v26 = vmul.f32 %v4992_v52, %v1462_v41  ;;  %v1429_v9 = vmul.f32 12.507343, %v1428_v38 }
 0x171   : > { %v2815_v23 = vpop.eup %2814  ;;  %vm5037_vm15 = vcmp.eq.f32.partialorder %v1469_v18, 8.507059e+37  ;;  %v1492_v31 = vand.u32 2147483647, %v4975_v50  ;;  %2818 = vrcp.f32 %v5005_v0  ;;  %v1438_v21 = vsel %vm5016_vm9, %v4944_v54, %v1434_v57 }
 0x172   : > { %vm1466_vm14 = vweird.f32 %v4992_v52  ;;  %v1472_v60 = vor.u32 1.1754944e-38, %v1471_v4  ;;  %v1484_v56 = vmul.f32 %v2815_v23, %v4975_v50  ;;  %v1453_v10 = vsel %vm5032_vm12, %v4977_v27, %v1449_v36 }
 0x173   : > { %v2817_v20 = vpop.eup %2816  ;;  %v5052_v16 = vadd.f32 6.0, %v4454_v59  ;;  %vm1488_vm0 = vweird.f32 %v4975_v50  ;;  %v1494_v18 = vand.u32 2147483648, %v4975_v50  ;;  %v1464_v38 = vadd.f32 %v4992_v52, %v1463_v26  ;;  %vm5062_vm2 = vmor %vm1465_vm10, %vm1466_vm14 }
 0x174   : > { %v1485_v54 = vsub.f32 1.0, %v1484_v56  ;;  %vm1489_vm1 = vweird.f32 %v2815_v23  ;;  %v1499_v4 = vmul.f32 %v2817_v20, %v4981_v63  ;;  %v1443_v57 = vsel %vm4984_vm4, %v1442_v51, %v1438_v21 }
 0x175   : > { %v5067_v34 = vadd.f32 %v1429_v9, %v4956_v2  ;;  %vm5069_vm7 = vcmp.eq.f32.partialorder %v1492_v31, 8.507059e+37  ;;  %vm1503_vm3 = vweird.f32 %v4981_v63  ;;  %vm1504_vm8 = vweird.f32 %v2817_v20  ;;  %vm5081_vm4 = vmor %vm1488_vm0, %vm1489_vm1 }
 0x176   : > { %v1486_v62 = vmul.f32 %v2815_v23, %v1485_v54  ;;  %v1500_v36 = vsub.f32 1.0, %v1499_v4  ;;  %v1507_v24 = vand.u32 2147483647, %v4981_v63  ;;  %v1458_v61 = vsel %vm5020_vm13, %v1457_v49, %v1453_v10  ;;  %vm5094_vm5 = vmor %vm1503_vm3, %vm1504_vm8 }
 0x177   : > { %v5075_v51 = vpop.eup %2818  ;;  %v1495_v25 = vor.u32 1.1754944e-38, %v1494_v18  ;;  %v1509_v26 = vand.u32 2147483648, %v4981_v63  ;;  %2820 = vrcp.f32 %v5052_v16  ;;  %v1468_v9 = vsel %vm5062_vm2, %v4992_v52, %v1464_v38 }
 0x178   : > { %v1487_v31 = vadd.f32 %v2815_v23, %v1486_v62  ;;  %v1501_v21 = vmul.f32 %v2817_v20, %v1500_v36  ;;  %v1514_v37 = vmul.f32 %v5075_v51, %v5005_v0  ;;  %v1444_v49 = vmul.f32 12.507343, %v1443_v57 }
 0x179   : > { %vm1518_vm6 = vweird.f32 %v5005_v0  ;;  %v1522_v56 = vand.u32 2147483647, %v5005_v0  ;;  %v5101_v10 = vadd.f32 7.0, %v4418_v14  ;;  %vm5105_vm11 = vcmp.eq.f32.partialorder %v1507_v24, 8.507059e+37 }
 0x17a   : > { %v1491_v52 = vsel %vm5081_vm4, %v2815_v23, %v1487_v31  ;;  %v1502_v18 = vadd.f32 %v2817_v20, %v1501_v21  ;;  %v1515_v63 = vsub.f32 1.0, %v1514_v37  ;;  %v1459_v54 = vmul.f32 12.507343, %v1458_v61 }
 0x17b   : > { %v1473_v4 = vsel %vm5037_vm15, %v1472_v60, %v1468_v9  ;;  %v1510_v57 = vor.u32 1.1754944e-38, %v1509_v26  ;;  %v5112_v27 = vadd.f32 7.0, %v4424_v17  ;;  %vm1519_vm9 = vweird.f32 %v5075_v51 }
 0x17c   : > { %v1506_v62 = vsel %vm5094_vm5, %v2817_v20, %v1502_v18  ;;  %v1516_v36 = vmul.f32 %v5075_v51, %v1515_v63  ;;  %2822 = vrcp.f32 %v5101_v10  ;;  %v1476_v24 = vadd.f32 %v1444_v49, %v4959_v32  ;;  %vm5139_vm10 = vmor %vm1518_vm6, %vm1519_vm9 }
 0x17d   : > { %v5119_v23 = vpop.eup %2820  ;;  %v1496_v53 = vsel %vm5069_vm7, %v1495_v25, %v1491_v52  ;;  %v1524_v60 = vand.u32 2147483648, %v5005_v0  ;;  %v5126_v61 = vadd.f32 7.0, %v4429_v44  ;;  %v1474_v2 = vmul.f32 12.507343, %v1473_v4 }
 0x17e   : > { %v1517_v20 = vadd.f32 %v5075_v51, %v1516_v36  ;;  %vm5129_vm13 = vcmp.eq.f32.partialorder %v1522_v56, 8.507059e+37  ;;  %v1529_v9 = vmul.f32 %v5119_v23, %v5052_v16  ;;  %v1511_v32 = vsel %vm5105_vm11, %v1510_v57, %v1506_v62 }
 0x17f   : > { %v1537_v25 = vand.u32 2147483647, %v5052_v16  ;;  %v1539_v31 = vand.u32 2147483648, %v5052_v16  ;;  %2824 = vrcp.f32 %v5112_v27  ;;  %v5147_v21 = vadd.f32 %v1459_v54, %v5012_v58 }
 0x180   : > { %v1497_v37 = vmul.f32 -0.1385711, %v1496_v53  ;;  %v1530_v49 = vsub.f32 1.0, %v1529_v9  ;;  %v1560_v50 = vand.u32 2147483647, %v5101_v10  ;;  %v1525_v56 = vor.u32 1.1754944e-38, %v1524_v60 }
 0x181   : > { %vm1533_vm12 = vweird.f32 %v5052_v16  ;;  %v5152_v0 = vadd.f32 7.0, %v4454_v59  ;;  %2826 = vrcp.f32 %v5126_v61  ;;  %v5156_v18 = vadd.f32 %v1474_v2, %v5025_v30 }
 0x182   : > { %v2823_v52 = vpop.eup %2822  ;;  %v1512_v38 = vmul.f32 -0.1385711, %v1511_v32  ;;  %v1521_v58 = vsel %vm5139_vm10, %v5075_v51, %v1517_v20  ;;  %v1562_v63 = vand.u32 2147483648, %v5101_v10  ;;  %v1531_v54 = vmul.f32 %v5119_v23, %v1530_v49 }
 0x183   : > { %vm5163_vm15 = vcmp.eq.f32.partialorder %v1537_v25, 8.507059e+37  ;;  %v1540_v57 = vor.u32 1.1754944e-38, %v1539_v31  ;;  %v1552_v62 = vmul.f32 %v2823_v52, %v5101_v10  ;;  %vm1534_vm14 = vweird.f32 %v5119_v23 }
 0x184   : > { %v5170_v30 = vadd.f32 %v1497_v37, %v5067_v34  ;;  %vm1556_vm0 = vweird.f32 %v5101_v10  ;;  %vm5173_vm1 = vcmp.eq.f32.partialorder %v1560_v50, 8.507059e+37  ;;  %v1526_v53 = vsel %vm5129_vm13, %v1525_v56, %v1521_v58  ;;  %vm5191_vm3 = vmor %vm1533_vm12, %vm1534_vm14 }
 0x185   : > { %v2825_v36 = vpop.eup %2824  ;;  %v1553_v60 = vsub.f32 1.0, %v1552_v62  ;;  %vm1557_vm2 = vweird.f32 %v2823_v52  ;;  %2828 = vrcp.f32 %v5152_v0  ;;  %v5180_v2 = vadd.f32 %v1512_v38, %v1476_v24 }
 0x186   : > { %v1563_v20 = vor.u32 1.1754944e-38, %v1562_v63  ;;  %v1567_v34 = vmul.f32 %v2825_v36, %v5112_v27  ;;  %vm1571_vm7 = vweird.f32 %v5112_v27  ;;  %v1532_v32 = vadd.f32 %v5119_v23, %v1531_v54  ;;  %vm5199_vm8 = vmor %vm1556_vm0, %vm1557_vm2 }
 0x187   : > { %v5184_v9 = vpop.eup %2826  ;;  %v1554_v41 = vmul.f32 %v2823_v52, %v1553_v60  ;;  %v1575_v24 = vand.u32 2147483647, %v5112_v27  ;;  %v1577_v25 = vand.u32 2147483648, %v5112_v27  ;;  %v1527_v31 = vmul.f32 -0.1385711, %v1526_v53 }
 0x188   : > { %v1568_v49 = vsub.f32 1.0, %v1567_v34  ;;  %vm1572_vm4 = vweird.f32 %v2825_v36  ;;  %v1582_v16 = vmul.f32 %v5184_v9, %v5126_v61  ;;  %vm1586_vm5 = vweird.f32 %v5126_v61 }
 0x189   : > { %v1555_v50 = vadd.f32 %v2823_v52, %v1554_v41  ;;  %v1590_v56 = vand.u32 2147483647, %v5126_v61  ;;  %v1615_v38 = vadd.f32 8.0, %v4418_v14  ;;  %v1592_v54 = vand.u32 2147483648, %v5126_v61  ;;  %vm5221_vm6 = vmor %vm1571_vm7, %vm1572_vm4 }
 0x18a   : > { %v1569_v58 = vmul.f32 %v2825_v36, %v1568_v49  ;;  %v1583_v63 = vsub.f32 1.0, %v1582_v16  ;;  %v5210_v62 = vadd.f32 8.0, %v4424_v17  ;;  %v1536_v60 = vsel %vm5191_vm3, %v5119_v23, %v1532_v32 }
 0x18b   : > { %v5212_v53 = vpop.eup %2828  ;;  %v1559_v34 = vsel %vm5199_vm8, %v2823_v52, %v1555_v50  ;;  %vm1587_vm11 = vweird.f32 %v5184_v9  ;;  %2830 = vrcp.f32 %v1615_v38  ;;  %vm5231_vm9 = vcmp.eq.f32.partialorder %v1575_v24, 8.507059e+37 }
 0x18c   : > { %v1564_v49 = vsel %vm5173_vm1, %v1563_v20, %v1559_v34  ;;  %v1570_v16 = vadd.f32 %v2825_v36, %v1569_v58  ;;  %v1584_v46 = vmul.f32 %v5184_v9, %v1583_v63  ;;  %v1597_v23 = vmul.f32 %v5212_v53, %v5152_v0  ;;  %vm5252_vm13 = vmor %vm1586_vm5, %vm1587_vm11 }
 0x18d   : > { %v1578_v32 = vor.u32 1.1754944e-38, %v1577_v25  ;;  %v1607_v26 = vand.u32 2147483648, %v5152_v0  ;;  %v5237_v37 = vadd.f32 8.0, %v4429_v44  ;;  %v1541_v51 = vsel %vm5163_vm15, %v1540_v57, %v1536_v60 }
 0x18e   : > { %v1574_v20 = vsel %vm5221_vm6, %v2825_v36, %v1570_v16  ;;  %v1585_v50 = vadd.f32 %v5184_v9, %v1584_v46  ;;  %2832 = vrcp.f32 %v5210_v62  ;;  %v5246_v24 = vadd.f32 %v1527_v31, %v5147_v21 }
 0x18f   : > { %v1565_v58 = vmul.f32 9.984369e-06, %v1564_v49  ;;  %vm5256_vm10 = vcmp.eq.f32.partialorder %v1590_v56, 8.507059e+37  ;;  %v1598_v57 = vsub.f32 1.0, %v1597_v23  ;;  %v1593_v46 = vor.u32 1.1754944e-38, %v1592_v54 }
 0x190   : > { %vm1601_vm12 = vweird.f32 %v5152_v0  ;;  %v1605_v21 = vand.u32 2147483647, %v5152_v0  ;;  %v1628_v36 = vand.u32 2147483647, %v1615_v38  ;;  %v5262_v63 = vmul.f32 -0.1385711, %v1541_v51 }
 0x191   : > { %v2831_v31 = vpop.eup %2830  ;;  %v1579_v60 = vsel %vm5231_vm9, %v1578_v32, %v1574_v20  ;;  %v5266_v34 = vor.u32 1.1754944e-38, %v1607_v26  ;;  %2834 = vrcp.f32 %v5237_v37  ;;  %v1589_v56 = vsel %vm5252_vm13, %v5184_v9, %v1585_v50 }
 0x192   : > { %v5273_v54 = vadd.f32 8.0, %v4454_v59  ;;  %v1620_v41 = vmul.f32 %v2831_v31, %v1615_v38  ;;  %v1630_v49 = vand.u32 2147483648, %v1615_v38  ;;  %v1599_v16 = vmul.f32 %v5212_v53, %v1598_v57 }
 0x193   : > { %vm1602_vm15 = vweird.f32 %v5212_v53  ;;  %v5278_v23 = vadd.f32 %v1565_v58, %v5170_v30  ;;  %vm1624_vm14 = vweird.f32 %v1615_v38  ;;  %v1580_v32 = vmul.f32 9.984369e-06, %v1579_v60 }
 0x194   : > { %v2833_v52 = vpop.eup %2832  ;;  %v1621_v26 = vsub.f32 1.0, %v1620_v41  ;;  %vm1625_vm0 = vweird.f32 %v2831_v31  ;;  %vm5280_vm1 = vcmp.eq.f32.partialorder %v1628_v36, 8.507059e+37  ;;  %v1594_v9 = vsel %vm5256_vm10, %v1593_v46, %v1589_v56  ;;  %vm5306_vm4 = vmor %vm1601_vm12, %vm1602_vm15 }
 0x195   : > { %vm5286_vm2 = vcmp.eq.f32.partialorder %v1605_v21, 8.507059e+37  ;;  %v1635_v50 = vmul.f32 %v2833_v52, %v5210_v62  ;;  %v1643_v30 = vand.u32 2147483647, %v5210_v62  ;;  %v1645_v58 = vand.u32 2147483648, %v5210_v62  ;;  %vm5297_vm3 = vmor %vm1624_vm14, %vm1625_vm0 }
 0x196   : > { %v1622_v25 = vmul.f32 %v2831_v31, %v1621_v26  ;;  %v1631_v57 = vor.u32 1.1754944e-38, %v1630_v49  ;;  %vm1639_vm7 = vweird.f32 %v5210_v62  ;;  %2836 = vrcp.f32 %v5273_v54 }
 0x197   : > { %v2835_v36 = vpop.eup %2834  ;;  %v1600_v4 = vadd.f32 %v5212_v53, %v1599_v16  ;;  %v1636_v21 = vsub.f32 1.0, %v1635_v50  ;;  %vm1640_vm8 = vweird.f32 %v2833_v52  ;;  %v1658_v60 = vand.u32 2147483647, %v5237_v37 }
 0x198   : > { %v1595_v56 = vmul.f32 9.984369e-06, %v1594_v9  ;;  %v1623_v49 = vadd.f32 %v2831_v31, %v1622_v25  ;;  %v1650_v38 = vmul.f32 %v2835_v36, %v5237_v37  ;;  %v1660_v16 = vand.u32 2147483648, %v5237_v37  ;;  %vm5321_vm6 = vmor %vm1639_vm7, %vm1640_vm8 }
 0x199   : > { %v1612_v26 = vadd.f32 %v1580_v32, %v5180_v2  ;;  %v1637_v50 = vmul.f32 %v2833_v52, %v1636_v21  ;;  %vm5313_vm5 = vcmp.eq.f32.partialorder %v1643_v30, 8.507059e+37  ;;  %v1646_v9 = vor.u32 1.1754944e-38, %v1645_v58 }
 0x19a   : > { %v1627_v5 = vsel %vm5297_vm3, %v2831_v31, %v1623_v49  ;;  %v1651_v25 = vsub.f32 1.0, %v1650_v38  ;;  %vm1654_vm11 = vweird.f32 %v5237_v37  ;;  %vm1655_vm9 = vweird.f32 %v2835_v36 }
 0x19b   : > { %v1604_v2 = vsel %vm5306_vm4, %v5212_v53, %v1600_v4  ;;  %v1638_v32 = vadd.f32 %v2833_v52, %v1637_v50  ;;  %vm5329_vm13 = vcmp.eq.f32.partialorder %v1658_v60, 8.507059e+37  ;;  %v5334_v31 = vadd.f32 0.5, %v5101_v10  ;;  %vm5343_vm10 = vmor %vm1654_vm11, %vm1655_vm9 }
 0x19c   : > { %v2837_v62 = vpop.eup %2836  ;;  %v1632_v58 = vsel %vm5280_vm1, %v1631_v57, %v1627_v5  ;;  %v1652_v46 = vmul.f32 %v2835_v36, %v1651_v25  ;;  %v1661_v21 = vor.u32 1.1754944e-38, %v1660_v16  ;;  %v5339_v37 = vadd.f32 0.5, %v5112_v27 }
 0x19d   : > { %v1642_v53 = vsel %vm5321_vm6, %v2833_v52, %v1638_v32  ;;  %v1665_v60 = vmul.f32 %v2837_v62, %v5273_v54  ;;  %vm1669_vm12 = vweird.f32 %v5273_v54  ;;  %v5350_v10 = vadd.f32 0.5, %v5126_v61 }
 0x19e   : > { %v1647_v5 = vsel %vm5313_vm5, %v1646_v9, %v1642_v53  ;;  %v1653_v51 = vadd.f32 %v2835_v36, %v1652_v46  ;;  %v1675_v27 = vand.u32 2147483648, %v5273_v54  ;;  %v5356_v11 = vadd.f32 0.5, %v5152_v0 }
 0x19f   : > { %v1633_v52 = vmul.f32 1.5056327e-07, %v1632_v58  ;;  %v1666_v57 = vsub.f32 1.0, %v1665_v60  ;;  %vm1670_vm15 = vweird.f32 %v2837_v62  ;;  %2838 = vlog2.f32 %v5334_v31 }
 0x1a0   : > { %v1609_v41 = vsel %vm5286_vm2, %v5266_v34, %v1604_v2  ;;  %v1657_v1 = vsel %vm5343_vm10, %v2835_v36, %v1653_v51  ;;  %v1673_v61 = vand.u32 2147483647, %v5273_v54  ;;  %2840 = vlog2.f32 %v5339_v37  ;;  %vm5375_vm14 = vmor %vm1669_vm12, %vm1670_vm15  ;;  %v2954_v2 = vld [vmem:[%s3320_s13] sm:$0xff] }
 0x1a1   : > { %v1648_v49 = vmul.f32 1.5056327e-07, %v1647_v5  ;;  %v1662_v0 = vsel %vm5329_vm13, %v1661_v21, %v1657_v1  ;;  %v1667_v38 = vmul.f32 %v2837_v62, %v1666_v57  ;;  %2842 = vlog2.f32 %v5350_v10  ;;  %v2955_v21 = vld [vmem:[%s3320_s13 + $0x8] sm:$0xff] }
 0x1a2   : > { %v5370_v16 = vmul.f32 0.6931472, %v4512_v13  ;;  %v1613_v34 = vadd.f32 %v1595_v56, %v5246_v24  ;;  %v1663_v20 = vmul.f32 1.5056327e-07, %v1662_v0  ;;  %2844 = vlog2.f32 %v5356_v11 }
 0x1a3   : > { %v1668_v50 = vadd.f32 %v2837_v62, %v1667_v38  ;;  %v1676_v9 = vor.u32 1.1754944e-38, %v1675_v27  ;;  %v1679_v25 = vadd.f32 %v1633_v52, %v5278_v23  ;;  %v1731_v32 = vadd.f32 1.0, %v2954_v2 }
 0x1a4   : > { %v1546_v13 = vadd.f32 %v5262_v63, %v5156_v18  ;;  %v1610_v24 = vmul.f32 9.984369e-06, %v1609_v41  ;;  %vm1674_vm0 = vcmp.eq.f32.partialorder %v1673_v61, 8.507059e+37  ;;  %v1687_v54 = vadd.f32 0.5, %v4418_v14 }
 0x1a5   : > { %v2839_v56 = vpop.eup %2838  ;;  %v6590_v30 = vsub.f32 %v4495_v22, %v4458_v3  ;;  %v1672_v46 = vsel %vm5375_vm14, %v2837_v62, %v1668_v50  ;;  %v1680_v23 = vadd.f32 %v1648_v49, %v1612_v26  ;;  %v1732_v53 = vadd.f32 1.0, %v2955_v21  ;;  %v2957_v49 = vld [vmem:[%s3320_s13 + $0x18] sm:$0xff] }
 0x1a6   : > { %v2841_v4 = vpop.eup %2840  ;;  %v1681_v60 = vadd.f32 %v1663_v20, %v1613_v34  ;;  %v1688_v18 = vadd.f32 0.5, %v4424_v17  ;;  %v1689_v14 = vadd.f32 0.5, %v4429_v44  ;;  %v1692_v63 = vmul.f32 0.6931472, %v2839_v56  ;;  %v2956_v17 = vld [vmem:[%s3320_s13 + $0x10] sm:$0xff] }
 0x1a7   : > { %v5389_v58 = vadd.f32 %v6590_v30, %v3512_v6  ;;  %v2843_v5 = vpop.eup %2842  ;;  %v1677_v51 = vsel %vm1674_vm0, %v1676_v9, %v1672_v46  ;;  %v1694_v27 = vmul.f32 0.6931472, %v2841_v4  ;;  %2846 = vlog2.f32 %v1679_v25 }
 0x1a8   : > { %v5396_v6 = vadd.f32 1.0, %v1731_v32  ;;  %v2845_v3 = vpop.eup %2844  ;;  %v1132_v22 = vmul.f32 0.6931472, %v4518_v45  ;;  %v1614_v26 = vadd.f32 %v1610_v24, %v1546_v13  ;;  %v1696_v62 = vmul.f32 0.6931472, %v2843_v5 }
 0x1a9   : > { %v1699_v52 = vmul.f32 %v1692_v63, %v1687_v54  ;;  %v1690_v57 = vadd.f32 0.5, %v4454_v59  ;;  %2848 = vlog2.f32 %v1680_v23  ;;  %v1733_v41 = vadd.f32 1.0, %v2956_v17 }
 0x1aa   : > { %v5401_v44 = vadd.f32 1.0, %v1732_v53  ;;  %v1678_v1 = vmul.f32 1.5056327e-07, %v1677_v51  ;;  %v1698_v61 = vmul.f32 0.6931472, %v2845_v3  ;;  %2850 = vlog2.f32 %v1681_v60 }
 0x1ab   : > { %v1734_v0 = vadd.f32 1.0, %v2957_v49  ;;  %v1700_v38 = vmul.f32 %v1694_v27, %v1688_v18  ;;  %v1701_v34 = vmul.f32 %v1696_v62, %v1689_v14  ;;  %2852 = vlog2.f32 %v1731_v32 }
 0x1ac   : > { %v5405_v45 = vadd.f32 1.0, %v5396_v6  ;;  %v1110_v20 = vsub.f32 %v4577_v29, %v4461_v8  ;;  %v5411_v59 = vadd.f32 %v4579_v42, %v4478_v19  ;;  %v1703_v36 = vadd.f32 0.9189385, %v1699_v52 }
 0x1ad   : > { %2854 = vlog2.f32 %v1732_v53  ;;  %v2847_v50 = vpop.eup %2846  ;;  %v1134_v9 = vmul.f32 0.6931472, %v4524_v40  ;;  %v5414_v25 = vadd.f32 1.0, %v1733_v41  ;;  %v5417_v2 = vadd.f32 1.0, %v5401_v44 }
 0x1ae   : > { %2856 = vlog2.f32 %v1733_v41  ;;  %v1682_v32 = vadd.f32 %v1678_v1, %v1614_v26  ;;  %v1702_v13 = vmul.f32 %v1698_v61, %v1690_v57  ;;  %v5419_v24 = vadd.f32 1.0, %v1734_v0 }
 0x1af   : > { %2858 = vlog2.f32 %v1734_v0  ;;  %v2849_v8 = vpop.eup %2848  ;;  %v5423_v19 = vadd.f32 %v5370_v16, %v4488_v55  ;;  %v1704_v29 = vadd.f32 0.9189385, %v1700_v38  ;;  %v1705_v42 = vadd.f32 0.9189385, %v1701_v34 }
 0x1b0   : > { %2860 = vrcp.f32 %v5405_v45  ;;  %v2851_v40 = vpop.eup %2850  ;;  %v5427_v54 = vadd.f32 %v1132_v22, %v4497_v28  ;;  %v1707_v56 = vsub.f32 %v1703_v36, %v5334_v31  ;;  %v1712_v30 = vmul.f32 0.6931472, %v2847_v50 }
 0x1b1   : > { %2862 = vlog2.f32 %v5396_v6  ;;  %v2853_v46 = vpop.eup %2852  ;;  %v5432_v23 = vadd.f32 %v1110_v20, %v3519_v7  ;;  %v5435_v55 = vadd.f32 %v1134_v9, %v4506_v43  ;;  %v5438_v16 = vadd.f32 1.0, %v5414_v25 }
 0x1b2   : > { %2864 = vrcp.f32 %v5417_v2  ;;  %v5441_v28 = vadd.f32 0.9189385, %v1702_v13  ;;  %v1714_v53 = vmul.f32 0.6931472, %v2849_v8  ;;  %v5444_v31 = vadd.f32 1.0, %v5419_v24 }
 0x1b3   : > { %6591 = vst [vmem:[#allocation21_spill] sm:$0xff] %v5432_v23  ;;  %v2855_v21 = vpop.eup %2854  ;;  %2866 = vlog2.f32 %v1682_v32  ;;  %v1708_v7 = vsub.f32 %v1704_v29, %v5339_v37  ;;  %v1709_v60 = vsub.f32 %v1705_v42, %v5350_v10  ;;  %v1716_v43 = vmul.f32 0.6931472, %v2851_v40 }
 0x1b4   : > { %v2857_v4 = vpop.eup %2856  ;;  %2868 = vlog2.f32 %v5401_v44  ;;  %v5451_v14 = vadd.f32 %v1712_v30, %v1707_v56  ;;  %vm1768_vm1 = vweird.f32 %v5405_v45  ;;  %v1772_v63 = vand.u32 2147483647, %v5405_v45 }
 0x1b5   : > { %v5449_v18 = vpop.eup %2858  ;;  %2870 = vlog2.f32 %v5414_v25  ;;  %v5456_v51 = vmul.f32 0.6931472, %v2853_v46  ;;  %v5458_v27 = vmul.f32 0.6931472, %v2855_v21  ;;  %v1774_v37 = vand.u32 2147483648, %v5405_v45 }
 0x1b6   : > { %v2861_v5 = vpop.eup %2860  ;;  %2872 = vrcp.f32 %v5438_v16  ;;  %v1787_v26 = vand.u32 2147483647, %v5417_v2  ;;  %v5469_v52 = vadd.f32 %v1714_v53, %v1708_v7  ;;  %v5471_v57 = vadd.f32 %v1716_v43, %v1709_v60 }
 0x1b7   : > { %v5462_v10 = vpop.eup %2862  ;;  %2874 = vlog2.f32 %v5419_v24  ;;  %v1764_v22 = vmul.f32 %v2861_v5, %v5405_v45  ;;  %v5473_v17 = vmul.f32 0.6931472, %v2857_v4  ;;  %v1789_v41 = vand.u32 2147483648, %v5417_v2 }
 0x1b8   : > { %v2865_v62 = vpop.eup %2864  ;;  %vm1769_vm2 = vweird.f32 %v2861_v5  ;;  %vm5483_vm7 = vcmp.eq.f32.partialorder %v1772_v63, 8.507059e+37  ;;  %v1775_v20 = vor.u32 1.1754944e-38, %v1774_v37  ;;  %vm1783_vm3 = vweird.f32 %v5417_v2 }
 0x1b9   : > { %v5476_v1 = vpop.eup %2866  ;;  %v1765_v49 = vsub.f32 1.0, %v1764_v22  ;;  %v1779_v0 = vmul.f32 %v2865_v62, %v5417_v2  ;;  %2876 = vrcp.f32 %v5444_v31  ;;  %vm1784_vm8 = vweird.f32 %v2865_v62  ;;  %vm5497_vm5 = vmor %vm1768_vm1, %vm1769_vm2 }
 0x1ba   : > { %v5481_v38 = vpop.eup %2868  ;;  %vm5491_vm4 = vcmp.eq.f32.partialorder %v1787_v26, 8.507059e+37  ;;  %v1790_v29 = vor.u32 1.1754944e-38, %v1789_v41  ;;  %v1802_v42 = vand.u32 2147483647, %v5438_v16  ;;  %v1804_v40 = vand.u32 2147483648, %v5438_v16  ;;  %vm5512_vm11 = vmor %vm1783_vm3, %vm1784_vm8 }
 0x1bb   : > { %v5489_v36 = vpop.eup %2870  ;;  %v1766_v50 = vmul.f32 %v2861_v5, %v1765_v49  ;;  %v1780_v9 = vsub.f32 1.0, %v1779_v0  ;;  %v5504_v56 = vadd.f32 2.0, %v5396_v6  ;;  %vm1798_vm6 = vweird.f32 %v5438_v16 }
 0x1bc   : > { %v2873_v13 = vpop.eup %2872  ;;  %vm1813_vm13 = vweird.f32 %v5444_v31  ;;  %v1817_v4 = vand.u32 2147483647, %v5444_v31  ;;  %v1819_v7 = vand.u32 2147483648, %v5444_v31  ;;  %vm5522_vm10 = vcmp.eq.f32.partialorder %v1802_v42, 8.507059e+37 }
 0x1bd   : > { %v5506_v30 = vpop.eup %2874  ;;  %v1767_v46 = vadd.f32 %v2861_v5, %v1766_v50  ;;  %v1781_v21 = vmul.f32 %v2865_v62, %v1780_v9  ;;  %v1794_v53 = vmul.f32 %v2873_v13, %v5438_v16  ;;  %vm1799_vm9 = vweird.f32 %v2873_v13 }
 0x1be   : > { %2878 = vrcp.f32 %v5504_v56  ;;  %v1805_v22 = vor.u32 1.1754944e-38, %v1804_v40  ;;  %v5527_v26 = vadd.f32 2.0, %v5401_v44  ;;  %v5530_v41 = vadd.f32 2.0, %v5414_v25  ;;  %vm5542_vm12 = vmor %vm1798_vm6, %vm1799_vm9 }
 0x1bf   : > { %v1771_v60 = vsel %vm5497_vm5, %v2861_v5, %v1767_v46  ;;  %v1782_v43 = vadd.f32 %v2865_v62, %v1781_v21  ;;  %v1795_v63 = vsub.f32 1.0, %v1794_v53  ;;  %v2877_v37 = vpop.eup %2876  ;;  %vm5546_vm15 = vcmp.eq.f32.partialorder %v1817_v4, 8.507059e+37 }
 0x1c0   : > { %v1776_v49 = vsel %vm5483_vm7, %v1775_v20, %v1771_v60  ;;  %v1809_v50 = vmul.f32 %v2877_v37, %v5444_v31  ;;  %v1820_v34 = vor.u32 1.1754944e-38, %v1819_v7  ;;  %vm1814_vm14 = vweird.f32 %v2877_v37 }
 0x1c1   : > { %v1786_v5 = vsel %vm5512_vm11, %v2865_v62, %v1782_v43  ;;  %v1796_v0 = vmul.f32 %v2873_v13, %v1795_v63  ;;  %v1840_v62 = vand.u32 2147483647, %v5504_v56  ;;  %v1842_v32 = vand.u32 2147483648, %v5504_v56  ;;  %vm5564_vm1 = vmor %vm1813_vm13, %vm1814_vm14 }
 0x1c2   : > { %v1791_v9 = vsel %vm5491_vm4, %v1790_v29, %v1786_v5  ;;  %v1810_v40 = vsub.f32 1.0, %v1809_v50  ;;  %v1777_v29 = vmul.f32 676.5204, %v1776_v49  ;;  %v5553_v46 = vadd.f32 2.0, %v5419_v24 }
 0x1c3   : > { %v1797_v20 = vadd.f32 %v2873_v13, %v1796_v0  ;;  %vm1836_vm0 = vweird.f32 %v5504_v56  ;;  %2880 = vrcp.f32 %v5527_v26  ;;  %v1792_v21 = vmul.f32 676.5204, %v1791_v9 }
 0x1c4   : > { %v2879_v16 = vpop.eup %2878  ;;  %v1811_v45 = vmul.f32 %v2877_v37, %v1810_v40  ;;  %2882 = vrcp.f32 %v5530_v41  ;;  %v1855_v43 = vand.u32 2147483647, %v5527_v26  ;;  %v1857_v63 = vand.u32 2147483648, %v5527_v26 }
 0x1c5   : > { %v1801_v53 = vsel %vm5542_vm12, %v2873_v13, %v1797_v20  ;;  %v1832_v60 = vmul.f32 %v2879_v16, %v5504_v56  ;;  %vm5571_vm2 = vcmp.eq.f32.partialorder %v1840_v62, 8.507059e+37  ;;  %v1843_v2 = vor.u32 1.1754944e-38, %v1842_v32 }
 0x1c6   : > { %v1806_v4 = vsel %vm5522_vm10, %v1805_v22, %v1801_v53  ;;  %v1812_v13 = vadd.f32 %v2877_v37, %v1811_v45  ;;  %v5575_v22 = vadd.f32 1.0, %v1777_v29  ;;  %vm1837_vm7 = vweird.f32 %v2879_v16 }
 0x1c7   : > { %v1807_v49 = vmul.f32 676.5204, %v1806_v4  ;;  %v1833_v31 = vsub.f32 1.0, %v1832_v60  ;;  %2884 = vrcp.f32 %v5553_v46  ;;  %v5580_v50 = vadd.f32 1.0, %v1792_v21  ;;  %vm5593_vm5 = vmor %vm1836_vm0, %vm1837_vm7 }
 0x1c8   : > { %v1816_v0 = vsel %vm5564_vm1, %v2877_v37, %v1812_v13  ;;  %vm1851_vm3 = vweird.f32 %v5527_v26  ;;  %v1870_v9 = vand.u32 2147483647, %v5530_v41  ;;  %vm5584_vm8 = vcmp.eq.f32.partialorder %v1855_v43, 8.507059e+37 }
 0x1c9   : > { %v2881_v8 = vpop.eup %2880  ;;  %v1834_v62 = vmul.f32 %v2879_v16, %v1833_v31  ;;  %v1858_v40 = vor.u32 1.1754944e-38, %v1857_v63  ;;  %vm1866_vm4 = vweird.f32 %v5530_v41  ;;  %v5589_v29 = vadd.f32 1.0, %v1807_v49 }
 0x1ca   : > { %v2883_v32 = vpop.eup %2882  ;;  %v1847_v21 = vmul.f32 %v2881_v8, %v5527_v26  ;;  %v1872_v53 = vand.u32 2147483648, %v5530_v41  ;;  %vm1881_vm6 = vweird.f32 %v5553_v46  ;;  %v1821_v45 = vsel %vm5546_vm15, %v1820_v34, %v1816_v0 }
 0x1cb   : > { %v1835_v4 = vadd.f32 %v2879_v16, %v1834_v62  ;;  %v1862_v7 = vmul.f32 %v2883_v32, %v5530_v41  ;;  %v1885_v60 = vand.u32 2147483647, %v5553_v46  ;;  %vm1852_vm11 = vweird.f32 %v2881_v8 }
 0x1cc   : > { %v1848_v43 = vsub.f32 1.0, %v1847_v21  ;;  %vm5604_vm9 = vcmp.eq.f32.partialorder %v1870_v9, 8.507059e+37  ;;  %v5609_v63 = vadd.f32 3.0, %v5396_v6  ;;  %vm1867_vm13 = vweird.f32 %v2883_v32  ;;  %vm5621_vm10 = vmor %vm1851_vm3, %vm1852_vm11 }
 0x1cd   : > { %v2885_v49 = vpop.eup %2884  ;;  %v1839_v13 = vsel %vm5593_vm5, %v2879_v16, %v1835_v4  ;;  %v1863_v42 = vsub.f32 1.0, %v1862_v7  ;;  %v5614_v34 = vadd.f32 3.0, %v5401_v44  ;;  %v1822_v31 = vmul.f32 676.5204, %v1821_v45  ;;  %vm5629_vm12 = vmor %vm1866_vm4, %vm1867_vm13 }
 0x1ce   : > { %v1844_v0 = vsel %vm5571_vm2, %v1843_v2, %v1839_v13  ;;  %v1849_v9 = vmul.f32 %v2881_v8, %v1848_v43  ;;  %v1877_v62 = vmul.f32 %v2885_v49, %v5553_v46  ;;  %v1873_v16 = vor.u32 1.1754944e-38, %v1872_v53 }
 0x1cf   : > { %v1864_v37 = vmul.f32 %v2883_v32, %v1863_v42  ;;  %v1887_v4 = vand.u32 2147483648, %v5553_v46  ;;  %2886 = vrcp.f32 %v5609_v63  ;;  %vm1882_vm15 = vweird.f32 %v2885_v49 }
 0x1d0   : > { %v1850_v7 = vadd.f32 %v2881_v8, %v1849_v9  ;;  %v1878_v2 = vsub.f32 1.0, %v1877_v62  ;;  %vm5633_vm14 = vcmp.eq.f32.partialorder %v1885_v60, 8.507059e+37  ;;  %v1845_v45 = vmul.f32 -1259.1392, %v1844_v0  ;;  %vm5650_vm0 = vmor %vm1881_vm6, %vm1882_vm15 }
 0x1d1   : > { %v1865_v43 = vadd.f32 %v2883_v32, %v1864_v37  ;;  %v5638_v53 = vadd.f32 3.0, %v5414_v25  ;;  %2888 = vrcp.f32 %v5614_v34  ;;  %v1826_v13 = vadd.f32 1.0, %v1822_v31 }
 0x1d2   : > { %v1854_v41 = vsel %vm5621_vm10, %v2881_v8, %v1850_v7  ;;  %v1879_v42 = vmul.f32 %v2885_v49, %v1878_v2  ;;  %v1908_v9 = vand.u32 2147483647, %v5609_v63  ;;  %v1888_v37 = vor.u32 1.1754944e-38, %v1887_v4 }
 0x1d3   : > { %v1859_v60 = vsel %vm5584_vm8, %v1858_v40, %v1854_v41  ;;  %v1869_v62 = vsel %vm5629_vm12, %v2883_v32, %v1865_v43  ;;  %v1910_v31 = vand.u32 2147483648, %v5609_v63  ;;  %v5658_v7 = vadd.f32 3.0, %v5419_v24 }
 0x1d4   : > { %v1874_v8 = vsel %vm5604_vm9, %v1873_v16, %v1869_v62  ;;  %v1880_v21 = vadd.f32 %v2885_v49, %v1879_v42  ;;  %vm1904_vm1 = vweird.f32 %v5609_v63  ;;  %v1860_v40 = vmul.f32 -1259.1392, %v1859_v60 }
 0x1d5   : > { %v2887_v20 = vpop.eup %2886  ;;  %v5662_v46 = vadd.f32 %v1845_v45, %v5575_v22  ;;  %v1923_v32 = vand.u32 2147483647, %v5614_v34  ;;  %2890 = vrcp.f32 %v5638_v53  ;;  %v1875_v4 = vmul.f32 -1259.1392, %v1874_v8 }
 0x1d6   : > { %v1884_v56 = vsel %vm5650_vm0, %v2885_v49, %v1880_v21  ;;  %v1900_v16 = vmul.f32 %v2887_v20, %v5609_v63  ;;  %vm5669_vm2 = vcmp.eq.f32.partialorder %v1908_v9, 8.507059e+37  ;;  %vm1905_vm7 = vweird.f32 %v2887_v20 }
 0x1d7   : > { %v2889_v2 = vpop.eup %2888  ;;  %v1911_v43 = vor.u32 1.1754944e-38, %v1910_v31  ;;  %vm1919_vm3 = vweird.f32 %v5614_v34  ;;  %v1925_v22 = vand.u32 2147483648, %v5614_v34  ;;  %v1889_v45 = vsel %vm5633_vm14, %v1888_v37, %v1884_v56  ;;  %vm5694_vm6 = vmor %vm1904_vm1, %vm1905_vm7 }
 0x1d8   : > { %v1901_v41 = vsub.f32 1.0, %v1900_v16  ;;  %v1915_v42 = vmul.f32 %v2889_v2, %v5614_v34  ;;  %v1938_v49 = vand.u32 2147483647, %v5638_v53  ;;  %v5680_v9 = vadd.f32 %v1860_v40, %v5580_v50 }
 0x1d9   : > { %vm5682_vm8 = vcmp.eq.f32.partialorder %v1923_v32, 8.507059e+37  ;;  %vm1934_vm4 = vweird.f32 %v5638_v53  ;;  %2892 = vrcp.f32 %v5658_v7  ;;  %v5689_v62 = vadd.f32 %v1875_v4, %v5589_v29 }
 0x1da   : > { %v1902_v26 = vmul.f32 %v2887_v20, %v1901_v41  ;;  %v1916_v0 = vsub.f32 1.0, %v1915_v42  ;;  %vm1920_vm5 = vweird.f32 %v2889_v2  ;;  %v1890_v31 = vmul.f32 -1259.1392, %v1889_v45 }
 0x1db   : > { %v2891_v37 = vpop.eup %2890  ;;  %v1926_v8 = vor.u32 1.1754944e-38, %v1925_v22  ;;  %v1940_v21 = vand.u32 2147483648, %v5638_v53  ;;  %v5700_v40 = vadd.f32 4.0, %v5396_v6  ;;  %vm5703_vm11 = vcmp.eq.f32.partialorder %v1938_v49, 8.507059e+37  ;;  %vm5709_vm9 = vmor %vm1919_vm3, %vm1920_vm5 }
 0x1dc   : > { %v1903_v29 = vadd.f32 %v2887_v20, %v1902_v26  ;;  %v1917_v32 = vmul.f32 %v2889_v2, %v1916_v0  ;;  %v1930_v4 = vmul.f32 %v2891_v37, %v5638_v53  ;;  %vm1935_vm13 = vweird.f32 %v2891_v37 }
 0x1dd   : > { %vm1949_vm10 = vweird.f32 %v5658_v7  ;;  %v1953_v16 = vand.u32 2147483647, %v5658_v7  ;;  %v1955_v22 = vand.u32 2147483648, %v5658_v7  ;;  %2894 = vrcp.f32 %v5700_v40  ;;  %vm5737_vm12 = vmor %vm1934_vm4, %vm1935_vm13 }
 0x1de   : > { %v1907_v45 = vsel %vm5694_vm6, %v2887_v20, %v1903_v29  ;;  %v1918_v41 = vadd.f32 %v2889_v2, %v1917_v32  ;;  %v1931_v42 = vsub.f32 1.0, %v1930_v4  ;;  %v5719_v34 = vadd.f32 %v1890_v31, %v1826_v13 }
 0x1df   : > { %v2893_v49 = vpop.eup %2892  ;;  %v1941_v26 = vor.u32 1.1754944e-38, %v1940_v21  ;;  %v5722_v0 = vadd.f32 4.0, %v5401_v44  ;;  %v5725_v61 = vadd.f32 4.0, %v5414_v25  ;;  %v1912_v3 = vsel %vm5669_vm2, %v1911_v43, %v1907_v45 }
 0x1e0   : > { %v1922_v20 = vsel %vm5709_vm9, %v2889_v2, %v1918_v41  ;;  %v1932_v50 = vmul.f32 %v2891_v37, %v1931_v42  ;;  %v1945_v29 = vmul.f32 %v2893_v49, %v5658_v7  ;;  %vm5741_vm15 = vcmp.eq.f32.partialorder %v1953_v16, 8.507059e+37 }
 0x1e1   : > { %v1927_v13 = vsel %vm5682_vm8, %v1926_v8, %v1922_v20  ;;  %v1956_v5 = vor.u32 1.1754944e-38, %v1955_v22  ;;  %v1976_v2 = vand.u32 2147483647, %v5700_v40  ;;  %vm1950_vm14 = vweird.f32 %v2893_v49 }
 0x1e2   : > { %v1933_v43 = vadd.f32 %v2891_v37, %v1932_v50  ;;  %v1946_v32 = vsub.f32 1.0, %v1945_v29  ;;  %v1978_v60 = vand.u32 2147483648, %v5700_v40  ;;  %v1913_v8 = vmul.f32 771.3234, %v1912_v3  ;;  %vm5759_vm1 = vmor %vm1949_vm10, %vm1950_vm14 }
 0x1e3   : > { %v5748_v4 = vadd.f32 4.0, %v5419_v24  ;;  %vm1972_vm0 = vweird.f32 %v5700_v40  ;;  %2896 = vrcp.f32 %v5722_v0  ;;  %v2895_v53 = vpop.eup %2894  ;;  %v1928_v63 = vmul.f32 771.3234, %v1927_v13 }
 0x1e4   : > { %v1937_v16 = vsel %vm5737_vm12, %v2891_v37, %v1933_v43  ;;  %v1947_v22 = vmul.f32 %v2893_v49, %v1946_v32  ;;  %2898 = vrcp.f32 %v5725_v61  ;;  %v1968_v41 = vmul.f32 %v2895_v53, %v5700_v40 }
 0x1e5   : > { %v1942_v45 = vsel %vm5703_vm11, %v1941_v26, %v1937_v16  ;;  %v1991_v42 = vand.u32 2147483647, %v5722_v0  ;;  %v1993_v20 = vand.u32 2147483648, %v5722_v0  ;;  %vm5766_vm2 = vcmp.eq.f32.partialorder %v1976_v2, 8.507059e+37 }
 0x1e6   : > { %v1943_v50 = vmul.f32 771.3234, %v1942_v45  ;;  %v1948_v37 = vadd.f32 %v2893_v49, %v1947_v22  ;;  %v1979_v56 = vor.u32 1.1754944e-38, %v1978_v60  ;;  %v5771_v26 = vadd.f32 %v1913_v8, %v5662_v46 }
 0x1e7   : > { %v1969_v7 = vsub.f32 1.0, %v1968_v41  ;;  %vm1973_vm7 = vweird.f32 %v2895_v53  ;;  %2900 = vrcp.f32 %v5748_v4  ;;  %v5777_v31 = vadd.f32 %v1928_v63, %v5680_v9 }
 0x1e8   : > { %v1952_v13 = vsel %vm5759_vm1, %v2893_v49, %v1948_v37  ;;  %vm1987_vm3 = vweird.f32 %v5722_v0  ;;  %v2006_v2 = vand.u32 2147483647, %v5725_v61  ;;  %vm5781_vm8 = vcmp.eq.f32.partialorder %v1991_v42, 8.507059e+37  ;;  %vm5791_vm5 = vmor %vm1972_vm0, %vm1973_vm7 }
 0x1e9   : > { %v2897_v43 = vpop.eup %2896  ;;  %v1970_v32 = vmul.f32 %v2895_v53, %v1969_v7  ;;  %v1994_v46 = vor.u32 1.1754944e-38, %v1993_v20  ;;  %vm2002_vm4 = vweird.f32 %v5725_v61  ;;  %v5787_v16 = vadd.f32 %v1943_v50, %v5689_v62 }
 0x1ea   : > { %v2899_v8 = vpop.eup %2898  ;;  %v1983_v49 = vmul.f32 %v2897_v43, %v5722_v0  ;;  %v2008_v63 = vand.u32 2147483648, %v5725_v61  ;;  %vm2017_vm6 = vweird.f32 %v5748_v4  ;;  %v1957_v22 = vsel %vm5741_vm15, %v1956_v5, %v1952_v13 }
 0x1eb   : > { %v1971_v45 = vadd.f32 %v2895_v53, %v1970_v32  ;;  %v1998_v3 = vmul.f32 %v2899_v8, %v5725_v61  ;;  %v2021_v62 = vand.u32 2147483647, %v5748_v4  ;;  %vm1988_vm11 = vweird.f32 %v2897_v43 }
 0x1ec   : > { %v1984_v41 = vsub.f32 1.0, %v1983_v49  ;;  %vm5802_vm9 = vcmp.eq.f32.partialorder %v2006_v2, 8.507059e+37  ;;  %v5807_v42 = vadd.f32 5.0, %v5396_v6  ;;  %vm2003_vm13 = vweird.f32 %v2899_v8  ;;  %vm5819_vm10 = vmor %vm1987_vm3, %vm1988_vm11 }
 0x1ed   : > { %v2901_v20 = vpop.eup %2900  ;;  %v1975_v50 = vsel %vm5791_vm5, %v2895_v53, %v1971_v45  ;;  %v1999_v21 = vsub.f32 1.0, %v1998_v3  ;;  %v5812_v5 = vadd.f32 5.0, %v5401_v44  ;;  %v1958_v37 = vmul.f32 771.3234, %v1957_v22  ;;  %vm5827_vm12 = vmor %vm2002_vm4, %vm2003_vm13 }
 0x1ee   : > { %v1980_v7 = vsel %vm5766_vm2, %v1979_v56, %v1975_v50  ;;  %v1985_v13 = vmul.f32 %v2897_v43, %v1984_v41  ;;  %v2013_v2 = vmul.f32 %v2901_v20, %v5748_v4  ;;  %v2009_v53 = vor.u32 1.1754944e-38, %v2008_v63 }
 0x1ef   : > { %v2000_v9 = vmul.f32 %v2899_v8, %v1999_v21  ;;  %v2023_v49 = vand.u32 2147483648, %v5748_v4  ;;  %2902 = vrcp.f32 %v5807_v42  ;;  %vm2018_vm15 = vweird.f32 %v2901_v20 }
 0x1f0   : > { %v1986_v45 = vadd.f32 %v2897_v43, %v1985_v13  ;;  %v2014_v56 = vsub.f32 1.0, %v2013_v2  ;;  %vm5831_vm14 = vcmp.eq.f32.partialorder %v2021_v62, 8.507059e+37  ;;  %v1981_v22 = vmul.f32 -176.61504, %v1980_v7  ;;  %vm5849_vm0 = vmor %vm2017_vm6, %vm2018_vm15 }
 0x1f1   : > { %v2001_v3 = vadd.f32 %v2899_v8, %v2000_v9  ;;  %v5836_v63 = vadd.f32 5.0, %v5414_v25  ;;  %2904 = vrcp.f32 %v5812_v5  ;;  %v1962_v41 = vadd.f32 %v1958_v37, %v5719_v34 }
 0x1f2   : > { %v1990_v61 = vsel %vm5819_vm10, %v2897_v43, %v1986_v45  ;;  %v2015_v50 = vmul.f32 %v2901_v20, %v2014_v56  ;;  %v2044_v21 = vand.u32 2147483647, %v5807_v42  ;;  %v2024_v2 = vor.u32 1.1754944e-38, %v2023_v49 }
 0x1f3   : > { %v1995_v62 = vsel %vm5781_vm8, %v1994_v46, %v1990_v61  ;;  %v2005_v7 = vsel %vm5827_vm12, %v2899_v8, %v2001_v3  ;;  %v2046_v34 = vand.u32 2147483648, %v5807_v42  ;;  %v5857_v32 = vadd.f32 5.0, %v5419_v24 }
 0x1f4   : > { %v2010_v43 = vsel %vm5802_vm9, %v2009_v53, %v2005_v7  ;;  %v2016_v37 = vadd.f32 %v2901_v20, %v2015_v50  ;;  %vm2040_vm1 = vweird.f32 %v5807_v42  ;;  %v1996_v46 = vmul.f32 -176.61504, %v1995_v62 }
 0x1f5   : > { %v2903_v60 = vpop.eup %2902  ;;  %v5861_v4 = vadd.f32 %v1981_v22, %v5771_v26  ;;  %v2059_v8 = vand.u32 2147483647, %v5812_v5  ;;  %2906 = vrcp.f32 %v5836_v63  ;;  %v2011_v9 = vmul.f32 -176.61504, %v2010_v43 }
 0x1f6   : > { %v2020_v40 = vsel %vm5849_vm0, %v2901_v20, %v2016_v37  ;;  %v2036_v53 = vmul.f32 %v2903_v60, %v5807_v42  ;;  %vm5868_vm2 = vcmp.eq.f32.partialorder %v2044_v21, 8.507059e+37  ;;  %vm2041_vm7 = vweird.f32 %v2903_v60 }
 0x1f7   : > { %v2905_v45 = vpop.eup %2904  ;;  %v2047_v29 = vor.u32 1.1754944e-38, %v2046_v34  ;;  %vm2055_vm3 = vweird.f32 %v5812_v5  ;;  %v2061_v26 = vand.u32 2147483648, %v5812_v5  ;;  %v2025_v56 = vsel %vm5831_vm14, %v2024_v2, %v2020_v40  ;;  %vm5893_vm6 = vmor %vm2040_vm1, %vm2041_vm7 }
 0x1f8   : > { %v2037_v22 = vsub.f32 1.0, %v2036_v53  ;;  %v2051_v3 = vmul.f32 %v2905_v45, %v5812_v5  ;;  %v2074_v20 = vand.u32 2147483647, %v5836_v63  ;;  %v5879_v61 = vadd.f32 %v1996_v46, %v5777_v31 }
 0x1f9   : > { %vm5881_vm8 = vcmp.eq.f32.partialorder %v2059_v8, 8.507059e+37  ;;  %vm2070_vm4 = vweird.f32 %v5836_v63  ;;  %2908 = vrcp.f32 %v5857_v32  ;;  %v5888_v21 = vadd.f32 %v2011_v9, %v5787_v16 }
 0x1fa   : > { %v2038_v0 = vmul.f32 %v2903_v60, %v2037_v22  ;;  %v2052_v62 = vsub.f32 1.0, %v2051_v3  ;;  %vm2056_vm5 = vweird.f32 %v2905_v45  ;;  %v2026_v13 = vmul.f32 -176.61504, %v2025_v56 }
 0x1fb   : > { %v2907_v7 = vpop.eup %2906  ;;  %v2062_v2 = vor.u32 1.1754944e-38, %v2061_v26  ;;  %v2076_v34 = vand.u32 2147483648, %v5836_v63  ;;  %v5899_v43 = vadd.f32 6.0, %v5396_v6  ;;  %vm5902_vm11 = vcmp.eq.f32.partialorder %v2074_v20, 8.507059e+37  ;;  %vm5908_vm9 = vmor %vm2055_vm3, %vm2056_vm5 }
 0x1fc   : > { %v2039_v16 = vadd.f32 %v2903_v60, %v2038_v0  ;;  %v2053_v37 = vmul.f32 %v2905_v45, %v2052_v62  ;;  %v2066_v46 = vmul.f32 %v2907_v7, %v5836_v63  ;;  %vm2071_vm13 = vweird.f32 %v2907_v7 }
 0x1fd   : > { %vm2085_vm10 = vweird.f32 %v5857_v32  ;;  %v2089_v9 = vand.u32 2147483647, %v5857_v32  ;;  %v2091_v40 = vand.u32 2147483648, %v5857_v32  ;;  %2910 = vrcp.f32 %v5899_v43  ;;  %vm5936_vm12 = vmor %vm2070_vm4, %vm2071_vm13 }
 0x1fe   : > { %v2043_v53 = vsel %vm5893_vm6, %v2903_v60, %v2039_v16  ;;  %v2054_v26 = vadd.f32 %v2905_v45, %v2053_v37  ;;  %v2067_v56 = vsub.f32 1.0, %v2066_v46  ;;  %v5918_v5 = vadd.f32 %v2026_v13, %v1962_v41 }
 0x1ff   : > { %v2909_v22 = vpop.eup %2908  ;;  %v2077_v3 = vor.u32 1.1754944e-38, %v2076_v34  ;;  %v5921_v20 = vadd.f32 6.0, %v5401_v44  ;;  %v5924_v0 = vadd.f32 6.0, %v5414_v25  ;;  %v2048_v62 = vsel %vm5868_vm2, %v2047_v29, %v2043_v53 }
 0x200   : > { %v2058_v60 = vsel %vm5908_vm9, %v2905_v45, %v2054_v26  ;;  %v2068_v31 = vmul.f32 %v2907_v7, %v2067_v56  ;;  %v2081_v16 = vmul.f32 %v2909_v22, %v5857_v32  ;;  %vm5940_vm15 = vcmp.eq.f32.partialorder %v2089_v9, 8.507059e+37 }
 0x201   : > { %v2063_v41 = vsel %vm5881_vm8, %v2062_v2, %v2058_v60  ;;  %v2092_v49 = vor.u32 1.1754944e-38, %v2091_v40  ;;  %v2112_v45 = vand.u32 2147483647, %v5899_v43  ;;  %vm2086_vm14 = vweird.f32 %v2909_v22 }
 0x202   : > { %v2069_v29 = vadd.f32 %v2907_v7, %v2068_v31  ;;  %v2082_v37 = vsub.f32 1.0, %v2081_v16  ;;  %v2114_v50 = vand.u32 2147483648, %v5899_v43  ;;  %v2049_v2 = vmul.f32 12.507343, %v2048_v62  ;;  %vm5958_vm1 = vmor %vm2085_vm10, %vm2086_vm14 }
 0x203   : > { %v5947_v46 = vadd.f32 6.0, %v5419_v24  ;;  %vm2108_vm0 = vweird.f32 %v5899_v43  ;;  %2912 = vrcp.f32 %v5921_v20  ;;  %v2911_v63 = vpop.eup %2910  ;;  %v2064_v42 = vmul.f32 12.507343, %v2063_v41 }
 0x204   : > { %v2073_v9 = vsel %vm5936_vm12, %v2907_v7, %v2069_v29  ;;  %v2083_v40 = vmul.f32 %v2909_v22, %v2082_v37  ;;  %2914 = vrcp.f32 %v5924_v0  ;;  %v2104_v56 = vmul.f32 %v2911_v63, %v5899_v43 }
 0x205   : > { %v2078_v53 = vsel %vm5902_vm11, %v2077_v3, %v2073_v9  ;;  %v2127_v62 = vand.u32 2147483647, %v5921_v20  ;;  %v2129_v60 = vand.u32 2147483648, %v5921_v20  ;;  %vm5965_vm2 = vcmp.eq.f32.partialorder %v2112_v45, 8.507059e+37 }
 0x206   : > { %v2079_v31 = vmul.f32 12.507343, %v2078_v53  ;;  %v2084_v7 = vadd.f32 %v2909_v22, %v2083_v40  ;;  %v2115_v8 = vor.u32 1.1754944e-38, %v2114_v50  ;;  %v5970_v3 = vadd.f32 %v2049_v2, %v5861_v4 }
 0x207   : > { %v2105_v32 = vsub.f32 1.0, %v2104_v56  ;;  %vm2109_vm7 = vweird.f32 %v2911_v63  ;;  %2916 = vrcp.f32 %v5947_v46  ;;  %v5976_v13 = vadd.f32 %v2064_v42, %v5879_v61 }
 0x208   : > { %v2088_v41 = vsel %vm5958_vm1, %v2909_v22, %v2084_v7  ;;  %vm2123_vm3 = vweird.f32 %v5921_v20  ;;  %v2142_v45 = vand.u32 2147483647, %v5924_v0  ;;  %vm5980_vm8 = vcmp.eq.f32.partialorder %v2127_v62, 8.507059e+37  ;;  %vm5990_vm5 = vmor %vm2108_vm0, %vm2109_vm7 }
 0x209   : > { %v2913_v29 = vpop.eup %2912  ;;  %v2106_v37 = vmul.f32 %v2911_v63, %v2105_v32  ;;  %v2130_v4 = vor.u32 1.1754944e-38, %v2129_v60  ;;  %vm2138_vm4 = vweird.f32 %v5924_v0  ;;  %v5986_v9 = vadd.f32 %v2079_v31, %v5888_v21 }
 0x20a   : > { %v2915_v2 = vpop.eup %2914  ;;  %v2119_v22 = vmul.f32 %v2913_v29, %v5921_v20  ;;  %v2144_v42 = vand.u32 2147483648, %v5924_v0  ;;  %vm2153_vm6 = vweird.f32 %v5947_v46  ;;  %v2093_v40 = vsel %vm5940_vm15, %v2092_v49, %v2088_v41 }
 0x20b   : > { %v2107_v53 = vadd.f32 %v2911_v63, %v2106_v37  ;;  %v2134_v26 = vmul.f32 %v2915_v2, %v5924_v0  ;;  %v2157_v21 = vand.u32 2147483647, %v5947_v46  ;;  %vm2124_vm11 = vweird.f32 %v2913_v29 }
 0x20c   : > { %v2120_v56 = vsub.f32 1.0, %v2119_v22  ;;  %vm6001_vm9 = vcmp.eq.f32.partialorder %v2142_v45, 8.507059e+37  ;;  %v6006_v62 = vadd.f32 7.0, %v5396_v6  ;;  %vm2139_vm13 = vweird.f32 %v2915_v2  ;;  %vm6018_vm10 = vmor %vm2123_vm3, %vm2124_vm11 }
 0x20d   : > { %v2917_v60 = vpop.eup %2916  ;;  %v2111_v31 = vsel %vm5990_vm5, %v2911_v63, %v2107_v53  ;;  %v2135_v34 = vsub.f32 1.0, %v2134_v26  ;;  %v6011_v49 = vadd.f32 7.0, %v5401_v44  ;;  %v2094_v7 = vmul.f32 12.507343, %v2093_v40  ;;  %vm6026_vm12 = vmor %vm2138_vm4, %vm2139_vm13 }
 0x20e   : > { %v2116_v32 = vsel %vm5965_vm2, %v2115_v8, %v2111_v31  ;;  %v2121_v41 = vmul.f32 %v2913_v29, %v2120_v56  ;;  %v2149_v45 = vmul.f32 %v2917_v60, %v5947_v46  ;;  %v2145_v63 = vor.u32 1.1754944e-38, %v2144_v42 }
 0x20f   : > { %v2136_v61 = vmul.f32 %v2915_v2, %v2135_v34  ;;  %v2159_v22 = vand.u32 2147483648, %v5947_v46  ;;  %2918 = vrcp.f32 %v6006_v62  ;;  %vm2154_vm15 = vweird.f32 %v2917_v60 }
 0x210   : > { %v2122_v53 = vadd.f32 %v2913_v29, %v2121_v41  ;;  %v2150_v8 = vsub.f32 1.0, %v2149_v45  ;;  %vm6030_vm14 = vcmp.eq.f32.partialorder %v2157_v21, 8.507059e+37  ;;  %v2117_v40 = vmul.f32 -0.1385711, %v2116_v32  ;;  %vm6048_vm0 = vmor %vm2153_vm6, %vm2154_vm15 }
 0x211   : > { %v2137_v26 = vadd.f32 %v2915_v2, %v2136_v61  ;;  %v6035_v42 = vadd.f32 7.0, %v5414_v25  ;;  %2920 = vrcp.f32 %v6011_v49  ;;  %v2098_v56 = vadd.f32 %v2094_v7, %v5918_v5 }
 0x212   : > { %v2126_v0 = vsel %vm6018_vm10, %v2913_v29, %v2122_v53  ;;  %v2151_v31 = vmul.f32 %v2917_v60, %v2150_v8  ;;  %v2180_v34 = vand.u32 2147483647, %v6006_v62  ;;  %v2160_v45 = vor.u32 1.1754944e-38, %v2159_v22 }
 0x213   : > { %v2131_v21 = vsel %vm5980_vm8, %v2130_v4, %v2126_v0  ;;  %v2141_v32 = vsel %vm6026_vm12, %v2915_v2, %v2137_v26  ;;  %v2182_v5 = vand.u32 2147483648, %v6006_v62  ;;  %v6056_v37 = vadd.f32 7.0, %v5419_v24 }
 0x214   : > { %v2146_v29 = vsel %vm6001_vm9, %v2145_v63, %v2141_v32  ;;  %v2152_v7 = vadd.f32 %v2917_v60, %v2151_v31  ;;  %vm2176_vm1 = vweird.f32 %v6006_v62  ;;  %v2132_v4 = vmul.f32 -0.1385711, %v2131_v21 }
 0x215   : > { %v2919_v50 = vpop.eup %2918  ;;  %v6060_v46 = vadd.f32 %v2117_v40, %v5970_v3  ;;  %v2195_v2 = vand.u32 2147483647, %v6011_v49  ;;  %2922 = vrcp.f32 %v6035_v42  ;;  %v2147_v61 = vmul.f32 -0.1385711, %v2146_v29 }
 0x216   : > { %v2156_v43 = vsel %vm6048_vm0, %v2917_v60, %v2152_v7  ;;  %v2172_v63 = vmul.f32 %v2919_v50, %v6006_v62  ;;  %vm6067_vm2 = vcmp.eq.f32.partialorder %v2180_v34, 8.507059e+37  ;;  %vm2177_vm7 = vweird.f32 %v2919_v50 }
 0x217   : > { %v2921_v53 = vpop.eup %2920  ;;  %v2183_v16 = vor.u32 1.1754944e-38, %v2182_v5  ;;  %vm2191_vm3 = vweird.f32 %v6011_v49  ;;  %v2197_v3 = vand.u32 2147483648, %v6011_v49  ;;  %v2161_v8 = vsel %vm6030_vm14, %v2160_v45, %v2156_v43  ;;  %vm6092_vm6 = vmor %vm2176_vm1, %vm2177_vm7 }
 0x218   : > { %v2173_v40 = vsub.f32 1.0, %v2172_v63  ;;  %v2187_v26 = vmul.f32 %v2921_v53, %v6011_v49  ;;  %v2210_v60 = vand.u32 2147483647, %v6035_v42  ;;  %v6078_v0 = vadd.f32 %v2132_v4, %v5976_v13 }
 0x219   : > { %vm6080_vm8 = vcmp.eq.f32.partialorder %v2195_v2, 8.507059e+37  ;;  %vm2206_vm4 = vweird.f32 %v6035_v42  ;;  %2924 = vrcp.f32 %v6056_v37  ;;  %v6087_v34 = vadd.f32 %v2147_v61, %v5986_v9 }
 0x21a   : > { %v2174_v20 = vmul.f32 %v2919_v50, %v2173_v40  ;;  %v2188_v21 = vsub.f32 1.0, %v2187_v26  ;;  %vm2192_vm5 = vweird.f32 %v2921_v53  ;;  %v2162_v41 = vmul.f32 -0.1385711, %v2161_v8 }
 0x21b   : > { %v2923_v32 = vpop.eup %2922  ;;  %v2198_v45 = vor.u32 1.1754944e-38, %v2197_v3  ;;  %v2212_v5 = vand.u32 2147483648, %v6035_v42  ;;  %v6098_v29 = vadd.f32 8.0, %v5396_v6  ;;  %vm6101_vm11 = vcmp.eq.f32.partialorder %v2210_v60, 8.507059e+37  ;;  %vm6107_vm9 = vmor %vm2191_vm3, %vm2192_vm5 }
 0x21c   : > { %v2175_v9 = vadd.f32 %v2919_v50, %v2174_v20  ;;  %v2189_v7 = vmul.f32 %v2921_v53, %v2188_v21  ;;  %v2202_v4 = vmul.f32 %v2923_v32, %v6035_v42  ;;  %vm2207_vm13 = vweird.f32 %v2923_v32 }
 0x21d   : > { %vm2221_vm10 = vweird.f32 %v6056_v37  ;;  %v2225_v43 = vand.u32 2147483647, %v6056_v37  ;;  %v2227_v63 = vand.u32 2147483648, %v6056_v37  ;;  %2926 = vrcp.f32 %v6098_v29  ;;  %vm6135_vm12 = vmor %vm2206_vm4, %vm2207_vm13 }
 0x21e   : > { %v2179_v3 = vsel %vm6092_vm6, %v2919_v50, %v2175_v9  ;;  %v2190_v8 = vadd.f32 %v2921_v53, %v2189_v7  ;;  %v2203_v40 = vsub.f32 1.0, %v2202_v4  ;;  %v6117_v60 = vadd.f32 %v2162_v41, %v2098_v56 }
 0x21f   : > { %v2925_v26 = vpop.eup %2924  ;;  %v2213_v20 = vor.u32 1.1754944e-38, %v2212_v5  ;;  %v6120_v21 = vadd.f32 8.0, %v5401_v44  ;;  %v6123_v39 = vadd.f32 8.0, %v5414_v25  ;;  %v2184_v23 = vsel %vm6067_vm2, %v2183_v16, %v2179_v3 }
 0x220   : > { %v2194_v50 = vsel %vm6107_vm9, %v2921_v53, %v2190_v8  ;;  %v2204_v13 = vmul.f32 %v2923_v32, %v2203_v40  ;;  %v2217_v9 = vmul.f32 %v2925_v26, %v6056_v37  ;;  %vm6139_vm15 = vcmp.eq.f32.partialorder %v2225_v43, 8.507059e+37 }
 0x221   : > { %v2199_v56 = vsel %vm6080_vm8, %v2198_v45, %v2194_v50  ;;  %v2228_v22 = vor.u32 1.1754944e-38, %v2227_v63  ;;  %v2248_v53 = vand.u32 2147483647, %v6098_v29  ;;  %vm2222_vm14 = vweird.f32 %v2925_v26 }
 0x222   : > { %v2205_v16 = vadd.f32 %v2923_v32, %v2204_v13  ;;  %v2218_v7 = vsub.f32 1.0, %v2217_v9  ;;  %v2250_v31 = vand.u32 2147483648, %v6098_v29  ;;  %v2185_v45 = vmul.f32 9.984369e-06, %v2184_v23  ;;  %vm6157_vm1 = vmor %vm2221_vm10, %vm2222_vm14 }
 0x223   : > { %v6146_v4 = vadd.f32 8.0, %v5419_v24  ;;  %vm2244_vm0 = vweird.f32 %v6098_v29  ;;  %2928 = vrcp.f32 %v6120_v21  ;;  %v2927_v61 = vpop.eup %2926  ;;  %v2200_v43 = vmul.f32 9.984369e-06, %v2199_v56 }
 0x224   : > { %v2209_v63 = vsel %vm6135_vm12, %v2923_v32, %v2205_v16  ;;  %v2219_v3 = vmul.f32 %v2925_v26, %v2218_v7  ;;  %2930 = vrcp.f32 %v6123_v39  ;;  %v2240_v40 = vmul.f32 %v2927_v61, %v6098_v29 }
 0x225   : > { %v2214_v8 = vsel %vm6101_vm11, %v2213_v20, %v2209_v63  ;;  %v2263_v50 = vand.u32 2147483647, %v6120_v21  ;;  %v2265_v13 = vand.u32 2147483648, %v6120_v21  ;;  %vm6164_vm2 = vcmp.eq.f32.partialorder %v2248_v53, 8.507059e+37 }
 0x226   : > { %v2215_v9 = vmul.f32 9.984369e-06, %v2214_v8  ;;  %v2220_v32 = vadd.f32 %v2925_v26, %v2219_v3  ;;  %v2251_v2 = vor.u32 1.1754944e-38, %v2250_v31  ;;  %v2231_v20 = vadd.f32 %v2185_v45, %v6060_v46 }
 0x227   : > { %v2241_v41 = vsub.f32 1.0, %v2240_v40  ;;  %vm2245_vm7 = vweird.f32 %v2927_v61  ;;  %2932 = vrcp.f32 %v6146_v4  ;;  %vm2259_vm3 = vweird.f32 %v6120_v21 }
 0x228   : > { %v2224_v16 = vsel %vm6157_vm1, %v2925_v26, %v2220_v32  ;;  %v2278_v7 = vand.u32 2147483647, %v6123_v39  ;;  %v2280_v63 = vand.u32 2147483648, %v6123_v39  ;;  %v2232_v3 = vadd.f32 %v2200_v43, %v6078_v0  ;;  %vm6183_vm4 = vmor %vm2244_vm0, %vm2245_vm7 }
 0x229   : > { %v2929_v53 = vpop.eup %2928  ;;  %v2242_v8 = vmul.f32 %v2927_v61, %v2241_v41  ;;  %vm6176_vm8 = vcmp.eq.f32.partialorder %v2263_v50, 8.507059e+37  ;;  %v2266_v46 = vor.u32 1.1754944e-38, %v2265_v13  ;;  %v2233_v40 = vadd.f32 %v2215_v9, %v6087_v34 }
 0x22a   : > { %v2931_v45 = vpop.eup %2930  ;;  %v2255_v23 = vmul.f32 %v2929_v53, %v6120_v21  ;;  %vm2274_vm5 = vweird.f32 %v6123_v39  ;;  %vm2289_vm6 = vweird.f32 %v6146_v4  ;;  %v2229_v0 = vsel %vm6139_vm15, %v2228_v22, %v2224_v16 }
 0x22b   : > { %v2243_v43 = vadd.f32 %v2927_v61, %v2242_v8  ;;  %v2270_v50 = vmul.f32 %v2931_v45, %v6123_v39  ;;  %v2293_v34 = vand.u32 2147483647, %v6146_v4  ;;  %vm2260_vm11 = vweird.f32 %v2929_v53 }
 0x22c   : > { %v2256_v13 = vsub.f32 1.0, %v2255_v23  ;;  %vm6194_vm9 = vcmp.eq.f32.partialorder %v2278_v7, 8.507059e+37  ;;  %v2281_v9 = vor.u32 1.1754944e-38, %v2280_v63  ;;  %vm2275_vm13 = vweird.f32 %v2931_v45  ;;  %vm6211_vm10 = vmor %vm2259_vm3, %vm2260_vm11 }
 0x22d   : > { %v2933_v32 = vpop.eup %2932  ;;  %v2247_v41 = vsel %vm6183_vm4, %v2927_v61, %v2243_v43  ;;  %v2271_v15 = vsub.f32 1.0, %v2270_v50  ;;  %v6201_v5 = vadd.f32 0.5, %v6006_v62  ;;  %v6207_v7 = vadd.f32 0.5, %v6011_v49  ;;  %vm6221_vm12 = vmor %vm2274_vm5, %vm2275_vm13 }
 0x22e   : > { %v2252_v22 = vsel %vm6164_vm2, %v2251_v2, %v2247_v41  ;;  %v2257_v16 = vmul.f32 %v2929_v53, %v2256_v13  ;;  %v2285_v8 = vmul.f32 %v2933_v32, %v6146_v4  ;;  %v2295_v62 = vand.u32 2147483648, %v6146_v4 }
 0x22f   : > { %v2253_v23 = vmul.f32 1.5056327e-07, %v2252_v22  ;;  %v2272_v61 = vmul.f32 %v2931_v45, %v2271_v15  ;;  %v6217_v26 = vadd.f32 0.5, %v6035_v42  ;;  %vm2290_vm15 = vweird.f32 %v2933_v32 }
 0x230   : > { %v2258_v56 = vadd.f32 %v2929_v53, %v2257_v16  ;;  %v2286_v49 = vsub.f32 1.0, %v2285_v8  ;;  %v6226_v21 = vadd.f32 0.5, %v6056_v37  ;;  %v2230_v43 = vmul.f32 9.984369e-06, %v2229_v0  ;;  %vm6242_vm0 = vmor %vm2289_vm6, %vm2290_vm15 }
 0x231   : > { %v2273_v50 = vadd.f32 %v2931_v45, %v2272_v61  ;;  %v2299_v15 = vadd.f32 %v2253_v23, %v2231_v20  ;;  %2934 = vlog2.f32 %v6201_v5  ;;  %vm6231_vm14 = vcmp.eq.f32.partialorder %v2293_v34, 8.507059e+37 }
 0x232   : > { %v2262_v42 = vsel %vm6211_vm10, %v2929_v53, %v2258_v56  ;;  %v2287_v13 = vmul.f32 %v2933_v32, %v2286_v49  ;;  %2936 = vlog2.f32 %v6207_v7  ;;  %v2296_v53 = vor.u32 1.1754944e-38, %v2295_v62 }
 0x233   : > { %v2267_v41 = vsel %vm6176_vm8, %v2266_v46, %v2262_v42  ;;  %v2277_v37 = vsel %vm6221_vm12, %v2931_v45, %v2273_v50  ;;  %2938 = vlog2.f32 %v6217_v26  ;;  %v1724_v31 = vsub.f32 %v5469_v52, %v5423_v19 }
 0x234   : > { %v2268_v0 = vmul.f32 1.5056327e-07, %v2267_v41  ;;  %v2282_v34 = vsel %vm6194_vm9, %v2281_v9, %v2277_v37  ;;  %v2288_v22 = vadd.f32 %v2933_v32, %v2287_v13  ;;  %2940 = vlog2.f32 %v6226_v21 }
 0x235   : > { %v6253_v46 = vmul.f32 0.6931472, %v5449_v18  ;;  %v2283_v4 = vmul.f32 1.5056327e-07, %v2282_v34  ;;  %2942 = vlog2.f32 %v2299_v15  ;;  %v2234_v45 = vadd.f32 %v2230_v43, %v6117_v60 }
 0x236   : > { %v2292_v16 = vsel %vm6242_vm0, %v2933_v32, %v2288_v22  ;;  %v2300_v8 = vadd.f32 %v2268_v0, %v2232_v3  ;;  %v2307_v29 = vadd.f32 0.5, %v5396_v6  ;;  %v1748_v23 = vmul.f32 0.6931472, %v5462_v10 }
 0x237   : > { %v2935_v9 = vpop.eup %2934  ;;  %v2297_v63 = vsel %vm6231_vm14, %v2296_v53, %v2292_v16  ;;  %v2301_v19 = vadd.f32 %v2283_v4, %v2233_v40  ;;  %v2308_v18 = vadd.f32 0.5, %v5401_v44  ;;  %v2309_v62 = vadd.f32 0.5, %v5414_v25 }
 0x238   : > { %v2937_v52 = vpop.eup %2936  ;;  %v2298_v61 = vmul.f32 1.5056327e-07, %v2297_v63  ;;  %v2312_v60 = vmul.f32 0.6931472, %v2935_v9  ;;  %2944 = vlog2.f32 %v2300_v8  ;;  %v1718_v3 = vmul.f32 0.6931472, %v5476_v1 }
 0x239   : > { %v2939_v56 = vpop.eup %2938  ;;  %v2310_v6 = vadd.f32 0.5, %v5419_v24  ;;  %v2314_v32 = vmul.f32 0.6931472, %v2937_v52  ;;  %2946 = vlog2.f32 %v2301_v19  ;;  %v1725_v2 = vsub.f32 %v5471_v57, %v5427_v54  ;;  %v2958_v19 = vld [vmem:[%s3320_s13] sm:$0xff] }
 0x23a   : > { %v2941_v10 = vpop.eup %2940  ;;  %v2302_v40 = vadd.f32 %v2298_v61, %v2234_v45  ;;  %v2316_v49 = vmul.f32 0.6931472, %v2939_v56  ;;  %v2319_v44 = vmul.f32 %v2312_v60, %v2307_v29  ;;  %v1750_v50 = vmul.f32 0.6931472, %v5481_v38  ;;  %v6726_v56 = vld [vmem:[#allocation15_spill] sm:$0xff] }
 0x23b   : > { %v2943_v43 = vpop.eup %2942  ;;  %v1752_v25 = vmul.f32 0.6931472, %v5489_v36  ;;  %v2318_v15 = vmul.f32 0.6931472, %v2941_v10  ;;  %v2320_v42 = vmul.f32 %v2314_v32, %v2308_v18  ;;  %v6720_v24 = vsub.f32 %v5441_v28, %v5356_v11  ;;  %v6728_v32 = vld [vmem:[#allocation17_spill] sm:$0xff] }
 0x23c   : > { %v2321_v13 = vmul.f32 %v2316_v49, %v2309_v62  ;;  %v2323_v1 = vadd.f32 0.9189385, %v2319_v44  ;;  %v2332_v39 = vmul.f32 0.6931472, %v2943_v43  ;;  %2948 = vlog2.f32 %v2302_v40  ;;  %v2960_v62 = vld [vmem:[%s3320_s13 + $0x10] sm:$0xff] }
 0x23d   : > { %v1722_v41 = vadd.f32 %v1718_v3, %v6720_v24  ;;  %v6721_v54 = vsub.f32 %v5451_v14, %v5411_v59  ;;  %v2322_v37 = vmul.f32 %v2318_v15, %v2310_v6  ;;  %v2324_v20 = vadd.f32 0.9189385, %v2320_v42  ;;  %v6730_v40 = vld [vmem:[#allocation16_spill] sm:$0xff] }
 0x23e   : > { %v2945_v38 = vpop.eup %2944  ;;  %v1754_v36 = vmul.f32 0.6931472, %v5506_v30  ;;  %v1755_v53 = vadd.f32 %v1748_v23, %v5456_v51  ;;  %v2325_v0 = vadd.f32 0.9189385, %v2321_v13  ;;  %v2327_v34 = vsub.f32 %v2323_v1, %v6201_v5 }
 0x23f   : > { %v1727_v57 = vsub.f32 %v4554_v47, %v6721_v54  ;;  %v2947_v22 = vpop.eup %2946  ;;  %v1756_v4 = vadd.f32 %v1750_v50, %v5458_v27  ;;  %v2326_v11 = vadd.f32 0.9189385, %v2322_v37  ;;  %v2328_v28 = vsub.f32 %v2324_v20, %v6207_v7  ;;  %v2961_v50 = vld [vmem:[%s3320_s13 + $0x18] sm:$0xff] }
 0x240   : > { %v2334_v45 = vmul.f32 0.6931472, %v2945_v38  ;;  %v1757_v59 = vadd.f32 %v1752_v25, %v5473_v17  ;;  %v2329_v47 = vsub.f32 %v2325_v0, %v6217_v26  ;;  %v2336_v14 = vmul.f32 0.6931472, %v2947_v22 }
 0x241   : > { %v2339_v16 = vadd.f32 %v2332_v39, %v2327_v34  ;;  %v1726_v30 = vsub.f32 %v1722_v41, %v5435_v55  ;;  %v1728_v51 = vsub.f32 %v4596_v33, %v1724_v31  ;;  %v2330_v5 = vsub.f32 %v2326_v11, %v6226_v21  ;;  %v6723_v33 = vld [vmem:[#allocation20_spill] sm:$0xff]  ;;  %v2363_v34 = vld [vmem:[#allocation10] sm:$0x1] }
 0x242   : > { %v2340_v8 = vadd.f32 %v2334_v45, %v2328_v28  ;;  %v2949_v27 = vpop.eup %2948  ;;  %v6722_v29 = vmax.f32 %v3423_v35, 0.0  ;;  %v1729_v17 = vsub.f32 %v5389_v58, %v1725_v2  ;;  %v2341_v9 = vadd.f32 %v2336_v14, %v2329_v47  ;;  %v2959_v35 = vld [vmem:[%s3320_s13 + $0x8] sm:$0xff] }
 0x243   : > { %v2343_v26 = vsub.f32 %v2339_v16, %v1755_v53  ;;  %v1758_v23 = vadd.f32 %v1754_v36, %v6253_v46  ;;  %v2338_v63 = vmul.f32 0.6931472, %v2949_v27  ;;  %vm2351_vm1 = vcmp.lt.f32.partialorder %v2958_v19, 1e-08  ;;  %v6725_v46 = vld [vmem:[#allocation18_spill] sm:$0xff] }
 0x244   : > { %v458_v7 = vadd.f32 %v4421_v48, %v6722_v29  ;;  %v2344_v55 = vsub.f32 %v2340_v8, %v1756_v4  ;;  %v461_v21 = vsub.f32 %v6723_v33, %v3457_v12  ;;  %v2345_v31 = vsub.f32 %v2341_v9, %v1757_v59  ;;  %v6724_v48 = vld [vmem:[#allocation21_spill] sm:$0xff]  ;;  %v6729_v12 = vld [vmem:[#allocation19_spill] sm:$0xff] }
 0x245   : > { %v2347_v18 = vsub.f32 %v1727_v57, %v2343_v26  ;;  %vm2352_vm2 = vcmp.lt.f32.partialorder %v2959_v35, 1e-08  ;;  %v1730_v52 = vsub.f32 %v6724_v48, %v1726_v30  ;;  %v2342_v58 = vadd.f32 %v2338_v63, %v2330_v5 }
 0x246   : > { %v2348_v61 = vsub.f32 %v1728_v51, %v2344_v55  ;;  %vm2353_vm7 = vcmp.lt.f32.partialorder %v2960_v62, 1e-08  ;;  %v2349_v60 = vsub.f32 %v1729_v17, %v2345_v31  ;;  %v6727_v3 = vsub.f32 %v6725_v46, %v6726_v56 }
 0x247   : > { %v462_v10 = vsub.f32 %v458_v7, %v6728_v32  ;;  %v2346_v2 = vsub.f32 %v2342_v58, %v1758_v23  ;;  %v6731_v49 = vsub.f32 %v6729_v12, %v6730_v40  ;;  %vm2354_vm3 = vcmp.lt.f32.partialorder %v2961_v50, 1e-08 }
 0x248   : > { %v2355_v6 = vsel %vm2351_vm1, %v6727_v3, %v2347_v18  ;;  %v2357_v25 = vsel %vm2353_vm7, %v461_v21, %v2349_v60  ;;  %vm2378_vm8 = vcmask 0  }
 0x249   : > { %v2356_v44 = vsel %vm2352_vm2, %v6731_v49, %v2348_v61  ;;  %v2359_v43 = vsub.f32 0.0, %v2355_v6  ;;  %v2350_v42 = vsub.f32 %v1730_v52, %v2346_v2  ;;  %v2361_v13 = vsub.f32 0.0, %v2357_v25 }
 0x24a   : > { %v2360_v15 = vsub.f32 0.0, %v2356_v44 }
 0x24b   : > { %v2358_v39 = vsel %vm2354_vm3, %v462_v10, %v2350_v42 }
 0x24c   : > { %v2364_v1 = vadd.f32 %v2360_v15, %v2359_v43  ;;  %v2362_v24 = vsub.f32 0.0, %v2358_v39 }
 0x24e   : > { %v2365_v41 = vadd.f32 %v2364_v1, %v2361_v13 }
 0x250   : > { %v2366_v54 = vadd.f32 %v2365_v41, %v2362_v24 }
 0x252   : > { %2367 = vadd.xlane.f32.xlu0 %v2366_v54 }
 0x2c5   : > { %v2368_v57 = vpop.xlane.xlu0 %2367 }
 0x2c6   : > { %v2369_v37 = vrot.slane %v2368_v57, 4 }
 0x2c8   : > { %v2370_v20 = vadd.f32 %v2369_v37, %v2368_v57 }
 0x2ca   : > { %v2371_v38 = vrot.slane %v2370_v20, 2 }
 0x2cc   : > { %v2372_v36 = vadd.f32 %v2371_v38, %v2370_v20 }
 0x2ce   : > { %v2373_v53 = vrot.slane %v2372_v36, 1 }
 0x2d0   : > { %v2374_v0 = vadd.f32 %v2373_v53, %v2372_v36 }
 0x2d2   : > { %2542 = vpush %v2374_v0 }
 0x303   : > { %s2543_s24 = spop %2542  ;;  %2383 = sbr.rel (%p2533_p7) target bundleno = 786 (0x312), region = 60 }
 0x304   : > { %v2376_v22 = vstv %s2543_s24 }
 0x305   : > { %v2377_v4 = vadd.f32 %v2376_v22, %v2363_v34 }
 0x307   : > { %2379 = vst.msk [vmem:[#allocation10] sm:$0x1] %vm2378_vm8, %v2377_v4 }
 0x30e   : > { %v2384_v11 = vld [vmem:[#allocation10] sm:$0x1] }
 0x30f   : > { %v2385_v28 = vmul.f32 0.001953125, %v2384_v11 }
 0x311   : > { %2386 = vst.msk [vmem:[#allocation10] sm:$0x1] %vm2378_vm8, %v2385_v28 }
 0x312 PF: > { %p2570_p10 = scmp.eq.s32.totalorder %s3204_s19, 1  ;;  %s3159_s18 = smov [#allocation10]  }
 0x313   : > { %s2393_s9 = sshll.u32 %s3159_s18, 4  ;;  %s2395_s21 = sshll.u32 %s6328_s4, 4  ;;  %s2394_s9 = int_to_ptr.vmem [resolvable:$true] %s2393_s9  ;;  %s2396_s21 = int_to_ptr.hbm [resolvable:$true] %s2395_s21 }
 0x314   : > { %2553 = dma.vmem_to_hbm [thread:$0]  (%p2570_p10), %s2394_s9, 16, %s2396_s21, [#allocation4]  }
 0x315   : > { %3139 = dma.done.wait (%p2570_p10), [#allocation4], 16  }
 0x316   : > { %3141 = vsyncadd (%p2570_p10), [#allocation4], 4294967280 }
 0x317 PF: > { %p21_p5 = scmp.ge.s32.totalorder %s3207_s20, 4   ;;  %s6732_s15 = smov %s3148_s16 }
 0x318   : > { %s6733_s16 = smov %s3152_s17  ;;  %s6734_s17 = smov %s3217_s23 }
 0x319   : > { %s6735_s18 = smov %s3207_s20  ;;  %23 = sbr.rel (!%p21_p5) target bundleno = 8 (0x8), region = 118 }
 0x31e   :  { %2409 = vsyncpa [#allocation3], 1 }
 0x31f   :  { %2411 = vsyncpa [#allocation3 + $0x1], 1 }
 0x320   :  { %2412 = vsyncpa [#allocation6], 1 }
 0x321   :  { %2414 = vsyncpa [#allocation6 + $0x1], 1 }
 0x322   :  { %2415 = vsyncpa [#allocation9], 1 }
 0x323   :  { %2417 = vsyncpa [#allocation9 + $0x1], 1 }
 0x324   :  { %2418 = vsyncpa [#allocation4], 1 }
 0x325   :  { %2420 = vsyncpa [#allocation4 + $0x1], 1 }

</bundles_post_ra>
